<compile_context>
chip_gen: v7x
topology: tpu7x:2x2x1
jax: 0.10.0
libtpu: 0.0.40
codegen_flags: <defaults>
</compile_context>

<pallas_src>
import functools

import jax
import jax.numpy as jnp
from jax import lax
from jax.experimental import pallas as pl
from jax.experimental.pallas import tpu as pltpu

LANE = 128
_VMEM_LIMIT = 32 * 1024 * 1024


def _round_up(a, b):
    return (a + b - 1) // b * b


# --------------- fused conv3x3 + bias + ReLU + maxpool2x2 (one stage) ---------------

def _conv_relu_pool_kernel(x_ref, w_ref, b_ref, o_ref, *,
                           H, W, Wp, cin_p, taps, out_pitch):
    """One image per grid step.

    x_ref: (1, (H+3)*Wp, cin_p) bf16 zero-padded frame (valid pixel (i,j) at
           flat row (i+1)*Wp + (j+1)); the extra pitch row covers the flat
           tap over-read (max read index (H+2)*Wp + 1 < (H+3)*Wp).
    w_ref: (9*cin_p, cout_p) bf16, tap-major (t = di*3 + dj).
    b_ref: (1, cout_p) f32.
    o_ref: next stage's frame (1, (Ho+3)*out_pitch, cout_p) bf16, or plain
           pooled features (1, Ho*Wo, cout_p) when out_pitch is None.
    """
    cout_p = o_ref.shape[-1]
    x = x_ref[0]                                     # (frame_rows, cin_p)
    M = H * Wp                                       # flat conv rows (cols >= W are garbage)

    # 9-tap decomposition: uninterrupted f32 accumulation chain on the MXU.
    acc = jnp.zeros((M, cout_p), jnp.float32)
    for t, off in enumerate(taps):                   # statically unrolled
        xs = x[off:off + M, :]                       # static row-shifted window
        wt = w_ref[t * cin_p:(t + 1) * cin_p, :]     # (cin_p, cout_p)
        acc = acc + jnp.dot(xs, wt, preferred_element_type=jnp.float32)

    acc = jnp.maximum(acc + b_ref[...], 0.0)         # bias + ReLU in f32

    # 2x2 stride-2 max pool on the valid W columns (garbage pitch cols dropped).
    Ho, Wo = H // 2, W // 2
    y = acc.reshape(H, Wp, cout_p)[:, :W, :]                 # (H, W, C)
    yv = jnp.max(y.reshape(Ho, 2, W, cout_p), axis=1)        # (Ho, W, C)
    p = jnp.max(yv.reshape(Ho, Wo, 2, cout_p), axis=2)       # (Ho, Wo, C)
    p = p.astype(o_ref.dtype)

    if out_pitch is None:
        # Final stage: plain pooled features (spatial is 1x1 for this model).
        o_ref[0] = p.reshape(Ho * Wo, cout_p)
    else:
        # Write the next stage's zero-padded frame directly (no HBM pad op):
        # zero the whole frame, then store the Ho interior rows.
        o_ref[...] = jnp.zeros(o_ref.shape, o_ref.dtype)
        for i in range(Ho):                          # Ho is small at these sizes
            o_ref[0, pl.ds((i + 1) * out_pitch + 1, Wo), :] = p[i]


def conv_relu_pool(x, layer, *, H, W, out_pitch):
    """x: (N, (H+3)*Wp, cin_p) bf16 frame.  Returns the next frame
    (N, (Ho+3)*out_pitch, cout_p), or (N, Ho*Wo, cout_p) if out_pitch is None."""
    N, frame_rows, cin_p = x.shape
    Wp = frame_rows // (H + 3)
    assert frame_rows == (H + 3) * Wp and Wp % 8 == 0
    assert cin_p == layer["cin_p"]
    assert H % 2 == 0 and W % 2 == 0
    cout_p = layer["cout_p"]
    Ho, Wo = H // 2, W // 2

    if out_pitch is None:
        out_shape = jax.ShapeDtypeStruct((N, Ho * Wo, cout_p), jnp.bfloat16)
        out_block = (1, Ho * Wo, cout_p)
    else:
        out_shape = jax.ShapeDtypeStruct((N, (Ho + 3) * out_pitch, cout_p),
                                         jnp.bfloat16)
        out_block = (1, (Ho + 3) * out_pitch, cout_p)

    taps = tuple(di * Wp + dj for di in range(3) for dj in range(3))
    kernel = functools.partial(_conv_relu_pool_kernel, H=H, W=W, Wp=Wp,
                               cin_p=cin_p, taps=taps, out_pitch=out_pitch)
    return pl.pallas_call(
        kernel,
        out_shape=out_shape,
        grid=(N,),                                   # one image per step (2 steps -> both v7x TCs)
        in_specs=[
            pl.BlockSpec((1, frame_rows, cin_p), lambda n: (n, 0, 0)),
            # constant index_maps -> weights/bias fetched once, stay resident
            pl.BlockSpec((9 * cin_p, cout_p), lambda n: (0, 0)),
            pl.BlockSpec((1, cout_p), lambda n: (0, 0)),
        ],
        out_specs=pl.BlockSpec(out_block, lambda n: (n, 0, 0)),
        compiler_params=pltpu.CompilerParams(
            dimension_semantics=("parallel",),
            vmem_limit_bytes=_VMEM_LIMIT),
    )(x, layer["w"], layer["b"])


# ------------------------------- classifier (Linear) --------------------------------

def _linear_kernel(x_ref, w_ref, b_ref, o_ref):
    acc = jnp.dot(x_ref[...], w_ref[...], preferred_element_type=jnp.float32)
    o_ref[...] = (acc + b_ref[...]).astype(o_ref.dtype)


def linear(feat, lin):
    M, K = feat.shape
    w, b = lin["w"], lin["b"]
    assert w.shape[0] == K
    n_p = w.shape[1]
    m_p = _round_up(M, 8)
    xpad = jnp.pad(feat, ((0, m_p - M), (0, 0)))
    out = pl.pallas_call(
        _linear_kernel,
        out_shape=jax.ShapeDtypeStruct((m_p, n_p), jnp.float32),
        grid=(1,),
        in_specs=[
            pl.BlockSpec((m_p, K), lambda i: (0, 0)),
            pl.BlockSpec((K, n_p), lambda i: (0, 0)),
            pl.BlockSpec((1, n_p), lambda i: (0, 0)),
        ],
        out_specs=pl.BlockSpec((m_p, n_p), lambda i: (0, 0)),
        compiler_params=pltpu.CompilerParams(
            dimension_semantics=("arbitrary",),
            vmem_limit_bytes=_VMEM_LIMIT),
    )(xpad, w, b)
    return out[:M, :lin["ncls"]]


# ---------------------------------- param handling ----------------------------------

def init_params(key, num_classes=10):
    # Representative VGG-style feature stack producing 512 features at 1x1:
    #   conv3x3(3->64)+ReLU, pool2; conv3x3(64->128)+ReLU, pool2;
    #   conv3x3(128->512)+ReLU, pool2.
    cfg = [(3, 64), (64, 128), (128, 512)]
    convs = []
    for (cin, cout) in cfg:
        key, kw = jax.random.split(key)
        w = jax.random.normal(kw, (cout, cin, 3, 3), jnp.float32) * 0.05
        b = jnp.zeros((cout,), jnp.float32)
        convs.append((w, b))
    key, kl = jax.random.split(key)
    wc = jax.random.normal(kl, (num_classes, 512), jnp.float32) * 0.01
    bc = jnp.zeros((num_classes,), jnp.float32)
    return {"convs": convs, "classifier": (wc, bc)}


def prepare_params(params):
    """One-time repack: tap-major weights, channel padding to 128, bf16 cast."""
    convs = []
    for (w, b) in params["convs"]:
        cout, cin, kh, kw = w.shape
        assert (kh, kw) == (3, 3)
        cin_p = _round_up(cin, LANE)
        cout_p = _round_up(cout, LANE)
        wt = jnp.transpose(w, (2, 3, 1, 0))                       # (3,3,cin,cout)
        wt = jnp.pad(wt, ((0, 0), (0, 0), (0, cin_p - cin), (0, cout_p - cout)))
        wt = wt.reshape(9 * cin_p, cout_p).astype(jnp.bfloat16)
        bp = jnp.pad(b, (0, cout_p - cout)).reshape(1, cout_p).astype(jnp.float32)
        convs.append(dict(w=wt, b=bp, cin_p=cin_p, cout=cout, cout_p=cout_p))
    wc, bc = params["classifier"]
    ncls, k = wc.shape
    assert k == params["convs"][-1][0].shape[0]      # Linear(512, .) matches last Cout
    k_p = convs[-1]["cout_p"]
    n_p = _round_up(ncls, LANE)
    wl = jnp.zeros((k_p, n_p), jnp.float32).at[:k, :ncls].set(wc.T).astype(jnp.bfloat16)
    bl = jnp.zeros((1, n_p), jnp.float32).at[0, :ncls].set(bc)
    return dict(convs=convs, linear=dict(w=wl, b=bl, ncls=ncls))


# ------------------------------------- forward --------------------------------------

def vgg_forward(x_nchw, prepped):
    # NCHW (PyTorch) -> NHWC; build the first stage's zero-padded frame in one
    # pad (spatial pad + 8-aligned pitch + channel pad + extra halo row),
    # cast bf16, flatten to (N, (H+3)*Wp, cin_p).
    x = jnp.transpose(x_nchw, (0, 2, 3, 1))
    N, H, W, cin = x.shape
    cin_p = prepped["convs"][0]["cin_p"]
    Wp = _round_up(W + 2, 8)
    x = jnp.pad(x, ((0, 0), (1, 2), (1, Wp - W - 1), (0, cin_p - cin)))
    x = x.astype(jnp.bfloat16).reshape(N, (H + 3) * Wp, cin_p)

    n_conv = len(prepped["convs"])
    for li, layer in enumerate(prepped["convs"]):
        Ho, Wo = H // 2, W // 2
        last = li == n_conv - 1
        out_pitch = None if last else _round_up(Wo + 2, 8)
        x = conv_relu_pool(x, layer, H=H, W=W, out_pitch=out_pitch)
        H, W = Ho, Wo

    # y = y.view(x.size(0), -1): the feature stack ends at 1x1 spatial, so the
    # NHWC and NCHW flatten orders coincide.
    # TODO(synk): general H,W > 1 NCHW flatten ordering is not implemented
    # (Linear(512, .) in the spec implies 1x1x512 features).
    assert H == 1 and W == 1, "classifier Linear(512, .) expects 1x1x512 features"
    feat = x.reshape(N, -1)
    return linear(feat, prepped["linear"])


# ----------------------------------- pure-JAX ref ------------------------------------

def reference_forward(x_nchw, params):
    x = x_nchw.astype(jnp.float32)
    for (w, b) in params["convs"]:
        x = lax.conv_general_dilated(
            x, w, window_strides=(1, 1), padding=((1, 1), (1, 1)),
            dimension_numbers=("NCHW", "OIHW", "NCHW"))
        x = jnp.maximum(x + b[None, :, None, None], 0.0)
        x = lax.reduce_window(x, -jnp.inf, lax.max,
                              (1, 1, 2, 2), (1, 1, 2, 2), "VALID")
    y = x.reshape(x.shape[0], -1)
    wc, bc = params["classifier"]
    return y @ wc.T + bc


# --------------------------------------- main ----------------------------------------

if __name__ == "__main__":
    key = jax.random.PRNGKey(0)
    key, kx = jax.random.split(key)
    # Small VGG-style input: batch=2, channels=3, spatial=8 (NCHW like PyTorch).
    x = jax.random.normal(kx, (2, 3, 8, 8), jnp.float32)
    params = init_params(key, num_classes=10)
    prepped = prepare_params(params)

    fwd = jax.jit(functools.partial(vgg_forward, prepped=prepped))
    out = jax.block_until_ready(fwd(x))
    assert out.shape == (2, 10), out.shape

    ref = reference_forward(x, params)
    err = float(jnp.max(jnp.abs(out - ref)))
    assert err < 5e-2, f"max abs error vs reference: {err}"

    print("KERNEL_OK")
</pallas_src>

<mosaic_0001>
module attributes {stable_mosaic.version = 11 : i64} {
  func.func @_conv_relu_pool_kernel(%arg0: i32, %arg1: memref<1x56x128xbf16, #tpu.memory_space<vmem>>, %arg2: memref<1152x128xbf16, #tpu.memory_space<vmem>>, %arg3: memref<1x128xf32, #tpu.memory_space<vmem>>, %arg4: memref<1x40x128xbf16, #tpu.memory_space<vmem>>) attributes {dimension_semantics = [#tpu.dimension_semantics<parallel>], iteration_bounds = array<i64: 2>, scalar_prefetch = 0 : i64, scratch_operands = 0 : i64, tpu.core_type = #tpu.core_type<tc>, window_params = [{transform_indices = @transform_0, window_bounds = array<i64: 1, 56, 128>}, {pipeline_mode = #tpu.pipeline_mode<synchronous>, transform_indices = @transform_1, window_bounds = array<i64: 1152, 128>}, {pipeline_mode = #tpu.pipeline_mode<synchronous>, transform_indices = @transform_2, window_bounds = array<i64: 1, 128>}, {transform_indices = @transform_3, window_bounds = array<i64: 1, 40, 128>}]} {
    %c0 = arith.constant 0 : index
    %c0_0 = arith.constant 0 : index
    %c0_1 = arith.constant 0 : index
    %0 = vector.load %arg1[%c0, %c0_0, %c0_1] : memref<1x56x128xbf16, #tpu.memory_space<vmem>>, vector<1x56x128xbf16>
    %1 = vector.shape_cast %0 : vector<1x56x128xbf16> to vector<56x128xbf16>
    %cst = arith.constant 0.000000e+00 : f32
    %2 = vector.broadcast %cst : f32 to vector<32x128xf32>
    %3 = vector.extract_strided_slice %1 {offsets = [0, 0], sizes = [32, 128], strides = [1, 1]} : vector<56x128xbf16> to vector<32x128xbf16>
    %c0_2 = arith.constant 0 : index
    %c0_3 = arith.constant 0 : index
    %4 = vector.load %arg2[%c0_2, %c0_3] : memref<1152x128xbf16, #tpu.memory_space<vmem>>, vector<128x128xbf16>
    %cst_4 = arith.constant dense<0.000000e+00> : vector<32x128xf32>
    %5 = tpu.matmul %3, %4, %cst_4 {dimension_numbers = #tpu.dot_dimension_numbers<[1], [0], [0], [1], [0, 0, 1, 1], [], []>} : vector<32x128xbf16>, vector<128x128xbf16>, vector<32x128xf32> -> vector<32x128xf32>
    %6 = arith.addf %2, %5 : vector<32x128xf32>
    %7 = vector.extract_strided_slice %1 {offsets = [1, 0], sizes = [32, 128], strides = [1, 1]} : vector<56x128xbf16> to vector<32x128xbf16>
    %c128 = arith.constant 128 : index
    %c0_5 = arith.constant 0 : index
    %8 = vector.load %arg2[%c128, %c0_5] : memref<1152x128xbf16, #tpu.memory_space<vmem>>, vector<128x128xbf16>
    %cst_6 = arith.constant dense<0.000000e+00> : vector<32x128xf32>
    %9 = tpu.matmul %7, %8, %cst_6 {dimension_numbers = #tpu.dot_dimension_numbers<[1], [0], [0], [1], [0, 0, 1, 1], [], []>} : vector<32x128xbf16>, vector<128x128xbf16>, vector<32x128xf32> -> vector<32x128xf32>
    %10 = arith.addf %6, %9 : vector<32x128xf32>
    %11 = vector.extract_strided_slice %1 {offsets = [2, 0], sizes = [32, 128], strides = [1, 1]} : vector<56x128xbf16> to vector<32x128xbf16>
    %c256 = arith.constant 256 : index
    %c0_7 = arith.constant 0 : index
    %12 = vector.load %arg2[%c256, %c0_7] : memref<1152x128xbf16, #tpu.memory_space<vmem>>, vector<128x128xbf16>
    %cst_8 = arith.constant dense<0.000000e+00> : vector<32x128xf32>
    %13 = tpu.matmul %11, %12, %cst_8 {dimension_numbers = #tpu.dot_dimension_numbers<[1], [0], [0], [1], [0, 0, 1, 1], [], []>} : vector<32x128xbf16>, vector<128x128xbf16>, vector<32x128xf32> -> vector<32x128xf32>
    %14 = arith.addf %10, %13 : vector<32x128xf32>
    %15 = vector.extract_strided_slice %1 {offsets = [8, 0], sizes = [32, 128], strides = [1, 1]} : vector<56x128xbf16> to vector<32x128xbf16>
    %c384 = arith.constant 384 : index
    %c0_9 = arith.constant 0 : index
    %16 = vector.load %arg2[%c384, %c0_9] : memref<1152x128xbf16, #tpu.memory_space<vmem>>, vector<128x128xbf16>
    %cst_10 = arith.constant dense<0.000000e+00> : vector<32x128xf32>
    %17 = tpu.matmul %15, %16, %cst_10 {dimension_numbers = #tpu.dot_dimension_numbers<[1], [0], [0], [1], [0, 0, 1, 1], [], []>} : vector<32x128xbf16>, vector<128x128xbf16>, vector<32x128xf32> -> vector<32x128xf32>
    %18 = arith.addf %14, %17 : vector<32x128xf32>
    %19 = vector.extract_strided_slice %1 {offsets = [9, 0], sizes = [32, 128], strides = [1, 1]} : vector<56x128xbf16> to vector<32x128xbf16>
    %c512 = arith.constant 512 : index
    %c0_11 = arith.constant 0 : index
    %20 = vector.load %arg2[%c512, %c0_11] : memref<1152x128xbf16, #tpu.memory_space<vmem>>, vector<128x128xbf16>
    %cst_12 = arith.constant dense<0.000000e+00> : vector<32x128xf32>
    %21 = tpu.matmul %19, %20, %cst_12 {dimension_numbers = #tpu.dot_dimension_numbers<[1], [0], [0], [1], [0, 0, 1, 1], [], []>} : vector<32x128xbf16>, vector<128x128xbf16>, vector<32x128xf32> -> vector<32x128xf32>
    %22 = arith.addf %18, %21 : vector<32x128xf32>
    %23 = vector.extract_strided_slice %1 {offsets = [10, 0], sizes = [32, 128], strides = [1, 1]} : vector<56x128xbf16> to vector<32x128xbf16>
    %c640 = arith.constant 640 : index
    %c0_13 = arith.constant 0 : index
    %24 = vector.load %arg2[%c640, %c0_13] : memref<1152x128xbf16, #tpu.memory_space<vmem>>, vector<128x128xbf16>
    %cst_14 = arith.constant dense<0.000000e+00> : vector<32x128xf32>
    %25 = tpu.matmul %23, %24, %cst_14 {dimension_numbers = #tpu.dot_dimension_numbers<[1], [0], [0], [1], [0, 0, 1, 1], [], []>} : vector<32x128xbf16>, vector<128x128xbf16>, vector<32x128xf32> -> vector<32x128xf32>
    %26 = arith.addf %22, %25 : vector<32x128xf32>
    %27 = vector.extract_strided_slice %1 {offsets = [16, 0], sizes = [32, 128], strides = [1, 1]} : vector<56x128xbf16> to vector<32x128xbf16>
    %c768 = arith.constant 768 : index
    %c0_15 = arith.constant 0 : index
    %28 = vector.load %arg2[%c768, %c0_15] : memref<1152x128xbf16, #tpu.memory_space<vmem>>, vector<128x128xbf16>
    %cst_16 = arith.constant dense<0.000000e+00> : vector<32x128xf32>
    %29 = tpu.matmul %27, %28, %cst_16 {dimension_numbers = #tpu.dot_dimension_numbers<[1], [0], [0], [1], [0, 0, 1, 1], [], []>} : vector<32x128xbf16>, vector<128x128xbf16>, vector<32x128xf32> -> vector<32x128xf32>
    %30 = arith.addf %26, %29 : vector<32x128xf32>
    %31 = vector.extract_strided_slice %1 {offsets = [17, 0], sizes = [32, 128], strides = [1, 1]} : vector<56x128xbf16> to vector<32x128xbf16>
    %c896 = arith.constant 896 : index
    %c0_17 = arith.constant 0 : index
    %32 = vector.load %arg2[%c896, %c0_17] : memref<1152x128xbf16, #tpu.memory_space<vmem>>, vector<128x128xbf16>
    %cst_18 = arith.constant dense<0.000000e+00> : vector<32x128xf32>
    %33 = tpu.matmul %31, %32, %cst_18 {dimension_numbers = #tpu.dot_dimension_numbers<[1], [0], [0], [1], [0, 0, 1, 1], [], []>} : vector<32x128xbf16>, vector<128x128xbf16>, vector<32x128xf32> -> vector<32x128xf32>
    %34 = arith.addf %30, %33 : vector<32x128xf32>
    %35 = vector.extract_strided_slice %1 {offsets = [18, 0], sizes = [32, 128], strides = [1, 1]} : vector<56x128xbf16> to vector<32x128xbf16>
    %c1024 = arith.constant 1024 : index
    %c0_19 = arith.constant 0 : index
    %36 = vector.load %arg2[%c1024, %c0_19] : memref<1152x128xbf16, #tpu.memory_space<vmem>>, vector<128x128xbf16>
    %cst_20 = arith.constant dense<0.000000e+00> : vector<32x128xf32>
    %37 = tpu.matmul %35, %36, %cst_20 {dimension_numbers = #tpu.dot_dimension_numbers<[1], [0], [0], [1], [0, 0, 1, 1], [], []>} : vector<32x128xbf16>, vector<128x128xbf16>, vector<32x128xf32> -> vector<32x128xf32>
    %38 = arith.addf %34, %37 : vector<32x128xf32>
    %c0_21 = arith.constant 0 : index
    %c0_22 = arith.constant 0 : index
    %39 = vector.load %arg3[%c0_21, %c0_22] : memref<1x128xf32, #tpu.memory_space<vmem>>, vector<1x128xf32>
    %40 = vector.broadcast %39 : vector<1x128xf32> to vector<32x128xf32>
    %41 = arith.addf %38, %40 : vector<32x128xf32>
    %cst_23 = arith.constant 0.000000e+00 : f32
    %42 = vector.broadcast %cst_23 : f32 to vector<32x128xf32>
    %43 = arith.maximumf %41, %42 : vector<32x128xf32>
    %44 = vector.shape_cast %43 : vector<32x128xf32> to vector<4x8x128xf32>
    %45 = vector.extract_strided_slice %44 {offsets = [0, 0, 0], sizes = [4, 4, 128], strides = [1, 1, 1]} : vector<4x8x128xf32> to vector<4x4x128xf32>
    %46 = vector.shape_cast %45 : vector<4x4x128xf32> to vector<2x2x4x128xf32>
    %cst_24 = arith.constant dense<0xFF800000> : vector<2x4x128xf32>
    %47 = vector.multi_reduction <maximumf>, %46, %cst_24 [1] : vector<2x2x4x128xf32> to vector<2x4x128xf32>
    %48 = vector.shape_cast %47 : vector<2x4x128xf32> to vector<2x2x2x128xf32>
    %cst_25 = arith.constant dense<0xFF800000> : vector<2x2x128xf32>
    %49 = vector.multi_reduction <maximumf>, %48, %cst_25 [2] : vector<2x2x2x128xf32> to vector<2x2x128xf32>
    %50 = arith.truncf %49 : vector<2x2x128xf32> to vector<2x2x128xbf16>
    %cst_26 = arith.constant 0.000000e+00 : bf16
    %51 = vector.broadcast %cst_26 : bf16 to vector<1x40x128xbf16>
    %c0_27 = arith.constant 0 : index
    %c0_28 = arith.constant 0 : index
    %c0_29 = arith.constant 0 : index
    %52 = vector.load %arg4[%c0_27, %c0_28, %c0_29] : memref<1x40x128xbf16, #tpu.memory_space<vmem>>, vector<1x40x128xbf16>
    tpu.vector_store %arg4[%c0_27, %c0_28, %c0_29], %51 {strides = array<i32>} : memref<1x40x128xbf16, #tpu.memory_space<vmem>>, vector<1x40x128xbf16>,
    %53 = vector.extract_strided_slice %50 {offsets = [0, 0, 0], sizes = [1, 2, 128], strides = [1, 1, 1]} : vector<2x2x128xbf16> to vector<1x2x128xbf16>
    %54 = vector.shape_cast %53 : vector<1x2x128xbf16> to vector<2x128xbf16>
    %c0_30 = arith.constant 0 : index
    %c9 = arith.constant 9 : index
    %c0_31 = arith.constant 0 : index
    %55 = vector.load %arg4[%c0_30, %c9, %c0_31] : memref<1x40x128xbf16, #tpu.memory_space<vmem>>, vector<1x2x128xbf16>
    %56 = vector.shape_cast %55 : vector<1x2x128xbf16> to vector<2x128xbf16>
    %57 = vector.shape_cast %54 : vector<2x128xbf16> to vector<1x2x128xbf16>
    tpu.vector_store %arg4[%c0_30, %c9, %c0_31], %57 {strides = array<i32>} : memref<1x40x128xbf16, #tpu.memory_space<vmem>>, vector<1x2x128xbf16>,
    %58 = vector.extract_strided_slice %50 {offsets = [1, 0, 0], sizes = [1, 2, 128], strides = [1, 1, 1]} : vector<2x2x128xbf16> to vector<1x2x128xbf16>
    %59 = vector.shape_cast %58 : vector<1x2x128xbf16> to vector<2x128xbf16>
    %c0_32 = arith.constant 0 : index
    %c17 = arith.constant 17 : index
    %c0_33 = arith.constant 0 : index
    %60 = vector.load %arg4[%c0_32, %c17, %c0_33] : memref<1x40x128xbf16, #tpu.memory_space<vmem>>, vector<1x2x128xbf16>
    %61 = vector.shape_cast %60 : vector<1x2x128xbf16> to vector<2x128xbf16>
    %62 = vector.shape_cast %59 : vector<2x128xbf16> to vector<1x2x128xbf16>
    tpu.vector_store %arg4[%c0_32, %c17, %c0_33], %62 {strides = array<i32>} : memref<1x40x128xbf16, #tpu.memory_space<vmem>>, vector<1x2x128xbf16>,
    return
  }
  func.func @transform_0(%arg0: i32) -> (i32, i32, i32) {
    %c0_i32 = arith.constant 0 : i32
    %c0_i32_0 = arith.constant 0 : i32
    %c0_i32_1 = arith.constant 0 : i32
    return %arg0, %c0_i32, %c0_i32_0 : i32, i32, i32
  }
  func.func @transform_1(%arg0: i32) -> (i32, i32) {
    %c0_i32 = arith.constant 0 : i32
    %c0_i32_0 = arith.constant 0 : i32
    %c0_i32_1 = arith.constant 0 : i32
    return %c0_i32, %c0_i32_0 : i32, i32
  }
  func.func @transform_2(%arg0: i32) -> (i32, i32) {
    %c0_i32 = arith.constant 0 : i32
    %c0_i32_0 = arith.constant 0 : i32
    %c0_i32_1 = arith.constant 0 : i32
    return %c0_i32, %c0_i32_0 : i32, i32
  }
  func.func @transform_3(%arg0: i32) -> (i32, i32, i32) {
    %c0_i32 = arith.constant 0 : i32
    %c0_i32_0 = arith.constant 0 : i32
    %c0_i32_1 = arith.constant 0 : i32
    return %arg0, %c0_i32, %c0_i32_0 : i32, i32, i32
  }
}

module attributes {stable_mosaic.version = 11 : i64} {
  func.func @_conv_relu_pool_kernel(%arg0: i32, %arg1: memref<1x176x128xbf16, #tpu.memory_space<vmem>>, %arg2: memref<1152x128xbf16, #tpu.memory_space<vmem>>, %arg3: memref<1x128xf32, #tpu.memory_space<vmem>>, %arg4: memref<1x56x128xbf16, #tpu.memory_space<vmem>>) attributes {dimension_semantics = [#tpu.dimension_semantics<parallel>], iteration_bounds = array<i64: 2>, scalar_prefetch = 0 : i64, scratch_operands = 0 : i64, tpu.core_type = #tpu.core_type<tc>, window_params = [{transform_indices = @transform_0, window_bounds = array<i64: 1, 176, 128>}, {pipeline_mode = #tpu.pipeline_mode<synchronous>, transform_indices = @transform_1, window_bounds = array<i64: 1152, 128>}, {pipeline_mode = #tpu.pipeline_mode<synchronous>, transform_indices = @transform_2, window_bounds = array<i64: 1, 128>}, {transform_indices = @transform_3, window_bounds = array<i64: 1, 56, 128>}]} {
    %c0 = arith.constant 0 : index
    %c0_0 = arith.constant 0 : index
    %c0_1 = arith.constant 0 : index
    %0 = vector.load %arg1[%c0, %c0_0, %c0_1] : memref<1x176x128xbf16, #tpu.memory_space<vmem>>, vector<1x176x128xbf16>
    %1 = vector.shape_cast %0 : vector<1x176x128xbf16> to vector<176x128xbf16>
    %cst = arith.constant 0.000000e+00 : f32
    %2 = vector.broadcast %cst : f32 to vector<128x128xf32>
    %3 = vector.extract_strided_slice %1 {offsets = [0, 0], sizes = [128, 128], strides = [1, 1]} : vector<176x128xbf16> to vector<128x128xbf16>
    %c0_2 = arith.constant 0 : index
    %c0_3 = arith.constant 0 : index
    %4 = vector.load %arg2[%c0_2, %c0_3] : memref<1152x128xbf16, #tpu.memory_space<vmem>>, vector<128x128xbf16>
    %cst_4 = arith.constant dense<0.000000e+00> : vector<128x128xf32>
    %5 = tpu.matmul %3, %4, %cst_4 {dimension_numbers = #tpu.dot_dimension_numbers<[1], [0], [0], [1], [0, 0, 1, 1], [], []>} : vector<128x128xbf16>, vector<128x128xbf16>, vector<128x128xf32> -> vector<128x128xf32>
    %6 = arith.addf %2, %5 : vector<128x128xf32>
    %7 = vector.extract_strided_slice %1 {offsets = [1, 0], sizes = [128, 128], strides = [1, 1]} : vector<176x128xbf16> to vector<128x128xbf16>
    %c128 = arith.constant 128 : index
    %c0_5 = arith.constant 0 : index
    %8 = vector.load %arg2[%c128, %c0_5] : memref<1152x128xbf16, #tpu.memory_space<vmem>>, vector<128x128xbf16>
    %cst_6 = arith.constant dense<0.000000e+00> : vector<128x128xf32>
    %9 = tpu.matmul %7, %8, %cst_6 {dimension_numbers = #tpu.dot_dimension_numbers<[1], [0], [0], [1], [0, 0, 1, 1], [], []>} : vector<128x128xbf16>, vector<128x128xbf16>, vector<128x128xf32> -> vector<128x128xf32>
    %10 = arith.addf %6, %9 : vector<128x128xf32>
    %11 = vector.extract_strided_slice %1 {offsets = [2, 0], sizes = [128, 128], strides = [1, 1]} : vector<176x128xbf16> to vector<128x128xbf16>
    %c256 = arith.constant 256 : index
    %c0_7 = arith.constant 0 : index
    %12 = vector.load %arg2[%c256, %c0_7] : memref<1152x128xbf16, #tpu.memory_space<vmem>>, vector<128x128xbf16>
    %cst_8 = arith.constant dense<0.000000e+00> : vector<128x128xf32>
    %13 = tpu.matmul %11, %12, %cst_8 {dimension_numbers = #tpu.dot_dimension_numbers<[1], [0], [0], [1], [0, 0, 1, 1], [], []>} : vector<128x128xbf16>, vector<128x128xbf16>, vector<128x128xf32> -> vector<128x128xf32>
    %14 = arith.addf %10, %13 : vector<128x128xf32>
    %15 = vector.extract_strided_slice %1 {offsets = [16, 0], sizes = [128, 128], strides = [1, 1]} : vector<176x128xbf16> to vector<128x128xbf16>
    %c384 = arith.constant 384 : index
    %c0_9 = arith.constant 0 : index
    %16 = vector.load %arg2[%c384, %c0_9] : memref<1152x128xbf16, #tpu.memory_space<vmem>>, vector<128x128xbf16>
    %cst_10 = arith.constant dense<0.000000e+00> : vector<128x128xf32>
    %17 = tpu.matmul %15, %16, %cst_10 {dimension_numbers = #tpu.dot_dimension_numbers<[1], [0], [0], [1], [0, 0, 1, 1], [], []>} : vector<128x128xbf16>, vector<128x128xbf16>, vector<128x128xf32> -> vector<128x128xf32>
    %18 = arith.addf %14, %17 : vector<128x128xf32>
    %19 = vector.extract_strided_slice %1 {offsets = [17, 0], sizes = [128, 128], strides = [1, 1]} : vector<176x128xbf16> to vector<128x128xbf16>
    %c512 = arith.constant 512 : index
    %c0_11 = arith.constant 0 : index
    %20 = vector.load %arg2[%c512, %c0_11] : memref<1152x128xbf16, #tpu.memory_space<vmem>>, vector<128x128xbf16>
    %cst_12 = arith.constant dense<0.000000e+00> : vector<128x128xf32>
    %21 = tpu.matmul %19, %20, %cst_12 {dimension_numbers = #tpu.dot_dimension_numbers<[1], [0], [0], [1], [0, 0, 1, 1], [], []>} : vector<128x128xbf16>, vector<128x128xbf16>, vector<128x128xf32> -> vector<128x128xf32>
    %22 = arith.addf %18, %21 : vector<128x128xf32>
    %23 = vector.extract_strided_slice %1 {offsets = [18, 0], sizes = [128, 128], strides = [1, 1]} : vector<176x128xbf16> to vector<128x128xbf16>
    %c640 = arith.constant 640 : index
    %c0_13 = arith.constant 0 : index
    %24 = vector.load %arg2[%c640, %c0_13] : memref<1152x128xbf16, #tpu.memory_space<vmem>>, vector<128x128xbf16>
    %cst_14 = arith.constant dense<0.000000e+00> : vector<128x128xf32>
    %25 = tpu.matmul %23, %24, %cst_14 {dimension_numbers = #tpu.dot_dimension_numbers<[1], [0], [0], [1], [0, 0, 1, 1], [], []>} : vector<128x128xbf16>, vector<128x128xbf16>, vector<128x128xf32> -> vector<128x128xf32>
    %26 = arith.addf %22, %25 : vector<128x128xf32>
    %27 = vector.extract_strided_slice %1 {offsets = [32, 0], sizes = [128, 128], strides = [1, 1]} : vector<176x128xbf16> to vector<128x128xbf16>
    %c768 = arith.constant 768 : index
    %c0_15 = arith.constant 0 : index
    %28 = vector.load %arg2[%c768, %c0_15] : memref<1152x128xbf16, #tpu.memory_space<vmem>>, vector<128x128xbf16>
    %cst_16 = arith.constant dense<0.000000e+00> : vector<128x128xf32>
    %29 = tpu.matmul %27, %28, %cst_16 {dimension_numbers = #tpu.dot_dimension_numbers<[1], [0], [0], [1], [0, 0, 1, 1], [], []>} : vector<128x128xbf16>, vector<128x128xbf16>, vector<128x128xf32> -> vector<128x128xf32>
    %30 = arith.addf %26, %29 : vector<128x128xf32>
    %31 = vector.extract_strided_slice %1 {offsets = [33, 0], sizes = [128, 128], strides = [1, 1]} : vector<176x128xbf16> to vector<128x128xbf16>
    %c896 = arith.constant 896 : index
    %c0_17 = arith.constant 0 : index
    %32 = vector.load %arg2[%c896, %c0_17] : memref<1152x128xbf16, #tpu.memory_space<vmem>>, vector<128x128xbf16>
    %cst_18 = arith.constant dense<0.000000e+00> : vector<128x128xf32>
    %33 = tpu.matmul %31, %32, %cst_18 {dimension_numbers = #tpu.dot_dimension_numbers<[1], [0], [0], [1], [0, 0, 1, 1], [], []>} : vector<128x128xbf16>, vector<128x128xbf16>, vector<128x128xf32> -> vector<128x128xf32>
    %34 = arith.addf %30, %33 : vector<128x128xf32>
    %35 = vector.extract_strided_slice %1 {offsets = [34, 0], sizes = [128, 128], strides = [1, 1]} : vector<176x128xbf16> to vector<128x128xbf16>
    %c1024 = arith.constant 1024 : index
    %c0_19 = arith.constant 0 : index
    %36 = vector.load %arg2[%c1024, %c0_19] : memref<1152x128xbf16, #tpu.memory_space<vmem>>, vector<128x128xbf16>
    %cst_20 = arith.constant dense<0.000000e+00> : vector<128x128xf32>
    %37 = tpu.matmul %35, %36, %cst_20 {dimension_numbers = #tpu.dot_dimension_numbers<[1], [0], [0], [1], [0, 0, 1, 1], [], []>} : vector<128x128xbf16>, vector<128x128xbf16>, vector<128x128xf32> -> vector<128x128xf32>
    %38 = arith.addf %34, %37 : vector<128x128xf32>
    %c0_21 = arith.constant 0 : index
    %c0_22 = arith.constant 0 : index
    %39 = vector.load %arg3[%c0_21, %c0_22] : memref<1x128xf32, #tpu.memory_space<vmem>>, vector<1x128xf32>
    %40 = vector.broadcast %39 : vector<1x128xf32> to vector<128x128xf32>
    %41 = arith.addf %38, %40 : vector<128x128xf32>
    %cst_23 = arith.constant 0.000000e+00 : f32
    %42 = vector.broadcast %cst_23 : f32 to vector<128x128xf32>
    %43 = arith.maximumf %41, %42 : vector<128x128xf32>
    %44 = vector.shape_cast %43 : vector<128x128xf32> to vector<8x16x128xf32>
    %45 = vector.extract_strided_slice %44 {offsets = [0, 0, 0], sizes = [8, 8, 128], strides = [1, 1, 1]} : vector<8x16x128xf32> to vector<8x8x128xf32>
    %46 = vector.shape_cast %45 : vector<8x8x128xf32> to vector<4x2x8x128xf32>
    %cst_24 = arith.constant dense<0xFF800000> : vector<4x8x128xf32>
    %47 = vector.multi_reduction <maximumf>, %46, %cst_24 [1] : vector<4x2x8x128xf32> to vector<4x8x128xf32>
    %48 = vector.shape_cast %47 : vector<4x8x128xf32> to vector<4x4x2x128xf32>
    %cst_25 = arith.constant dense<0xFF800000> : vector<4x4x128xf32>
    %49 = vector.multi_reduction <maximumf>, %48, %cst_25 [2] : vector<4x4x2x128xf32> to vector<4x4x128xf32>
    %50 = arith.truncf %49 : vector<4x4x128xf32> to vector<4x4x128xbf16>
    %cst_26 = arith.constant 0.000000e+00 : bf16
    %51 = vector.broadcast %cst_26 : bf16 to vector<1x56x128xbf16>
    %c0_27 = arith.constant 0 : index
    %c0_28 = arith.constant 0 : index
    %c0_29 = arith.constant 0 : index
    %52 = vector.load %arg4[%c0_27, %c0_28, %c0_29] : memref<1x56x128xbf16, #tpu.memory_space<vmem>>, vector<1x56x128xbf16>
    tpu.vector_store %arg4[%c0_27, %c0_28, %c0_29], %51 {strides = array<i32>} : memref<1x56x128xbf16, #tpu.memory_space<vmem>>, vector<1x56x128xbf16>,
    %53 = vector.extract_strided_slice %50 {offsets = [0, 0, 0], sizes = [1, 4, 128], strides = [1, 1, 1]} : vector<4x4x128xbf16> to vector<1x4x128xbf16>
    %54 = vector.shape_cast %53 : vector<1x4x128xbf16> to vector<4x128xbf16>
    %c0_30 = arith.constant 0 : index
    %c9 = arith.constant 9 : index
    %c0_31 = arith.constant 0 : index
    %55 = vector.load %arg4[%c0_30, %c9, %c0_31] : memref<1x56x128xbf16, #tpu.memory_space<vmem>>, vector<1x4x128xbf16>
    %56 = vector.shape_cast %55 : vector<1x4x128xbf16> to vector<4x128xbf16>
    %57 = vector.shape_cast %54 : vector<4x128xbf16> to vector<1x4x128xbf16>
    tpu.vector_store %arg4[%c0_30, %c9, %c0_31], %57 {strides = array<i32>} : memref<1x56x128xbf16, #tpu.memory_space<vmem>>, vector<1x4x128xbf16>,
    %58 = vector.extract_strided_slice %50 {offsets = [1, 0, 0], sizes = [1, 4, 128], strides = [1, 1, 1]} : vector<4x4x128xbf16> to vector<1x4x128xbf16>
    %59 = vector.shape_cast %58 : vector<1x4x128xbf16> to vector<4x128xbf16>
    %c0_32 = arith.constant 0 : index
    %c17 = arith.constant 17 : index
    %c0_33 = arith.constant 0 : index
    %60 = vector.load %arg4[%c0_32, %c17, %c0_33] : memref<1x56x128xbf16, #tpu.memory_space<vmem>>, vector<1x4x128xbf16>
    %61 = vector.shape_cast %60 : vector<1x4x128xbf16> to vector<4x128xbf16>
    %62 = vector.shape_cast %59 : vector<4x128xbf16> to vector<1x4x128xbf16>
    tpu.vector_store %arg4[%c0_32, %c17, %c0_33], %62 {strides = array<i32>} : memref<1x56x128xbf16, #tpu.memory_space<vmem>>, vector<1x4x128xbf16>,
    %63 = vector.extract_strided_slice %50 {offsets = [2, 0, 0], sizes = [1, 4, 128], strides = [1, 1, 1]} : vector<4x4x128xbf16> to vector<1x4x128xbf16>
    %64 = vector.shape_cast %63 : vector<1x4x128xbf16> to vector<4x128xbf16>
    %c0_34 = arith.constant 0 : index
    %c25 = arith.constant 25 : index
    %c0_35 = arith.constant 0 : index
    %65 = vector.load %arg4[%c0_34, %c25, %c0_35] : memref<1x56x128xbf16, #tpu.memory_space<vmem>>, vector<1x4x128xbf16>
    %66 = vector.shape_cast %65 : vector<1x4x128xbf16> to vector<4x128xbf16>
    %67 = vector.shape_cast %64 : vector<4x128xbf16> to vector<1x4x128xbf16>
    tpu.vector_store %arg4[%c0_34, %c25, %c0_35], %67 {strides = array<i32>} : memref<1x56x128xbf16, #tpu.memory_space<vmem>>, vector<1x4x128xbf16>,
    %68 = vector.extract_strided_slice %50 {offsets = [3, 0, 0], sizes = [1, 4, 128], strides = [1, 1, 1]} : vector<4x4x128xbf16> to vector<1x4x128xbf16>
    %69 = vector.shape_cast %68 : vector<1x4x128xbf16> to vector<4x128xbf16>
    %c0_36 = arith.constant 0 : index
    %c33 = arith.constant 33 : index
    %c0_37 = arith.constant 0 : index
    %70 = vector.load %arg4[%c0_36, %c33, %c0_37] : memref<1x56x128xbf16, #tpu.memory_space<vmem>>, vector<1x4x128xbf16>
    %71 = vector.shape_cast %70 : vector<1x4x128xbf16> to vector<4x128xbf16>
    %72 = vector.shape_cast %69 : vector<4x128xbf16> to vector<1x4x128xbf16>
    tpu.vector_store %arg4[%c0_36, %c33, %c0_37], %72 {strides = array<i32>} : memref<1x56x128xbf16, #tpu.memory_space<vmem>>, vector<1x4x128xbf16>,
    return
  }
  func.func @transform_0(%arg0: i32) -> (i32, i32, i32) {
    %c0_i32 = arith.constant 0 : i32
    %c0_i32_0 = arith.constant 0 : i32
    %c0_i32_1 = arith.constant 0 : i32
    return %arg0, %c0_i32, %c0_i32_0 : i32, i32, i32
  }
  func.func @transform_1(%arg0: i32) -> (i32, i32) {
    %c0_i32 = arith.constant 0 : i32
    %c0_i32_0 = arith.constant 0 : i32
    %c0_i32_1 = arith.constant 0 : i32
    return %c0_i32, %c0_i32_0 : i32, i32
  }
  func.func @transform_2(%arg0: i32) -> (i32, i32) {
    %c0_i32 = arith.constant 0 : i32
    %c0_i32_0 = arith.constant 0 : i32
    %c0_i32_1 = arith.constant 0 : i32
    return %c0_i32, %c0_i32_0 : i32, i32
  }
  func.func @transform_3(%arg0: i32) -> (i32, i32, i32) {
    %c0_i32 = arith.constant 0 : i32
    %c0_i32_0 = arith.constant 0 : i32
    %c0_i32_1 = arith.constant 0 : i32
    return %arg0, %c0_i32, %c0_i32_0 : i32, i32, i32
  }
}

module attributes {stable_mosaic.version = 11 : i64} {
  func.func @_conv_relu_pool_kernel(%arg0: i32, %arg1: memref<1x40x128xbf16, #tpu.memory_space<vmem>>, %arg2: memref<1152x512xbf16, #tpu.memory_space<vmem>>, %arg3: memref<1x512xf32, #tpu.memory_space<vmem>>, %arg4: memref<1x1x512xbf16, #tpu.memory_space<vmem>>) attributes {dimension_semantics = [#tpu.dimension_semantics<parallel>], iteration_bounds = array<i64: 2>, scalar_prefetch = 0 : i64, scratch_operands = 0 : i64, tpu.core_type = #tpu.core_type<tc>, window_params = [{transform_indices = @transform_0, window_bounds = array<i64: 1, 40, 128>}, {pipeline_mode = #tpu.pipeline_mode<synchronous>, transform_indices = @transform_1, window_bounds = array<i64: 1152, 512>}, {pipeline_mode = #tpu.pipeline_mode<synchronous>, transform_indices = @transform_2, window_bounds = array<i64: 1, 512>}, {transform_indices = @transform_3, window_bounds = array<i64: 1, 1, 512>}]} {
    %c0 = arith.constant 0 : index
    %c0_0 = arith.constant 0 : index
    %c0_1 = arith.constant 0 : index
    %0 = vector.load %arg1[%c0, %c0_0, %c0_1] : memref<1x40x128xbf16, #tpu.memory_space<vmem>>, vector<1x40x128xbf16>
    %1 = vector.shape_cast %0 : vector<1x40x128xbf16> to vector<40x128xbf16>
    %cst = arith.constant 0.000000e+00 : f32
    %2 = vector.broadcast %cst : f32 to vector<16x512xf32>
    %3 = vector.extract_strided_slice %1 {offsets = [0, 0], sizes = [16, 128], strides = [1, 1]} : vector<40x128xbf16> to vector<16x128xbf16>
    %c0_2 = arith.constant 0 : index
    %c0_3 = arith.constant 0 : index
    %4 = vector.load %arg2[%c0_2, %c0_3] : memref<1152x512xbf16, #tpu.memory_space<vmem>>, vector<128x512xbf16>
    %cst_4 = arith.constant dense<0.000000e+00> : vector<16x512xf32>
    %5 = tpu.matmul %3, %4, %cst_4 {dimension_numbers = #tpu.dot_dimension_numbers<[1], [0], [0], [1], [0, 0, 1, 1], [], []>} : vector<16x128xbf16>, vector<128x512xbf16>, vector<16x512xf32> -> vector<16x512xf32>
    %6 = arith.addf %2, %5 : vector<16x512xf32>
    %7 = vector.extract_strided_slice %1 {offsets = [1, 0], sizes = [16, 128], strides = [1, 1]} : vector<40x128xbf16> to vector<16x128xbf16>
    %c128 = arith.constant 128 : index
    %c0_5 = arith.constant 0 : index
    %8 = vector.load %arg2[%c128, %c0_5] : memref<1152x512xbf16, #tpu.memory_space<vmem>>, vector<128x512xbf16>
    %cst_6 = arith.constant dense<0.000000e+00> : vector<16x512xf32>
    %9 = tpu.matmul %7, %8, %cst_6 {dimension_numbers = #tpu.dot_dimension_numbers<[1], [0], [0], [1], [0, 0, 1, 1], [], []>} : vector<16x128xbf16>, vector<128x512xbf16>, vector<16x512xf32> -> vector<16x512xf32>
    %10 = arith.addf %6, %9 : vector<16x512xf32>
    %11 = vector.extract_strided_slice %1 {offsets = [2, 0], sizes = [16, 128], strides = [1, 1]} : vector<40x128xbf16> to vector<16x128xbf16>
    %c256 = arith.constant 256 : index
    %c0_7 = arith.constant 0 : index
    %12 = vector.load %arg2[%c256, %c0_7] : memref<1152x512xbf16, #tpu.memory_space<vmem>>, vector<128x512xbf16>
    %cst_8 = arith.constant dense<0.000000e+00> : vector<16x512xf32>
    %13 = tpu.matmul %11, %12, %cst_8 {dimension_numbers = #tpu.dot_dimension_numbers<[1], [0], [0], [1], [0, 0, 1, 1], [], []>} : vector<16x128xbf16>, vector<128x512xbf16>, vector<16x512xf32> -> vector<16x512xf32>
    %14 = arith.addf %10, %13 : vector<16x512xf32>
    %15 = vector.extract_strided_slice %1 {offsets = [8, 0], sizes = [16, 128], strides = [1, 1]} : vector<40x128xbf16> to vector<16x128xbf16>
    %c384 = arith.constant 384 : index
    %c0_9 = arith.constant 0 : index
    %16 = vector.load %arg2[%c384, %c0_9] : memref<1152x512xbf16, #tpu.memory_space<vmem>>, vector<128x512xbf16>
    %cst_10 = arith.constant dense<0.000000e+00> : vector<16x512xf32>
    %17 = tpu.matmul %15, %16, %cst_10 {dimension_numbers = #tpu.dot_dimension_numbers<[1], [0], [0], [1], [0, 0, 1, 1], [], []>} : vector<16x128xbf16>, vector<128x512xbf16>, vector<16x512xf32> -> vector<16x512xf32>
    %18 = arith.addf %14, %17 : vector<16x512xf32>
    %19 = vector.extract_strided_slice %1 {offsets = [9, 0], sizes = [16, 128], strides = [1, 1]} : vector<40x128xbf16> to vector<16x128xbf16>
    %c512 = arith.constant 512 : index
    %c0_11 = arith.constant 0 : index
    %20 = vector.load %arg2[%c512, %c0_11] : memref<1152x512xbf16, #tpu.memory_space<vmem>>, vector<128x512xbf16>
    %cst_12 = arith.constant dense<0.000000e+00> : vector<16x512xf32>
    %21 = tpu.matmul %19, %20, %cst_12 {dimension_numbers = #tpu.dot_dimension_numbers<[1], [0], [0], [1], [0, 0, 1, 1], [], []>} : vector<16x128xbf16>, vector<128x512xbf16>, vector<16x512xf32> -> vector<16x512xf32>
    %22 = arith.addf %18, %21 : vector<16x512xf32>
    %23 = vector.extract_strided_slice %1 {offsets = [10, 0], sizes = [16, 128], strides = [1, 1]} : vector<40x128xbf16> to vector<16x128xbf16>
    %c640 = arith.constant 640 : index
    %c0_13 = arith.constant 0 : index
    %24 = vector.load %arg2[%c640, %c0_13] : memref<1152x512xbf16, #tpu.memory_space<vmem>>, vector<128x512xbf16>
    %cst_14 = arith.constant dense<0.000000e+00> : vector<16x512xf32>
    %25 = tpu.matmul %23, %24, %cst_14 {dimension_numbers = #tpu.dot_dimension_numbers<[1], [0], [0], [1], [0, 0, 1, 1], [], []>} : vector<16x128xbf16>, vector<128x512xbf16>, vector<16x512xf32> -> vector<16x512xf32>
    %26 = arith.addf %22, %25 : vector<16x512xf32>
    %27 = vector.extract_strided_slice %1 {offsets = [16, 0], sizes = [16, 128], strides = [1, 1]} : vector<40x128xbf16> to vector<16x128xbf16>
    %c768 = arith.constant 768 : index
    %c0_15 = arith.constant 0 : index
    %28 = vector.load %arg2[%c768, %c0_15] : memref<1152x512xbf16, #tpu.memory_space<vmem>>, vector<128x512xbf16>
    %cst_16 = arith.constant dense<0.000000e+00> : vector<16x512xf32>
    %29 = tpu.matmul %27, %28, %cst_16 {dimension_numbers = #tpu.dot_dimension_numbers<[1], [0], [0], [1], [0, 0, 1, 1], [], []>} : vector<16x128xbf16>, vector<128x512xbf16>, vector<16x512xf32> -> vector<16x512xf32>
    %30 = arith.addf %26, %29 : vector<16x512xf32>
    %31 = vector.extract_strided_slice %1 {offsets = [17, 0], sizes = [16, 128], strides = [1, 1]} : vector<40x128xbf16> to vector<16x128xbf16>
    %c896 = arith.constant 896 : index
    %c0_17 = arith.constant 0 : index
    %32 = vector.load %arg2[%c896, %c0_17] : memref<1152x512xbf16, #tpu.memory_space<vmem>>, vector<128x512xbf16>
    %cst_18 = arith.constant dense<0.000000e+00> : vector<16x512xf32>
    %33 = tpu.matmul %31, %32, %cst_18 {dimension_numbers = #tpu.dot_dimension_numbers<[1], [0], [0], [1], [0, 0, 1, 1], [], []>} : vector<16x128xbf16>, vector<128x512xbf16>, vector<16x512xf32> -> vector<16x512xf32>
    %34 = arith.addf %30, %33 : vector<16x512xf32>
    %35 = vector.extract_strided_slice %1 {offsets = [18, 0], sizes = [16, 128], strides = [1, 1]} : vector<40x128xbf16> to vector<16x128xbf16>
    %c1024 = arith.constant 1024 : index
    %c0_19 = arith.constant 0 : index
    %36 = vector.load %arg2[%c1024, %c0_19] : memref<1152x512xbf16, #tpu.memory_space<vmem>>, vector<128x512xbf16>
    %cst_20 = arith.constant dense<0.000000e+00> : vector<16x512xf32>
    %37 = tpu.matmul %35, %36, %cst_20 {dimension_numbers = #tpu.dot_dimension_numbers<[1], [0], [0], [1], [0, 0, 1, 1], [], []>} : vector<16x128xbf16>, vector<128x512xbf16>, vector<16x512xf32> -> vector<16x512xf32>
    %38 = arith.addf %34, %37 : vector<16x512xf32>
    %c0_21 = arith.constant 0 : index
    %c0_22 = arith.constant 0 : index
    %39 = vector.load %arg3[%c0_21, %c0_22] : memref<1x512xf32, #tpu.memory_space<vmem>>, vector<1x512xf32>
    %40 = vector.broadcast %39 : vector<1x512xf32> to vector<16x512xf32>
    %41 = arith.addf %38, %40 : vector<16x512xf32>
    %cst_23 = arith.constant 0.000000e+00 : f32
    %42 = vector.broadcast %cst_23 : f32 to vector<16x512xf32>
    %43 = arith.maximumf %41, %42 : vector<16x512xf32>
    %44 = vector.shape_cast %43 : vector<16x512xf32> to vector<2x8x512xf32>
    %45 = vector.extract_strided_slice %44 {offsets = [0, 0, 0], sizes = [2, 2, 512], strides = [1, 1, 1]} : vector<2x8x512xf32> to vector<2x2x512xf32>
    %46 = vector.shape_cast %45 : vector<2x2x512xf32> to vector<1x2x2x512xf32>
    %cst_24 = arith.constant dense<0xFF800000> : vector<1x2x512xf32>
    %47 = vector.multi_reduction <maximumf>, %46, %cst_24 [1] : vector<1x2x2x512xf32> to vector<1x2x512xf32>
    %48 = vector.shape_cast %47 : vector<1x2x512xf32> to vector<1x1x2x512xf32>
    %cst_25 = arith.constant dense<0xFF800000> : vector<1x1x512xf32>
    %49 = vector.multi_reduction <maximumf>, %48, %cst_25 [2] : vector<1x1x2x512xf32> to vector<1x1x512xf32>
    %50 = arith.truncf %49 : vector<1x1x512xf32> to vector<1x1x512xbf16>
    %51 = vector.shape_cast %50 : vector<1x1x512xbf16> to vector<1x512xbf16>
    %c0_26 = arith.constant 0 : index
    %c0_27 = arith.constant 0 : index
    %c0_28 = arith.constant 0 : index
    %52 = vector.load %arg4[%c0_26, %c0_27, %c0_28] : memref<1x1x512xbf16, #tpu.memory_space<vmem>>, vector<1x1x512xbf16>
    %53 = vector.shape_cast %52 : vector<1x1x512xbf16> to vector<1x512xbf16>
    %54 = vector.shape_cast %51 : vector<1x512xbf16> to vector<1x1x512xbf16>
    tpu.vector_store %arg4[%c0_26, %c0_27, %c0_28], %54 {strides = array<i32>} : memref<1x1x512xbf16, #tpu.memory_space<vmem>>, vector<1x1x512xbf16>,
    return
  }
  func.func @transform_0(%arg0: i32) -> (i32, i32, i32) {
    %c0_i32 = arith.constant 0 : i32
    %c0_i32_0 = arith.constant 0 : i32
    %c0_i32_1 = arith.constant 0 : i32
    return %arg0, %c0_i32, %c0_i32_0 : i32, i32, i32
  }
  func.func @transform_1(%arg0: i32) -> (i32, i32) {
    %c0_i32 = arith.constant 0 : i32
    %c0_i32_0 = arith.constant 0 : i32
    %c0_i32_1 = arith.constant 0 : i32
    return %c0_i32, %c0_i32_0 : i32, i32
  }
  func.func @transform_2(%arg0: i32) -> (i32, i32) {
    %c0_i32 = arith.constant 0 : i32
    %c0_i32_0 = arith.constant 0 : i32
    %c0_i32_1 = arith.constant 0 : i32
    return %c0_i32, %c0_i32_0 : i32, i32
  }
  func.func @transform_3(%arg0: i32) -> (i32, i32, i32) {
    %c0_i32 = arith.constant 0 : i32
    %c0_i32_0 = arith.constant 0 : i32
    %c0_i32_1 = arith.constant 0 : i32
    return %arg0, %c0_i32, %c0_i32_0 : i32, i32, i32
  }
}

module attributes {stable_mosaic.version = 11 : i64} {
  func.func @_linear_kernel(%arg0: i32, %arg1: memref<8x512xbf16, #tpu.memory_space<vmem>>, %arg2: memref<512x128xbf16, #tpu.memory_space<vmem>>, %arg3: memref<1x128xf32, #tpu.memory_space<vmem>>, %arg4: memref<8x128xf32, #tpu.memory_space<vmem>>) attributes {dimension_semantics = [#tpu.dimension_semantics<arbitrary>], iteration_bounds = array<i64: 1>, scalar_prefetch = 0 : i64, scratch_operands = 0 : i64, tpu.core_type = #tpu.core_type<tc>, window_params = [{pipeline_mode = #tpu.pipeline_mode<synchronous>, transform_indices = @transform_0, window_bounds = array<i64: 8, 512>}, {pipeline_mode = #tpu.pipeline_mode<synchronous>, transform_indices = @transform_1, window_bounds = array<i64: 512, 128>}, {pipeline_mode = #tpu.pipeline_mode<synchronous>, transform_indices = @transform_2, window_bounds = array<i64: 1, 128>}, {pipeline_mode = #tpu.pipeline_mode<synchronous>, transform_indices = @transform_3, window_bounds = array<i64: 8, 128>}]} {
    %c0 = arith.constant 0 : index
    %c0_0 = arith.constant 0 : index
    %0 = vector.load %arg1[%c0, %c0_0] : memref<8x512xbf16, #tpu.memory_space<vmem>>, vector<8x512xbf16>
    %c0_1 = arith.constant 0 : index
    %c0_2 = arith.constant 0 : index
    %1 = vector.load %arg2[%c0_1, %c0_2] : memref<512x128xbf16, #tpu.memory_space<vmem>>, vector<512x128xbf16>
    %cst = arith.constant dense<0.000000e+00> : vector<8x128xf32>
    %2 = tpu.matmul %0, %1, %cst {dimension_numbers = #tpu.dot_dimension_numbers<[1], [0], [0], [1], [0, 0, 1, 1], [], []>} : vector<8x512xbf16>, vector<512x128xbf16>, vector<8x128xf32> -> vector<8x128xf32>
    %c0_3 = arith.constant 0 : index
    %c0_4 = arith.constant 0 : index
    %3 = vector.load %arg3[%c0_3, %c0_4] : memref<1x128xf32, #tpu.memory_space<vmem>>, vector<1x128xf32>
    %4 = vector.broadcast %3 : vector<1x128xf32> to vector<8x128xf32>
    %5 = arith.addf %2, %4 : vector<8x128xf32>
    %c0_5 = arith.constant 0 : index
    %c0_6 = arith.constant 0 : index
    %6 = vector.load %arg4[%c0_5, %c0_6] : memref<8x128xf32, #tpu.memory_space<vmem>>, vector<8x128xf32>
    tpu.vector_store %arg4[%c0_5, %c0_6], %5 {strides = array<i32>} : memref<8x128xf32, #tpu.memory_space<vmem>>, vector<8x128xf32>,
    return
  }
  func.func @transform_0(%arg0: i32) -> (i32, i32) {
    %c0_i32 = arith.constant 0 : i32
    %c0_i32_0 = arith.constant 0 : i32
    %c0_i32_1 = arith.constant 0 : i32
    return %c0_i32, %c0_i32_0 : i32, i32
  }
  func.func @transform_1(%arg0: i32) -> (i32, i32) {
    %c0_i32 = arith.constant 0 : i32
    %c0_i32_0 = arith.constant 0 : i32
    %c0_i32_1 = arith.constant 0 : i32
    return %c0_i32, %c0_i32_0 : i32, i32
  }
  func.func @transform_2(%arg0: i32) -> (i32, i32) {
    %c0_i32 = arith.constant 0 : i32
    %c0_i32_0 = arith.constant 0 : i32
    %c0_i32_1 = arith.constant 0 : i32
    return %c0_i32, %c0_i32_0 : i32, i32
  }
  func.func @transform_3(%arg0: i32) -> (i32, i32) {
    %c0_i32 = arith.constant 0 : i32
    %c0_i32_0 = arith.constant 0 : i32
    %c0_i32_1 = arith.constant 0 : i32
    return %c0_i32, %c0_i32_0 : i32, i32
  }
}

</mosaic_0001>

<bundles_post_ra>
// kernel: vgg_forward.7
= control target key start
LH: loop header
LB: loop body
LE: loop exit
PB: predicated region body
PF: predicated region fallthrough
CT: control target
= control target key end

     0   :  { %s624_s1 = inlined_call_operand.vmem [shape: bf16[512,128], index: 1, kind: input, shape index: {}]   ;;  %s625_s0 = inlined_call_operand.vmem [shape: bf16[8,512], index: 0, kind: input, shape index: {}]   ;;  %s626_s2 = inlined_call_operand.vmem [shape: f32[1,128], index: 2, kind: input, shape index: {}]   ;;  %s627_s3 = inlined_call_operand.vmem [shape: f32[8,128], index: 3, kind: output, shape index: {}]  }
   0x1   :  { %v460_v0 = vld [vmem:[%s624_s1 + $0x40] sm:$0xff]   ;;  %v464_v4 = vld [vmem:[%s624_s1 + $0x48] sm:$0xff]   ;;  %v468_v8 = vld [vmem:[%s624_s1 + $0x50] sm:$0xff]  }
   0x2   :  { %v461_v1 = vld [vmem:[%s624_s1 + $0xc0] sm:$0xff]   ;;  %416 = vmatprep.subr.bf16.mxu0 %v460_v0  ;;  %v465_v5 = vld [vmem:[%s624_s1 + $0xc8] sm:$0xff]   ;;  %v469_v9 = vld [vmem:[%s624_s1 + $0xd0] sm:$0xff]  }
   0x3   :  { %v462_v2 = vld [vmem:[%s624_s1] sm:$0xff]   ;;  %438 = vmatprep.subr.bf16.mxu1 %v461_v1  ;;  %v466_v6 = vld [vmem:[%s624_s1 + $0x8] sm:$0xff]   ;;  %v470_v10 = vld [vmem:[%s624_s1 + $0x10] sm:$0xff]  }
   0x4   :  { %v463_v3 = vld [vmem:[%s624_s1 + $0x80] sm:$0xff]   ;;  %417 = vmatpush3.bf16.msra.mxu0 %v462_v2  ;;  %v467_v7 = vld [vmem:[%s624_s1 + $0x88] sm:$0xff]   ;;  %v471_v11 = vld [vmem:[%s624_s1 + $0x90] sm:$0xff]  }
   0x5   :  { %439 = vmatpush3.bf16.msra.mxu1 %v463_v3  ;;  %418 = vmatprep.subr.bf16.mxu0 %v464_v4  ;;  %v472_v12 = vld [vmem:[%s624_s1 + $0x58] sm:$0xff]   ;;  %v476_v16 = vld [vmem:[%s624_s1 + $0x60] sm:$0xff]   ;;  %v480_v20 = vld [vmem:[%s624_s1 + $0x68] sm:$0xff]  }
   0x6   :  { %440 = vmatprep.subr.bf16.mxu1 %v465_v5  ;;  %v473_v13 = vld [vmem:[%s624_s1 + $0xd8] sm:$0xff]   ;;  %v477_v17 = vld [vmem:[%s624_s1 + $0xe0] sm:$0xff]   ;;  %v481_v21 = vld [vmem:[%s624_s1 + $0xe8] sm:$0xff]  }
   0x7   :  { %v474_v14 = vld [vmem:[%s624_s1 + $0x18] sm:$0xff]   ;;  %v478_v18 = vld [vmem:[%s624_s1 + $0x20] sm:$0xff]   ;;  %v482_v22 = vld [vmem:[%s624_s1 + $0x28] sm:$0xff]  }
   0x8   :  { %419 = vmatpush3.bf16.msra.mxu0 %v466_v6  ;;  %v475_v15 = vld [vmem:[%s624_s1 + $0x98] sm:$0xff]   ;;  %v479_v19 = vld [vmem:[%s624_s1 + $0xa0] sm:$0xff]   ;;  %v483_v23 = vld [vmem:[%s624_s1 + $0xa8] sm:$0xff]  }
   0x9   :  { %441 = vmatpush3.bf16.msra.mxu1 %v467_v7  ;;  %420 = vmatprep.subr.bf16.mxu0 %v468_v8  ;;  %v484_v24 = vld [vmem:[%s624_s1 + $0x70] sm:$0xff]   ;;  %v488_v28 = vld [vmem:[%s624_s1 + $0x78] sm:$0xff]   ;;  %v15_v32 = vld [vmem:[%s625_s0] sm:$0xff] }
   0xa   :  { %442 = vmatprep.subr.bf16.mxu1 %v469_v9  ;;  %v485_v25 = vld [vmem:[%s624_s1 + $0xf0] sm:$0xff]   ;;  %v489_v29 = vld [vmem:[%s624_s1 + $0xf8] sm:$0xff]   ;;  %v16_v33 = vld [vmem:[%s625_s0 + $0x8] sm:$0xff]  ;;  %v380_v34 = vcombine.low %v15_v32, %v15_v32  ;;  %v381_v35 = vcombine.high %v15_v32, %v15_v32 }
   0xb   :  { %v486_v26 = vld [vmem:[%s624_s1 + $0x30] sm:$0xff]   ;;  %v490_v30 = vld [vmem:[%s624_s1 + $0x38] sm:$0xff]   ;;  %v382_v36 = vcombine.low %v16_v33, %v16_v33  ;;  %v383_v37 = vcombine.high %v16_v33, %v16_v33  ;;  %v379_v40 = vld [vmem:[%s626_s2] ss:$0 sm:$0xff] }
   0xc   :  { %421 = vmatpush3.bf16.msra.mxu0 %v470_v10  ;;  %v487_v27 = vld [vmem:[%s624_s1 + $0xb0] sm:$0xff]   ;;  %v491_v31 = vld [vmem:[%s624_s1 + $0xb8] sm:$0xff]   ;;  %326 = vmatprep.mubr.bf16.mxu0 %v381_v35 }
   0xd   :  { %443 = vmatpush3.bf16.msra.mxu1 %v471_v11  ;;  %422 = vmatprep.subr.bf16.mxu0 %v472_v12 }
   0xe   :  { %444 = vmatprep.subr.bf16.mxu1 %v473_v13  ;;  %366 = vmatprep.mubr.bf16.mxu1 %v383_v37 }
  0x10   :  { %423 = vmatpush3.bf16.msra.mxu0 %v474_v14 }
  0x11   :  { %445 = vmatpush3.bf16.msra.mxu1 %v475_v15  ;;  %424 = vmatprep.subr.bf16.mxu0 %v476_v16 }
  0x12   :  { %446 = vmatprep.subr.bf16.mxu1 %v477_v17 }
  0x14   :  { %425 = vmatpush3.bf16.msra.mxu0 %v478_v18 }
  0x15   :  { %447 = vmatpush3.bf16.msra.mxu1 %v479_v19  ;;  %426 = vmatprep.subr.bf16.mxu0 %v480_v20 }
  0x16   :  { %448 = vmatprep.subr.bf16.mxu1 %v481_v21 }
  0x18   :  { %427 = vmatpush3.bf16.msra.mxu0 %v482_v22 }
  0x19   :  { %449 = vmatpush3.bf16.msra.mxu1 %v483_v23  ;;  %428 = vmatprep.subr.bf16.mxu0 %v484_v24 }
  0x1a   :  { %450 = vmatprep.subr.bf16.mxu1 %v485_v25 }
  0x1c   :  { %429 = vmatpush3.bf16.msra.mxu0 %v486_v26 }
  0x1d   :  { %451 = vmatpush3.bf16.msra.mxu1 %v487_v27  ;;  %430 = vmatprep.subr.bf16.mxu0 %v488_v28 }
  0x1e   :  { %452 = vmatprep.subr.bf16.mxu1 %v489_v29 }
  0x20   :  { %431 = vmatpush3.bf16.msra.mxu0 %v490_v30 }
  0x21   :  { %453 = vmatpush3.bf16.msra.mxu1 %v491_v31 }
  0x23   :  { %327 = vmatmul.mubr.bf16.vlgmr.msra.gmra.mrb[0].mxu0 %v380_v34 }
  0x24   :  { %367 = vmatmul.mubr.bf16.vlgmr.msra.gmra.mrb[0].mxu1 %v382_v36 }
  0xf6   :  { %v432_v38 = vpop.f32.mrb[0].mxu0 }
  0xf7   :  { %v454_v39 = vpop.f32.mrb[0].mxu1  ;;  %v433_v41 = vpop.f32.mrb[1].mxu0 }
  0xf8   :  { %v455_v42 = vpop.f32.mrb[1].mxu1  ;;  %v434_v43 = vadd.f32 %v433_v41, %v432_v38  ;;  %v435_v45 = vpop.f32.mrb[2].mxu0 }
  0xf9   :  { %v456_v44 = vadd.f32 %v455_v42, %v454_v39  ;;  %v457_v46 = vpop.f32.mrb[2].mxu1  ;;  %v436_v47 = vpop.f32.mrb[3].mxu0 }
  0xfa   :  { %v458_v48 = vpop.f32.mrb[3].mxu1  ;;  %v329_v49 = vadd.f32 %v434_v43, %v379_v40 }
  0xfc   :  { %v369_v50 = vadd.f32 %v456_v44, %v329_v49 }
  0xfe   :  { %374 = vst [vmem:[%s627_s3] sm:$0xff] %v369_v50 }

// kernel: vgg_forward.5
= control target key start
LH: loop header
LB: loop body
LE: loop exit
PB: predicated region body
PF: predicated region fallthrough
CT: control target
= control target key end

     0   :  { %8 = vsyncpa [#allocation3], 0  ;;  %s2100_s12 = smov 0   ;;  %s2268_s0 = inlined_call_operand.vmem [shape: bf16[2,56,128], index: 0, kind: input, shape index: {}]   ;;  %s2269_s1 = inlined_call_operand.hbm [shape: bf16[1152,128], index: 1, kind: input, shape index: {}]   ;;  %s2270_s2 = inlined_call_operand.vmem [shape: f32[1,128], index: 2, kind: input, shape index: {}]   ;;  %s2271_s3 = inlined_call_operand.vmem [shape: bf16[2,40,128], index: 3, kind: output, shape index: {}]  }
   0x1 LB: > { %s2106_s13 = sadd.s32 4294967295, %s2073_s12   ;;  %p1530_p0 = scmp.ge.s32.totalorder %s2073_s12, 1  ;;  %s2073_s12 = sphi %s2100_s12, %s14_s12  }
   0x2   : > { %p113_p1 = scmp.lt.s32.totalorder %s2073_s12, 3  ;;  %s2075_s14 = smov [#allocation2]  }
   0x3   : > { %s125_s15 = sshll.u32 %s2075_s14, 4  ;;  %p2272_p3 = scmp.eq.s32.totalorder %s2106_s13, 0  ;;  %s126_s15 = int_to_ptr.vmem [resolvable:$true] %s125_s15 }
   0x4   : > { %p2110_p2 = pnand %p1530_p0, %p113_p1  ;;  %s2035_s20 = scalar_lea.hbm %s2269_s1, 9216 }
   0x5   : > { %p2036_p6 = scmp.ne.s32.totalorder %s2269_s1, %s2035_s20  ;;  %p2042_p10 = scmp.lt.u32.totalorder %s2035_s20, %s2269_s1 }
   0x6   : > { %s2274_s16 = scalar_select %p2110_p2, 1, 0 }
   0x7   : > { %p1936_p4 = pneg %p2110_p2 }
   0x9   : > { %p2119_p5 = pnand %p2272_p3, %p1936_p4 }
   0xb   : > { %p2037_p7 = pneg %p2119_p5 }
   0xd   : > { %p2038_p8 = pnand %p2037_p7, %p2036_p6 }
   0xf   : > { %p2039_p9 = pneg %p2038_p8 }
  0x11   : > { %p2044_p11 = pnand %p2042_p10, %p2039_p9 }
  0x13   : > { %2047 = shalt.err (!%p2044_p11)
}
  0x14   : > { %s2048_s25 = scalar_lea.vmem %s126_s15, 9216  ;;  %p2056_p1 = scmp.lt.s32.totalorder %s126_s15, %s126_s15 }
  0x15   : > { %p2049_p12 = scmp.ne.s32.totalorder %s126_s15, %s2048_s25  ;;  %p2057_p4 = scmp.lt.s32.totalorder %s2048_s25, %s2048_s25 }
  0x17   : > { %p2051_p13 = pnand %p2049_p12, %p2037_p7  ;;  %p2058_p3 = por %p2057_p4, %p2056_p1 }
  0x19   : > { %p2052_p0 = pneg %p2051_p13 }
  0x1b   : > { %p2059_p2 = pnand %p2058_p3, %p2052_p0 }
  0x1d   : > { %2062 = shalt.err (!%p2059_p2)
}
  0x1e   : > { %s2076_s26 = smov 64   ;;  %s2077_s27 = smov 4  }
  0x1f   : > { %1939 = dma.hbm_to_vmem [thread:$0]  (!%p2119_p5), %s2269_s1, 9216, %s126_s15, [#allocation3], %s2076_s26, %s2076_s26, %s2077_s27  }
  0x20   : > { %p2276_p6 = scmp.ne.s32.totalorder %s2274_s16, 0 }
  0x21   : > { %p2277_p8 = scmp.eq.s32.totalorder (!%p2276_p6), %s2106_s13, 0 }
  0x22   : > { %152 = sbr.rel (%p2276_p6) target bundleno = 454 (0x1c6), region = 32 }
  0x29   : > { %2068 = dma.done.wait (%p2277_p8), [#allocation3], 9216   ;;  %p2278_p7 = pmov %p2277_p8 }
  0x2a   : > { %v1955_v0 = vld [vmem:[#allocation2 + $0x40] sm:$0xff]   ;;  %p176_p2 = scmp.lt.s32.totalorder %s2106_s13, 1  ;;  %v1957_v2 = vld [vmem:[#allocation2 + $0x48] sm:$0xff]   ;;  %v1959_v4 = vld [vmem:[#allocation2 + $0x50] sm:$0xff]   ;;  %vm239_vm0 = vsmask.f32 7424 }
  0x2b   : > { %2070 = vsyncadd (%p2278_p7), [#allocation3], 4294958080  ;;  %v1956_v1 = vld [vmem:[#allocation2 + $0x100] sm:$0xff]   ;;  %1718 = vmatprep.subr.bf16.mxu1 %v1955_v0  ;;  %v1958_v3 = vld [vmem:[#allocation2 + $0x108] sm:$0xff]   ;;  %vm474_vm1 = vcmask 1046528   ;;  %vm1362_vm2 = vcmask 1043456  }
  0x2c   : > { %1798 = vmatprep.subr.bf16.mxu0 %v1956_v1  ;;  %1719 = vmatpush3.bf16.msra.mxu1 %v1955_v0  ;;  %v1960_v5 = vld [vmem:[#allocation2 + $0x110] sm:$0xff]   ;;  %s2280_s13 = smov (!%p176_p2, %s2106_s13), 1  ;;  %v1961_v6 = vld [vmem:[#allocation2 + $0x58] sm:$0xff]   ;;  %v1963_v8 = vld [vmem:[#allocation2 + $0x60] sm:$0xff]   ;;  %vm1391_vm3 = vcmask 1041408   ;;  %vm1437_vm4 = vcmask 1042434  }
  0x2d   : > { %1799 = vmatpush3.bf16.msra.mxu0 %v1956_v1  ;;  %1720 = vmatprep.subr.bf16.mxu1 %v1957_v2  ;;  %v1962_v7 = vld [vmem:[#allocation2 + $0x118] sm:$0xff]   ;;  %s1930_s30 = smul.u32 28, %s2280_s13  ;;  %v1964_v9 = vld [vmem:[#allocation2 + $0x120] sm:$0xff]   ;;  %v1965_v10 = vld [vmem:[#allocation2 + $0x68] sm:$0xff]   ;;  %vm1442_vm5 = vsmask.f32 1282 }
  0x2e   : > { %1800 = vmatprep.subr.bf16.mxu0 %v1958_v3  ;;  %v1966_v11 = vld [vmem:[#allocation2 + $0x128] sm:$0xff]   ;;  %v1967_v23 = vld [vmem:[#allocation2 + $0x70] sm:$0xff]   ;;  %v1969_v33 = vld [vmem:[#allocation2 + $0x78] sm:$0xff]   ;;  %s1931_s7 = smul.u32 20, %s2280_s13 }
  0x2f   : > { %s2153_s6 = scalar_lea.vmem %s2268_s0, %s1930_s30  ;;  %v1968_v29 = vld [vmem:[#allocation2 + $0x130] sm:$0xff]   ;;  %v1970_v44 = vld [vmem:[#allocation2 + $0x138] sm:$0xff]   ;;  %v1973_v49 = vld [vmem:[#allocation2] sm:$0xff]  }
  0x30   : > { %1721 = vmatpush3.bf16.msra.mxu1 %v1957_v2  ;;  %v187_v12 = vld [vmem:[%s2153_s6] sm:$0xf]  ;;  %v188_v13 = vld [vmem:[%s2153_s6 + $0x4] sm:$0xf]  ;;  %v189_v14 = vld [vmem:[%s2153_s6 + $0x8] sm:$0xf]  ;;  %s2246_s10 = scalar_lea.vmem %s2271_s3, %s1931_s7 }
  0x31   : > { %1801 = vmatpush3.bf16.msra.mxu0 %v1958_v3  ;;  %1722 = vmatprep.subr.bf16.mxu1 %v1959_v4  ;;  %v190_v15 = vld [vmem:[%s2153_s6 + $0xc] sm:$0xf]  ;;  %v2159_v16 = vcombine.low %v187_v12, %v188_v13  ;;  %v2161_v17 = vcombine.low %v188_v13, %v189_v14  ;;  %v191_v19 = vld [vmem:[%s2153_s6 + $0x10] sm:$0xf]  ;;  %v192_v28 = vld [vmem:[%s2153_s6 + $0x14] sm:$0xf] }
  0x32   : > { %1802 = vmatprep.subr.bf16.mxu0 %v1960_v5  ;;  %v2163_v18 = vcombine.low %v189_v14, %v190_v15  ;;  %v2168_v22 = vcombine.low %v190_v15, %v191_v19  ;;  %v2173_v27 = vcombine.low %v191_v19, %v191_v19  ;;  %v2177_v32 = vcombine.low %v192_v28, %v192_v28  ;;  %v1976_v52 = vld [vmem:[#allocation2 + $0x140] sm:$0xff]   ;;  %v1979_v57 = vld [vmem:[#allocation2 + $0x8] sm:$0xff]   ;;  %v1981_v60 = vld [vmem:[#allocation2 + $0x10] sm:$0xff]  }
  0x33   : > { %v241_v20 = vshrl.u32 %v2159_v16, 16  ;;  %v243_v21 = vshll.u32 %v2159_v16, 16  ;;  %v724_v25 = vshrl.u32 %v2161_v17, 16  ;;  %v726_v26 = vshll.u32 %v2161_v17, 16  ;;  %v1980_v58 = vld [vmem:[#allocation2 + $0x148] sm:$0xff]   ;;  %v1982_v1 = vld [vmem:[#allocation2 + $0x150] sm:$0xff]   ;;  %vm1443_vm6 = vmand %vm1391_vm3, %vm1442_vm5 }
  0x34   : > { %1723 = vmatpush3.bf16.msra.mxu1 %v1959_v4  ;;  %v248_v24 = vshll.u32 %v2163_v18, 16  ;;  %v731_v31 = vshll.u32 %v2168_v22, 16  ;;  %v252_v36 = vshrl.u32 %v2163_v18, 16  ;;  %v2180_v37 = vcombine.low %v191_v19, %v192_v28  ;;  %v1983_v4 = vld [vmem:[#allocation2 + $0x18] sm:$0xff]   ;;  %v1993_v14 = vld [vmem:[#allocation2 + $0x80] sm:$0xff]   ;;  %v1998_v28 = vld [vmem:[#allocation2 + $0x190] sm:$0xff]  }
  0x35   : > { %1803 = vmatpush3.bf16.msra.mxu0 %v1960_v5  ;;  %1724 = vmatprep.subr.bf16.mxu1 %v1961_v6  ;;  %v245_v30 = vrot.slane %v243_v21, 1  ;;  %v728_v35 = vrot.slane %v726_v26, 1  ;;  %v256_v40 = vshll.u32 %v2173_v27, 16  ;;  %v735_v42 = vshrl.u32 %v2168_v22, 16  ;;  %v1984_v5 = vld [vmem:[#allocation2 + $0x158] sm:$0xff]   ;;  %v1994_v19 = vld [vmem:[#allocation2 + $0x180] sm:$0xff]  }
  0x36   : > { %1804 = vmatprep.subr.bf16.mxu0 %v1962_v7  ;;  %v250_v34 = vrot.slane %v248_v24, 1  ;;  %v733_v39 = vrot.slane %v731_v31, 1  ;;  %v739_v43 = vshll.u32 %v2177_v32, 16  ;;  %v862_v54 = vrot.slane %v2161_v17, 1  ;;  %v1991_v12 = vld [vmem:[#allocation2 + $0x38] sm:$0xff]   ;;  %v1996_v24 = vld [vmem:[#allocation2 + $0x188] sm:$0xff]  }
  0x37   : > { %v246_v38 = vor.u32 %v245_v30, %v241_v20  ;;  %v729_v41 = vor.u32 %v728_v35, %v724_v25  ;;  %v258_v48 = vrot.slane %v256_v40, 1  ;;  %v863_v55 = vrot.slane %v2168_v22, 1  ;;  %v1992_v13 = vld [vmem:[#allocation2 + $0x178] sm:$0xff]   ;;  %v1997_v26 = vld [vmem:[#allocation2 + $0x90] sm:$0xff]   ;;  %v2003_v40 = vld [vmem:[#allocation2 + $0xa8] sm:$0xff]  }
  0x38   : > { %1725 = vmatpush3.bf16.msra.mxu1 %v1961_v6  ;;  %v254_v47 = vor.u32 %v252_v36, %v250_v34  ;;  %v737_v50 = vor.u32 %v735_v42, %v733_v39  ;;  %v741_v51 = vrot.slane %v739_v43, 1  ;;  %v1109_v59 = vshll.u32 %v2180_v37, 16  ;;  %v1985_v6 = vld [vmem:[#allocation2 + $0x20] sm:$0xff]   ;;  %v2005_v42 = vld [vmem:[#allocation2 + $0xb0] sm:$0xff]  }
  0x39   : > { %1805 = vmatpush3.bf16.msra.mxu0 %v1962_v7  ;;  %1726 = vmatprep.subr.bf16.mxu1 %v1963_v8  ;;  %v251_v45 = vsel %vm239_vm0, %v246_v38, %v250_v34  ;;  %v734_v46 = vsel %vm239_vm0, %v729_v41, %v733_v39  ;;  %v864_v61 = vsel %vm474_vm1, %v862_v54, %v863_v55  ;;  %v2198_v63 = vrot.slane %v2163_v18, 1  ;;  %v1986_v7 = vld [vmem:[#allocation2 + $0x160] sm:$0xff]   ;;  %v2000_v34 = vld [vmem:[#allocation2 + $0x198] sm:$0xff]   ;;  %v2004_v41 = vld [vmem:[#allocation2 + $0x1a8] sm:$0xff]  }
  0x3a   : > { %1806 = vmatprep.subr.bf16.mxu0 %v1964_v9  ;;  %1734 = vmatprep.mubr.bf16.mxu1 %v251_v45  ;;  %v259_v53 = vsel %vm239_vm0, %v254_v47, %v258_v48  ;;  %v742_v56 = vsel %vm239_vm0, %v737_v50, %v741_v51  ;;  %v2195_v62 = vrot.slane %v1109_v59, 1  ;;  %v1240_v0 = vrot.slane %v2180_v37, 1  ;;  %v2002_v39 = vld [vmem:[#allocation2 + $0x1a0] sm:$0xff]   ;;  %v2006_v43 = vld [vmem:[#allocation2 + $0x1b0] sm:$0xff]   ;;  %v2008_v45 = vld [vmem:[#allocation2 + $0x1b8] sm:$0xff]  }
  0x3b   : > { %1814 = vmatprep.mubr.bf16.mxu0 %v734_v46  ;;  %v865_v15 = vrot.slane %v2177_v32, 1  ;;  %v475_v20 = vrot.slane %v2159_v16, 1  ;;  %v1999_v32 = vld [vmem:[#allocation2 + $0x98] sm:$0xff]   ;;  %v478_v46 = vrot.slane %v2173_v27, 1  ;;  %v2010_v48 = vld [vmem:[#allocation2 + $0x1c0] sm:$0xff]   ;;  %v2012_v50 = vld [vmem:[#allocation2 + $0xc8] sm:$0xff]  }
  0x3c   : > { %1727 = vmatpush3.bf16.msra.mxu1 %v1963_v8  ;;  %v2204_v2 = vsel %vm239_vm0, %v254_v47, %v2195_v62  ;;  %v2210_v3 = vsel %vm474_vm1, %v2198_v63, %v1240_v0  ;;  %v1987_v8 = vld [vmem:[#allocation2 + $0x28] sm:$0xff]   ;;  %v2009_v47 = vld [vmem:[#allocation2 + $0xc0] sm:$0xff]   ;;  %v2014_v27 = vld [vmem:[#allocation2 + $0xd0] sm:$0xff]  }
  0x3d   : > { %1807 = vmatpush3.bf16.msra.mxu0 %v1964_v9  ;;  %1728 = vmatprep.subr.bf16.mxu1 %v1965_v10  ;;  %v1988_v9 = vld [vmem:[#allocation2 + $0x168] sm:$0xff]   ;;  %v866_v21 = vsel %vm474_vm1, %v863_v55, %v865_v15  ;;  %v477_v25 = vsel %vm474_vm1, %v475_v20, %v2198_v63  ;;  %v2017_v54 = vld [vmem:[#allocation2 + $0x1d8] sm:$0xff]   ;;  %v2018_v55 = vld [vmem:[#allocation2 + $0xe0] sm:$0xff]  }
  0x3e   : > { %1808 = vmatprep.subr.bf16.mxu0 %v1966_v11  ;;  %v2013_v51 = vld [vmem:[#allocation2 + $0x1c8] sm:$0xff]   ;;  %v2024_v59 = vld [vmem:[#allocation2 + $0xf8] sm:$0xff]  }
  0x40   : > { %1729 = vmatpush3.bf16.msra.mxu1 %v1965_v10  ;;  %v1989_v10 = vld [vmem:[#allocation2 + $0x30] sm:$0xff]  }
  0x41   : > { %1809 = vmatpush3.bf16.msra.mxu0 %v1966_v11  ;;  %1730 = vmatprep.subr.bf16.mxu1 %v1967_v23  ;;  %v1990_v11 = vld [vmem:[#allocation2 + $0x170] sm:$0xff]  }
  0x42   : > { %1810 = vmatprep.subr.bf16.mxu0 %v1968_v29 }
  0x44   : > { %1731 = vmatpush3.bf16.msra.mxu1 %v1967_v23  ;;  %v1995_v23 = vld [vmem:[#allocation2 + $0x88] sm:$0xff]  }
  0x45   : > { %1811 = vmatpush3.bf16.msra.mxu0 %v1968_v29  ;;  %1732 = vmatprep.subr.bf16.mxu1 %v1969_v33  ;;  %v2027_v29 = vld [vmem:[%s2153_s6 + $0x18] ss:$0 sps:$4 sm:$0xff]  }
  0x46   : > { %1812 = vmatprep.subr.bf16.mxu0 %v1970_v44  ;;  %v1117_v31 = vshll.u32 %v2027_v29, 16 }
  0x48   : > { %1733 = vmatpush3.bf16.msra.mxu1 %v1969_v33  ;;  %v1242_v33 = vrot.slane %v2027_v29, 1  ;;  %v1119_v35 = vrot.slane %v1117_v31, 1 }
  0x49   : > { %1813 = vmatpush3.bf16.msra.mxu0 %v1970_v44  ;;  %1738 = vmatprep.subr.bf16.mxu1 %v1973_v49  ;;  %v2007_v44 = vld [vmem:[#allocation2 + $0xb8] sm:$0xff]  }
  0x4a   : > { %1818 = vmatprep.subr.bf16.mxu0 %v1976_v52  ;;  %v2227_v36 = vsel %vm474_vm1, %v1240_v0, %v1242_v33  ;;  %v2030_v0 = vld [vmem:[#allocation2 + $0x218] sm:$0xff]  }
  0x4b   : > { %1735 = vmatmul.mubr.bf16.vlgmr.msra.gmra.mrb[0].mxu1 %v259_v53  ;;  %v2016_v53 = vld [vmem:[#allocation2 + $0xd8] sm:$0xff]  }
  0x4c   : > { %1739 = vmatpush3.bf16.msra.mxu1 %v1973_v49  ;;  %1815 = vmatmul.mubr.bf16.vlgmr.msra.gmra.mrb[0].mxu0 %v742_v56  ;;  %v479_v49 = vsel %vm474_vm1, %v2198_v63, %v478_v46  ;;  %v2020_v56 = vld [vmem:[#allocation2 + $0xe8] sm:$0xff]   ;;  %v2029_v63 = vld [vmem:[#allocation2 + $0x210] sm:$0xff]  }
  0x4d   : > { %1819 = vmatpush3.bf16.msra.mxu0 %v1976_v52  ;;  %1740 = vmatprep.subr.bf16.mxu1 %v1979_v57  ;;  %v2015_v52 = vld [vmem:[#allocation2 + $0x1d0] sm:$0xff]  }
  0x4e   : > { %1820 = vmatprep.subr.bf16.mxu0 %v1980_v58  ;;  %1754 = vmatprep.mubr.bf16.mxu1 %v2159_v16  ;;  %v1113_v16 = vshrl.u32 %v2180_v37, 16 }
  0x4f   : > { %1834 = vmatprep.mubr.bf16.mxu0 %v864_v61  ;;  %v2026_v61 = vld [vmem:[#allocation2 + $0x200] sm:$0xff]  }
  0x50   : > { %1741 = vmatpush3.bf16.msra.mxu1 %v1979_v57  ;;  %v1115_v30 = vor.u32 %v1113_v16, %v2195_v62  ;;  %v2022_v57 = vld [vmem:[#allocation2 + $0xf0] sm:$0xff]   ;;  %v2028_v62 = vld [vmem:[#allocation2 + $0x208] sm:$0xff]  }
  0x51   : > { %1821 = vmatpush3.bf16.msra.mxu0 %v1980_v58  ;;  %1742 = vmatprep.subr.bf16.mxu1 %v1981_v60  ;;  %v2023_v58 = vld [vmem:[#allocation2 + $0x1f0] sm:$0xff]  }
  0x52   : > { %1822 = vmatprep.subr.bf16.mxu0 %v1982_v1  ;;  %v2230_v38 = vsel %vm239_vm0, %v1115_v30, %v1119_v35 }
  0x54   : > { %1743 = vmatpush3.bf16.msra.mxu1 %v1981_v60  ;;  %v2025_v60 = vld [vmem:[#allocation2 + $0x1f8] sm:$0xff]  }
  0x55   : > { %1823 = vmatpush3.bf16.msra.mxu0 %v1982_v1  ;;  %1744 = vmatprep.subr.bf16.mxu1 %v1983_v4  ;;  %v2031_v1 = vld [vmem:[#allocation2 + $0x220] sm:$0xff]  }
  0x56   : > { %1824 = vmatprep.subr.bf16.mxu0 %v1984_v5 }
  0x58   : > { %1745 = vmatpush3.bf16.msra.mxu1 %v1983_v4  ;;  %v2034_v4 = vld [vmem:[#allocation2 + $0x238] sm:$0xff]  }
  0x59   : > { %1825 = vmatpush3.bf16.msra.mxu0 %v1984_v5  ;;  %1746 = vmatprep.subr.bf16.mxu1 %v1985_v6 }
  0x5a   : > { %1826 = vmatprep.subr.bf16.mxu0 %v1986_v7 }
  0x5c   : > { %1747 = vmatpush3.bf16.msra.mxu1 %v1985_v6 }
  0x5d   : > { %1827 = vmatpush3.bf16.msra.mxu0 %v1986_v7  ;;  %1748 = vmatprep.subr.bf16.mxu1 %v1987_v8 }
  0x5e   : > { %1828 = vmatprep.subr.bf16.mxu0 %v1988_v9 }
  0x60   : > { %1749 = vmatpush3.bf16.msra.mxu1 %v1987_v8 }
  0x61   : > { %1829 = vmatpush3.bf16.msra.mxu0 %v1988_v9  ;;  %1750 = vmatprep.subr.bf16.mxu1 %v1989_v10 }
  0x62   : > { %1830 = vmatprep.subr.bf16.mxu0 %v1990_v11 }
  0x64   : > { %1751 = vmatpush3.bf16.msra.mxu1 %v1989_v10  ;;  %v1617_v10 = vld [vmem:[%s2270_s2] ss:$0 sm:$0xff] }
  0x65   : > { %1831 = vmatpush3.bf16.msra.mxu0 %v1990_v11  ;;  %1752 = vmatprep.subr.bf16.mxu1 %v1991_v12  ;;  %v2079_v11 = vmov 1983009808  }
  0x66   : > { %1832 = vmatprep.subr.bf16.mxu0 %v1992_v13 }
  0x68   : > { %1753 = vmatpush3.bf16.msra.mxu1 %v1991_v12  ;;  %v1372_v12 = vunpack.c.l.s4 %v2079_v11 }
  0x69   : > { %1833 = vmatpush3.bf16.msra.mxu0 %v1992_v13  ;;  %1758 = vmatprep.subr.bf16.mxu1 %v1993_v14  ;;  %v1374_v13 = vlaneseq }
  0x6a   : > { %1838 = vmatprep.subr.bf16.mxu0 %v1994_v19 }
  0x6b   : > { %1755 = vmatmul.mubr.bf16.vlgmr.msra.gmra.mrb[0].mxu1 %v2163_v18  ;;  %v1375_v16 = vshrl.u32 %v1374_v13, 7 }
  0x6c   : > { %1759 = vmatpush3.bf16.msra.mxu1 %v1993_v14  ;;  %1835 = vmatmul.mubr.bf16.vlgmr.msra.gmra.mrb[0].mxu0 %v866_v21 }
  0x6d   : > { %1839 = vmatpush3.bf16.msra.mxu0 %v1994_v19  ;;  %1760 = vmatprep.subr.bf16.mxu1 %v1995_v23 }
  0x6e   : > { %1840 = vmatprep.subr.bf16.mxu0 %v1996_v24  ;;  %1774 = vmatprep.mubr.bf16.mxu1 %v477_v25 }
  0x6f   : > { %1854 = vmatprep.mubr.bf16.mxu0 %v2163_v18  ;;  %v2001_v18 = vld [vmem:[#allocation2 + $0xa0] sm:$0xff]  }
  0x70   : > { %1761 = vmatpush3.bf16.msra.mxu1 %v1995_v23 }
  0x71   : > { %1841 = vmatpush3.bf16.msra.mxu0 %v1996_v24  ;;  %1762 = vmatprep.subr.bf16.mxu1 %v1997_v26 }
  0x72   : > { %1842 = vmatprep.subr.bf16.mxu0 %v1998_v28 }
  0x74   : > { %1763 = vmatpush3.bf16.msra.mxu1 %v1997_v26  ;;  %v1373_v26 = vunpack.c.0.s8 %v1372_v12 }
  0x75   : > { %1843 = vmatpush3.bf16.msra.mxu0 %v1998_v28  ;;  %1764 = vmatprep.subr.bf16.mxu1 %v1999_v32 }
  0x76   : > { %1844 = vmatprep.subr.bf16.mxu0 %v2000_v34 }
  0x78   : > { %1765 = vmatpush3.bf16.msra.mxu1 %v1999_v32 }
  0x79   : > { %1845 = vmatpush3.bf16.msra.mxu0 %v2000_v34  ;;  %1766 = vmatprep.subr.bf16.mxu1 %v2001_v18  ;;  %v1376_v34 = vsub.s32 %v1373_v26, %v1375_v16 }
  0x7a   : > { %1846 = vmatprep.subr.bf16.mxu0 %v2002_v39 }
  0x7c   : > { %1767 = vmatpush3.bf16.msra.mxu1 %v2001_v18 }
  0x7d   : > { %1847 = vmatpush3.bf16.msra.mxu0 %v2002_v39  ;;  %1768 = vmatprep.subr.bf16.mxu1 %v2003_v40 }
  0x7e   : > { %1848 = vmatprep.subr.bf16.mxu0 %v2004_v41 }
  0x80   : > { %1769 = vmatpush3.bf16.msra.mxu1 %v2003_v40 }
  0x81   : > { %1849 = vmatpush3.bf16.msra.mxu0 %v2004_v41  ;;  %1770 = vmatprep.subr.bf16.mxu1 %v2005_v42 }
  0x82   : > { %1850 = vmatprep.subr.bf16.mxu0 %v2006_v43 }
  0x84   : > { %1771 = vmatpush3.bf16.msra.mxu1 %v2005_v42 }
  0x85   : > { %1851 = vmatpush3.bf16.msra.mxu0 %v2006_v43  ;;  %1772 = vmatprep.subr.bf16.mxu1 %v2007_v44 }
  0x86   : > { %1852 = vmatprep.subr.bf16.mxu0 %v2008_v45 }
  0x88   : > { %1773 = vmatpush3.bf16.msra.mxu1 %v2007_v44 }
  0x89   : > { %1853 = vmatpush3.bf16.msra.mxu0 %v2008_v45  ;;  %1778 = vmatprep.subr.bf16.mxu1 %v2009_v47 }
  0x8a   : > { %1858 = vmatprep.subr.bf16.mxu0 %v2010_v48 }
  0x8b   : > { %1775 = vmatmul.mubr.bf16.vlgmr.msra.gmra.mrb[0].mxu1 %v479_v49 }
  0x8c   : > { %1779 = vmatpush3.bf16.msra.mxu1 %v2009_v47  ;;  %1855 = vmatmul.mubr.bf16.vlgmr.msra.gmra.mrb[0].mxu0 %v2180_v37  ;;  %v2019_v37 = vld [vmem:[#allocation2 + $0x1e0] sm:$0xff]  }
  0x8d   : > { %1859 = vmatpush3.bf16.msra.mxu0 %v2010_v48  ;;  %1780 = vmatprep.subr.bf16.mxu1 %v2012_v50 }
  0x8e   : > { %1860 = vmatprep.subr.bf16.mxu0 %v2013_v51  ;;  %1794 = vmatprep.mubr.bf16.mxu1 %v2161_v17  ;;  %v2021_v17 = vld [vmem:[#allocation2 + $0x1e8] sm:$0xff]  }
  0x8f   : > { %1874 = vmatprep.mubr.bf16.mxu0 %v2204_v2  ;;  %v2032_v2 = vld [vmem:[#allocation2 + $0x228] sm:$0xff]  }
  0x90   : > { %1781 = vmatpush3.bf16.msra.mxu1 %v2012_v50 }
  0x91   : > { %1861 = vmatpush3.bf16.msra.mxu0 %v2013_v51  ;;  %1782 = vmatprep.subr.bf16.mxu1 %v2014_v27 }
  0x92   : > { %1862 = vmatprep.subr.bf16.mxu0 %v2015_v52 }
  0x94   : > { %1783 = vmatpush3.bf16.msra.mxu1 %v2014_v27 }
  0x95   : > { %1863 = vmatpush3.bf16.msra.mxu0 %v2015_v52  ;;  %1784 = vmatprep.subr.bf16.mxu1 %v2016_v53 }
  0x96   : > { %1864 = vmatprep.subr.bf16.mxu0 %v2017_v54 }
  0x98   : > { %1785 = vmatpush3.bf16.msra.mxu1 %v2016_v53 }
  0x99   : > { %1865 = vmatpush3.bf16.msra.mxu0 %v2017_v54  ;;  %1786 = vmatprep.subr.bf16.mxu1 %v2018_v55 }
  0x9a   : > { %1866 = vmatprep.subr.bf16.mxu0 %v2019_v37 }
  0x9c   : > { %1787 = vmatpush3.bf16.msra.mxu1 %v2018_v55 }
  0x9d   : > { %1867 = vmatpush3.bf16.msra.mxu0 %v2019_v37  ;;  %1788 = vmatprep.subr.bf16.mxu1 %v2020_v56 }
  0x9e   : > { %1868 = vmatprep.subr.bf16.mxu0 %v2021_v17 }
  0xa0   : > { %1789 = vmatpush3.bf16.msra.mxu1 %v2020_v56 }
  0xa1   : > { %1869 = vmatpush3.bf16.msra.mxu0 %v2021_v17  ;;  %1790 = vmatprep.subr.bf16.mxu1 %v2022_v57 }
  0xa2   : > { %1870 = vmatprep.subr.bf16.mxu0 %v2023_v58 }
  0xa4   : > { %1791 = vmatpush3.bf16.msra.mxu1 %v2022_v57 }
  0xa5   : > { %1871 = vmatpush3.bf16.msra.mxu0 %v2023_v58  ;;  %1792 = vmatprep.subr.bf16.mxu1 %v2024_v59 }
  0xa6   : > { %1872 = vmatprep.subr.bf16.mxu0 %v2025_v60 }
  0xa8   : > { %1793 = vmatpush3.bf16.msra.mxu1 %v2024_v59 }
  0xa9   : > { %1873 = vmatpush3.bf16.msra.mxu0 %v2025_v60 }
  0xaa   : > { %1878 = vmatprep.subr.bf16.mxu0 %v2026_v61 }
  0xab   : > { %1795 = vmatmul.mubr.bf16.vlgmr.msra.gmra.mrb[0].mxu1 %v2168_v22  ;;  %v2033_v22 = vld [vmem:[#allocation2 + $0x230] sm:$0xff]  }
  0xac   : > { %1875 = vmatmul.mubr.bf16.vlgmr.msra.gmra.mrb[0].mxu0 %v2230_v38 }
  0xad   : > { %1879 = vmatpush3.bf16.msra.mxu0 %v2026_v61  ;;  %1894 = vmatprep.mubr.bf16.mxu0 %v2210_v3  ;;  %v2078_v3 = vmov 0  }
  0xae   : > { %1880 = vmatprep.subr.bf16.mxu0 %v2028_v62  ;;  %1424 = vst [vmem:[%s2246_s10] sm:$0xf] %v2078_v3  ;;  %1426 = vst [vmem:[%s2246_s10 + $0x8] sm:$0xf] %v2078_v3 }
  0xaf   : > { %1427 = vst [vmem:[%s2246_s10 + $0xc] sm:$0xf] %v2078_v3  ;;  %1428 = vst [vmem:[%s2246_s10 + $0x10] sm:$0xf] %v2078_v3 }
  0xb0   : > { %1425 = vst [vmem:[%s2246_s10 + $0x4] sm:$0xf] %v2078_v3 }
  0xb1   : > { %1881 = vmatpush3.bf16.msra.mxu0 %v2028_v62 }
  0xb2   : > { %1882 = vmatprep.subr.bf16.mxu0 %v2029_v63 }
  0xb5   : > { %1883 = vmatpush3.bf16.msra.mxu0 %v2029_v63 }
  0xb6   : > { %1884 = vmatprep.subr.bf16.mxu0 %v2030_v0 }
  0xb9   : > { %1885 = vmatpush3.bf16.msra.mxu0 %v2030_v0 }
  0xba   : > { %1886 = vmatprep.subr.bf16.mxu0 %v2031_v1 }
  0xbd   : > { %1887 = vmatpush3.bf16.msra.mxu0 %v2031_v1 }
  0xbe   : > { %1888 = vmatprep.subr.bf16.mxu0 %v2032_v2 }
  0xc1   : > { %1889 = vmatpush3.bf16.msra.mxu0 %v2032_v2 }
  0xc2   : > { %1890 = vmatprep.subr.bf16.mxu0 %v2033_v22 }
  0xc5   : > { %1891 = vmatpush3.bf16.msra.mxu0 %v2033_v22 }
  0xc6   : > { %1892 = vmatprep.subr.bf16.mxu0 %v2034_v4 }
  0xc9   : > { %1893 = vmatpush3.bf16.msra.mxu0 %v2034_v4 }
  0xcc   : > { %1895 = vmatmul.mubr.bf16.vlgmr.msra.gmra.mrb[0].mxu0 %v2227_v36 }
 0x17e   : > { %v1796_v5 = vpop.f32.mrb[0].mxu1 }
 0x17f   : > { %v685_v6 = vpop.f32.mrb[1].mxu1 }
 0x180   : > { %v1797_v7 = vpop.f32.mrb[2].mxu1 }
 0x181   : > { %v688_v8 = vpop.f32.mrb[3].mxu1 }
 0x19f   : > { %v1896_v9 = vpop.f32.mrb[0].mxu0 }
 0x1a0   : > { %v1898_v14 = vadd.f32 %v1896_v9, %v1796_v5  ;;  %v1328_v15 = vpop.f32.mrb[1].mxu0 }
 0x1a1   : > { %v1899_v19 = vadd.f32 %v1328_v15, %v685_v6  ;;  %v1897_v20 = vpop.f32.mrb[2].mxu0  ;;  %v1458_v15 = vld [vmem:[%s2246_s10 + $0x8] sm:$0x3] }
 0x1a2   : > { %v1356_v21 = vadd.f32 %v1898_v14, %v1617_v10  ;;  %v1900_v23 = vadd.f32 %v1897_v20, %v1797_v7  ;;  %v1331_v24 = vpop.f32.mrb[3].mxu0 }
 0x1a3   : > { %v1354_v25 = vadd.f32 %v1899_v19, %v1617_v10  ;;  %v1901_v28 = vadd.f32 %v1331_v24, %v688_v8 }
 0x1a4   : > { %v1360_v29 = vmax.f32 %v1356_v21, 0.0  ;;  %v1357_v30 = vadd.f32 %v1900_v23, %v1617_v10  ;;  %v1444_v21 = vld [vmem:[%s2246_s10 + $0x4] sm:$0x3] }
 0x1a5   : > { %v1358_v31 = vmax.f32 %v1354_v25, 0.0  ;;  %v1355_v32 = vadd.f32 %v1901_v28, %v1617_v10 }
 0x1a6   : > { %v1361_v33 = vmax.f32 %v1357_v30, 0.0  ;;  %v1366_v36 = vsel %vm1362_vm2, %v1360_v29, -inf }
 0x1a7   : > { %v1359_v35 = vmax.f32 %v1355_v32, 0.0  ;;  %v1363_v18 = vsel %vm1362_vm2, %v1358_v31, -inf }
 0x1a8   : > { %v1367_v38 = vsel %vm1362_vm2, %v1361_v33, -inf }
 0x1a9   : > { %v1368_v39 = vmax.f32 %v1366_v36, %v1367_v38  ;;  %v1364_v40 = vsel %vm1362_vm2, %v1359_v35, -inf }
 0x1aa   : > { %v1365_v41 = vmax.f32 %v1363_v18, %v1364_v40 }
 0x1ab   : > { %v1385_v42 = vrot.slane %v1368_v39, %v1376_v34 }
 0x1ac   : > { %v1377_v43 = vrot.slane %v1365_v41, %v1376_v34 }
 0x1ad   : > { %v1386_v44 = vcombine.high %v1385_v42, %v1385_v42  ;;  %v1406_v45 = vsel %vm1391_vm3, %v1385_v42, -inf }
 0x1ae   : > { %v1407_v46 = vrot.slane %v1406_v45, 4  ;;  %v1378_v47 = vcombine.high %v1377_v43, %v1377_v43  ;;  %v1392_v48 = vsel %vm1391_vm3, %v1377_v43, -inf }
 0x1af   : > { %v1413_v49 = vsel %vm1391_vm3, %v1386_v44, -inf  ;;  %v1393_v50 = vrot.slane %v1392_v48, 4 }
 0x1b0   : > { %v1408_v51 = vmax.f32 %v1406_v45, %v1407_v46  ;;  %v1414_v27 = vrot.slane %v1413_v49, 4  ;;  %v1399_v52 = vsel %vm1391_vm3, %v1378_v47, -inf }
 0x1b1   : > { %v1394_v53 = vmax.f32 %v1392_v48, %v1393_v50  ;;  %v1400_v54 = vrot.slane %v1399_v52, 4 }
 0x1b2   : > { %v1409_v55 = vrot.slane %v1408_v51, 2  ;;  %v1415_v37 = vmax.f32 %v1413_v49, %v1414_v27 }
 0x1b3   : > { %v1395_v56 = vrot.slane %v1394_v53, 2  ;;  %v1401_v17 = vmax.f32 %v1399_v52, %v1400_v54 }
 0x1b4   : > { %v1410_v57 = vmax.f32 %v1408_v51, %v1409_v55  ;;  %v1416_v58 = vrot.slane %v1415_v37, 2 }
 0x1b5   : > { %v1396_v59 = vmax.f32 %v1394_v53, %v1395_v56  ;;  %v1402_v60 = vrot.slane %v1401_v17, 2 }
 0x1b6   : > { %v1411_v61 = vrot.slane %v1410_v57, 1  ;;  %v1417_v62 = vmax.f32 %v1415_v37, %v1416_v58 }
 0x1b7   : > { %v1397_v63 = vrot.slane %v1396_v59, 1  ;;  %v1403_v0 = vmax.f32 %v1401_v17, %v1402_v60 }
 0x1b8   : > { %v1412_v1 = vmax.f32 %v1410_v57, %v1411_v61  ;;  %v1418_v2 = vrot.slane %v1417_v62, 1 }
 0x1b9   : > { %v1398_v22 = vmax.f32 %v1396_v59, %v1397_v63  ;;  %v1404_v4 = vrot.slane %v1403_v0, 1 }
 0x1ba   : > { %v1419_v3 = vmax.f32 %v1417_v62, %v1418_v2  ;;  %v1626_v5 = vpack.c.bf16 %v1412_v1, %v1412_v1 }
 0x1bb   : > { %v1405_v6 = vmax.f32 %v1403_v0, %v1404_v4  ;;  %v1624_v7 = vpack.c.bf16 %v1398_v22, %v1398_v22 }
 0x1bc   : > { %v1627_v8 = vpack.c.bf16 %v1419_v3, %v1419_v3  ;;  %v1453_v10 = vunpack.c.l.b16 %v1626_v5 }
 0x1bd   : > { %v1625_v9 = vpack.c.bf16 %v1405_v6, %v1405_v6  ;;  %v1435_v12 = vunpack.c.l.b16 %v1624_v7 }
 0x1be   : > { %v1454_v11 = vunpack.c.l.b16 %v1627_v8 }
 0x1bf   : > { %v1436_v13 = vunpack.c.l.b16 %v1625_v9 }
 0x1c0   : > { %v1455_v14 = vsel %vm1437_vm4, %v1454_v11, %v1453_v10 }
 0x1c1   : > { %v1456_v19 = vpack.c.b16 %v1455_v14, %v1455_v14  ;;  %v1438_v20 = vsel %vm1437_vm4, %v1436_v13, %v1435_v12 }
 0x1c2   : > { %v1439_v23 = vpack.c.b16 %v1438_v20, %v1438_v20 }
 0x1c3   : > { %v1459_v24 = vsel %vm1443_vm6, %v1456_v19, %v1458_v15 }
 0x1c4   : > { %1460 = vst [vmem:[%s2246_s10 + $0x8] sm:$0x3] %v1459_v24  ;;  %v1445_v25 = vsel %vm1443_vm6, %v1439_v23, %v1444_v21 }
 0x1c5   : > { %1446 = vst [vmem:[%s2246_s10 + $0x4] sm:$0x3] %v1445_v25 }
 0x1c6 PF: > { %s14_s12 = sadd.s32 1, %s2073_s12  }
 0x1c7   : > { %p11_p3 = scmp.ge.s32.totalorder %s14_s12, 4  }
 0x1c9   :  { %13 = sbr.rel (!%p11_p3) target bundleno = 1 (0x1), region = 67 }
 0x1d0   :  { %1482 = vsyncpa [#allocation3], 1 }
 0x1d1   :  { %1484 = vsyncpa [#allocation3 + $0x1], 1 }

// kernel: vgg_forward.4
= control target key start
LH: loop header
LB: loop body
LE: loop exit
PB: predicated region body
PF: predicated region fallthrough
CT: control target
= control target key end

     0   :  { %8 = vsyncpa [#allocation3], 0  ;;  %s3023_s12 = smov 0   ;;  %s3392_s0 = inlined_call_operand.vmem [shape: bf16[2,176,128], index: 0, kind: input, shape index: {}]   ;;  %s3393_s1 = inlined_call_operand.hbm [shape: bf16[1152,128], index: 1, kind: input, shape index: {}]   ;;  %s3394_s2 = inlined_call_operand.vmem [shape: f32[1,128], index: 2, kind: input, shape index: {}]   ;;  %s3395_s3 = inlined_call_operand.vmem [shape: bf16[2,56,128], index: 3, kind: output, shape index: {}]  }
   0x1 LB: > { %s3029_s13 = sadd.s32 4294967295, %s2996_s12   ;;  %p2273_p0 = scmp.ge.s32.totalorder %s2996_s12, 1  ;;  %s2996_s12 = sphi %s3023_s12, %s14_s12  }
   0x2   : > { %p113_p1 = scmp.lt.s32.totalorder %s2996_s12, 3  ;;  %s2998_s14 = smov [#allocation2]  }
   0x3   : > { %s125_s15 = sshll.u32 %s2998_s14, 4  ;;  %p3396_p3 = scmp.eq.s32.totalorder %s3029_s13, 0  ;;  %s126_s15 = int_to_ptr.vmem [resolvable:$true] %s125_s15 }
   0x4   : > { %p3033_p2 = pnand %p2273_p0, %p113_p1  ;;  %s2958_s20 = scalar_lea.hbm %s3393_s1, 9216 }
   0x5   : > { %p2959_p6 = scmp.ne.s32.totalorder %s3393_s1, %s2958_s20  ;;  %p2965_p10 = scmp.lt.u32.totalorder %s2958_s20, %s3393_s1 }
   0x6   : > { %s3398_s16 = scalar_select %p3033_p2, 1, 0 }
   0x7   : > { %p2854_p4 = pneg %p3033_p2 }
   0x9   : > { %p3042_p5 = pnand %p3396_p3, %p2854_p4 }
   0xb   : > { %p2960_p7 = pneg %p3042_p5 }
   0xd   : > { %p2961_p8 = pnand %p2960_p7, %p2959_p6 }
   0xf   : > { %p2962_p9 = pneg %p2961_p8 }
  0x11   : > { %p2967_p11 = pnand %p2965_p10, %p2962_p9 }
  0x13   : > { %2970 = shalt.err (!%p2967_p11)
}
  0x14   : > { %s2971_s25 = scalar_lea.vmem %s126_s15, 9216  ;;  %p2979_p1 = scmp.lt.s32.totalorder %s126_s15, %s126_s15 }
  0x15   : > { %p2972_p12 = scmp.ne.s32.totalorder %s126_s15, %s2971_s25  ;;  %p2980_p4 = scmp.lt.s32.totalorder %s2971_s25, %s2971_s25 }
  0x17   : > { %p2974_p13 = pnand %p2972_p12, %p2960_p7  ;;  %p2981_p3 = por %p2980_p4, %p2979_p1 }
  0x19   : > { %p2975_p0 = pneg %p2974_p13 }
  0x1b   : > { %p2982_p2 = pnand %p2981_p3, %p2975_p0 }
  0x1d   : > { %2985 = shalt.err (!%p2982_p2)
}
  0x1e   : > { %s2999_s26 = smov 64   ;;  %s3000_s27 = smov 4  }
  0x1f   : > { %2857 = dma.hbm_to_vmem [thread:$0]  (!%p3042_p5), %s3393_s1, 9216, %s126_s15, [#allocation3], %s2999_s26, %s2999_s26, %s3000_s27  }
  0x20   : > { %p3400_p6 = scmp.ne.s32.totalorder %s3398_s16, 0 }
  0x21   : > { %p3401_p8 = scmp.eq.s32.totalorder (!%p3400_p6), %s3029_s13, 0 }
  0x22   : > { %152 = sbr.rel (%p3400_p6) target bundleno = 482 (0x1e2), region = 32 }
  0x29   : > { %2991 = dma.done.wait (%p3401_p8), [#allocation3], 9216   ;;  %p3402_p7 = pmov %p3401_p8 }
  0x2a   : > { %v2873_v0 = vld [vmem:[#allocation2 + $0x40] sm:$0xff]   ;;  %v2875_v2 = vld [vmem:[#allocation2 + $0x48] sm:$0xff]   ;;  %p176_p2 = scmp.lt.s32.totalorder %s3029_s13, 1  ;;  %v2877_v4 = vld [vmem:[#allocation2 + $0x50] sm:$0xff]   ;;  %vm283_vm0 = vsmask.f32 7424 }
  0x2b   : > { %2993 = vsyncadd (%p3402_p7), [#allocation3], 4294958080  ;;  %v2874_v1 = vld [vmem:[#allocation2] sm:$0xff]   ;;  %2544 = vmatprep.subr.bf16.mxu0 %v2873_v0  ;;  %v2876_v3 = vld [vmem:[#allocation2 + $0x8] sm:$0xff]   ;;  %vm658_vm1 = vcmask 1046528   ;;  %vm1966_vm2 = vcmask 1041408  }
  0x2c   : > { %2576 = vmatprep.subr.bf16.mxu1 %v2874_v1  ;;  %2545 = vmatpush3.bf16.msra.mxu0 %v2873_v0  ;;  %v2878_v5 = vld [vmem:[#allocation2 + $0x10] sm:$0xff]   ;;  %s3406_s13 = smov (!%p176_p2, %s3029_s13), 1  ;;  %v2879_v6 = vld [vmem:[#allocation2 + $0x58] sm:$0xff]   ;;  %v2881_v8 = vld [vmem:[#allocation2 + $0x60] sm:$0xff]   ;;  %vm2118_vm3 = vcmask 1042434   ;;  %vm2120_vm4 = vcmask 1043459  }
  0x2d   : > { %2577 = vmatpush3.bf16.msra.mxu1 %v2874_v1  ;;  %2546 = vmatprep.subr.bf16.mxu0 %v2875_v2  ;;  %v2880_v7 = vld [vmem:[#allocation2 + $0x18] sm:$0xff]   ;;  %s2848_s30 = smul.u32 88, %s3406_s13  ;;  %v2882_v9 = vld [vmem:[#allocation2 + $0x20] sm:$0xff]   ;;  %v2883_v10 = vld [vmem:[#allocation2 + $0x68] sm:$0xff]   ;;  %vm2122_vm5 = vcmask 1044484   ;;  %vm2126_vm6 = vcmask 1042432  }
  0x2e   : > { %2578 = vmatprep.subr.bf16.mxu1 %v2876_v3  ;;  %v2884_v11 = vld [vmem:[#allocation2 + $0x28] sm:$0xff]   ;;  %v2885_v18 = vld [vmem:[#allocation2 + $0x70] sm:$0xff]   ;;  %v2887_v22 = vld [vmem:[#allocation2 + $0x78] sm:$0xff]   ;;  %s2849_s7 = smul.u32 28, %s3406_s13  ;;  %vm2127_vm7 = vsmask.f32 2306 }
  0x2f   : > { %s3076_s6 = scalar_lea.vmem %s3392_s0, %s2848_s30  ;;  %v2886_v19 = vld [vmem:[#allocation2 + $0x30] sm:$0xff]   ;;  %v2888_v27 = vld [vmem:[#allocation2 + $0x38] sm:$0xff]   ;;  %v2892_v34 = vld [vmem:[#allocation2 + $0x80] sm:$0xff]  }
  0x30   : > { %2547 = vmatpush3.bf16.msra.mxu0 %v2875_v2  ;;  %v3079_v12 = vld [vmem:[%s3076_s6] sm:$0xff]   ;;  %v3082_v13 = vld [vmem:[%s3076_s6 + $0x8] sm:$0xff]   ;;  %v3085_v14 = vld [vmem:[%s3076_s6 + $0x10] sm:$0xff]   ;;  %s3292_s10 = scalar_lea.vmem %s3395_s3, %s2849_s7 }
  0x31   : > { %2579 = vmatpush3.bf16.msra.mxu1 %v2876_v3  ;;  %2548 = vmatprep.subr.bf16.mxu0 %v2877_v4  ;;  %v285_v15 = vshrl.u32 %v3079_v12, 16  ;;  %v287_v16 = vshll.u32 %v3079_v12, 16  ;;  %v292_v17 = vshll.u32 %v3082_v13, 16  ;;  %v296_v23 = vshrl.u32 %v3082_v13, 16  ;;  %v3094_v26 = vld [vmem:[%s3076_s6 + $0x18] sm:$0xff]   ;;  %v3100_v33 = vld [vmem:[%s3076_s6 + $0x20] sm:$0xff]   ;;  %vm3348_vm8 = vmand %vm2126_vm6, %vm2127_vm7 }
  0x32   : > { %2580 = vmatprep.subr.bf16.mxu1 %v2878_v5  ;;  %2592 = vmatprep.mubr.bf16.mxu1 %v3079_v12  ;;  %v300_v24 = vshll.u32 %v3085_v14, 16  ;;  %v304_v29 = vshrl.u32 %v3085_v14, 16  ;;  %v308_v30 = vshll.u32 %v3094_v26, 16  ;;  %v2893_v35 = vld [vmem:[#allocation2 + $0xc0] sm:$0xff]   ;;  %v2894_v36 = vld [vmem:[#allocation2 + $0x88] sm:$0xff]   ;;  %v312_v41 = vshrl.u32 %v3094_v26, 16 }
  0x33   : > { %v289_v20 = vrot.slane %v287_v16, 1  ;;  %v294_v21 = vrot.slane %v292_v17, 1  ;;  %v3103_v39 = vld [vmem:[%s3076_s6 + $0x28] sm:$0xff]   ;;  %v316_v42 = vshll.u32 %v3100_v33, 16  ;;  %v3111_v44 = vld [vmem:[%s3076_s6 + $0x30] sm:$0xff]   ;;  %v320_v46 = vshrl.u32 %v3100_v33, 16 }
  0x34   : > { %2549 = vmatpush3.bf16.msra.mxu0 %v2877_v4  ;;  %v302_v32 = vrot.slane %v300_v24, 1  ;;  %v310_v38 = vrot.slane %v308_v30, 1  ;;  %v2895_v43 = vld [vmem:[#allocation2 + $0xc8] sm:$0xff]   ;;  %v324_v47 = vshll.u32 %v3103_v39, 16  ;;  %v2898_v50 = vld [vmem:[#allocation2 + $0x90] sm:$0xff]   ;;  %v332_v52 = vshll.u32 %v3111_v44, 16 }
  0x35   : > { %2581 = vmatpush3.bf16.msra.mxu1 %v2878_v5  ;;  %2550 = vmatprep.subr.bf16.mxu0 %v2879_v6  ;;  %v290_v25 = vor.u32 %v289_v20, %v285_v15  ;;  %v298_v31 = vor.u32 %v296_v23, %v294_v21  ;;  %v318_v49 = vrot.slane %v316_v42, 1  ;;  %v2899_v51 = vld [vmem:[#allocation2 + $0xd0] sm:$0xff]   ;;  %v328_v55 = vshrl.u32 %v3103_v39, 16  ;;  %v3125_v56 = vld [vmem:[%s3076_s6 + $0x38] sm:$0xff]   ;;  %v203_v59 = vld [vmem:[%s3076_s6 + $0x40] sm:$0xf] }
  0x36   : > { %2582 = vmatprep.subr.bf16.mxu1 %v2880_v7  ;;  %v306_v37 = vor.u32 %v304_v29, %v302_v32  ;;  %v314_v48 = vor.u32 %v312_v41, %v310_v38  ;;  %v326_v54 = vrot.slane %v324_v47, 1  ;;  %v2900_v58 = vld [vmem:[#allocation2 + $0x98] sm:$0xff]   ;;  %v334_v61 = vrot.slane %v332_v52, 1  ;;  %v2904_v63 = vld [vmem:[#allocation2 + $0xa0] sm:$0xff]   ;;  %v2907_v16 = vld [vmem:[#allocation2 + $0xe8] sm:$0xff]  }
  0x37   : > { %v295_v28 = vsel %vm283_vm0, %v290_v25, %v294_v21  ;;  %v3106_v40 = vsel %vm283_vm0, %v298_v31, %v302_v32  ;;  %v322_v53 = vor.u32 %v320_v46, %v318_v49  ;;  %v2901_v60 = vld [vmem:[#allocation2 + $0xd8] sm:$0xff]   ;;  %v336_v0 = vshrl.u32 %v3111_v44, 16  ;;  %v2905_v4 = vld [vmem:[#allocation2 + $0xe0] sm:$0xff]   ;;  %v2911_v21 = vld [vmem:[#allocation2 + $0xb0] sm:$0xff]  }
  0x38   : > { %2551 = vmatpush3.bf16.msra.mxu0 %v2879_v6  ;;  %2560 = vmatprep.mubr.bf16.mxu0 %v295_v28  ;;  %v3115_v45 = vsel %vm283_vm0, %v306_v37, %v310_v38  ;;  %v3128_v57 = vsel %vm283_vm0, %v314_v48, %v318_v49  ;;  %v340_v1 = vshll.u32 %v3125_v56, 16  ;;  %v330_v2 = vor.u32 %v328_v55, %v326_v54  ;;  %v204_v5 = vld [vmem:[%s3076_s6 + $0x44] sm:$0xf]  ;;  %v2912_v23 = vld [vmem:[#allocation2 + $0xf0] sm:$0xff]   ;;  %v2913_v29 = vld [vmem:[#allocation2 + $0xb8] sm:$0xff]  }
  0x39   : > { %2583 = vmatpush3.bf16.msra.mxu1 %v2880_v7  ;;  %2552 = vmatprep.subr.bf16.mxu0 %v2881_v8  ;;  %v3133_v62 = vsel %vm283_vm0, %v322_v53, %v326_v54  ;;  %v3138_v3 = vcombine.low %v203_v59, %v203_v59  ;;  %v338_v6 = vor.u32 %v336_v0, %v334_v61  ;;  %v659_v24 = vrot.slane %v3079_v12, 1  ;;  %v2914_v30 = vld [vmem:[#allocation2 + $0xf8] sm:$0xff]   ;;  %v2915_v32 = vld [vmem:[#allocation2 + $0x100] sm:$0xff]   ;;  %v2917_v37 = vld [vmem:[#allocation2 + $0x108] sm:$0xff]  }
  0x3a   : > { %2584 = vmatprep.subr.bf16.mxu1 %v2882_v9  ;;  %v342_v7 = vrot.slane %v340_v1, 1  ;;  %v3148_v15 = vcombine.low %v203_v59, %v204_v5  ;;  %v660_v25 = vrot.slane %v3082_v13, 1  ;;  %v662_v12 = vrot.slane %v3085_v14, 1  ;;  %v2918_v38 = vld [vmem:[#allocation2 + $0x148] sm:$0xff]   ;;  %v2919_v42 = vld [vmem:[#allocation2 + $0x110] sm:$0xff]   ;;  %v2921_v53 = vld [vmem:[#allocation2 + $0x118] sm:$0xff]  }
  0x3b   : > { %v2920_v46 = vld [vmem:[#allocation2 + $0x150] sm:$0xff]   ;;  %v668_v47 = vrot.slane %v3103_v39, 1  ;;  %v205_v48 = vld [vmem:[%s3076_s6 + $0x48] sm:$0xf]  ;;  %v206_v49 = vld [vmem:[%s3076_s6 + $0x4c] sm:$0xf] }
  0x3c   : > { %2553 = vmatpush3.bf16.msra.mxu0 %v2881_v8  ;;  %v3144_v8 = vsel %vm283_vm0, %v330_v2, %v334_v61  ;;  %v3152_v17 = vsel %vm283_vm0, %v338_v6, %v342_v7  ;;  %v661_v31 = vsel %vm658_vm1, %v659_v24, %v660_v25  ;;  %v3189_v52 = vcombine.low %v205_v48, %v206_v49  ;;  %v2922_v54 = vld [vmem:[#allocation2 + $0x158] sm:$0xff]   ;;  %v2924_v1 = vld [vmem:[#allocation2 + $0x160] sm:$0xff]   ;;  %v2942_v49 = vld [vmem:[#allocation2 + $0x1e8] sm:$0xff]  }
  0x3d   : > { %2585 = vmatpush3.bf16.msra.mxu1 %v2882_v9  ;;  %2554 = vmatprep.subr.bf16.mxu0 %v2883_v10  ;;  %v344_v9 = vshrl.u32 %v3125_v56, 16  ;;  %v3200_v2 = vrot.slane %v3125_v56, 1  ;;  %v3207_v5 = vrot.slane %v3148_v15, 1  ;;  %v674_v24 = vrot.slane %v3138_v3, 1 }
  0x3e   : > { %2586 = vmatprep.subr.bf16.mxu1 %v2884_v11  ;;  %v1525_v0 = vshll.u32 %v3189_v52, 16 }
  0x40   : > { %2555 = vmatpush3.bf16.msra.mxu0 %v2883_v10  ;;  %v348_v10 = vshll.u32 %v3138_v3, 16  ;;  %v1527_v6 = vrot.slane %v1525_v0, 1  ;;  %v675_v3 = vsel %vm658_vm1, %v3200_v2, %v674_v24  ;;  %v2950_v0 = vld [vmem:[#allocation2 + $0x208] sm:$0xff]  }
  0x41   : > { %2587 = vmatpush3.bf16.msra.mxu1 %v2884_v11  ;;  %2556 = vmatprep.subr.bf16.mxu0 %v2885_v18  ;;  %v2906_v11 = vld [vmem:[#allocation2 + $0xa8] sm:$0xff]  }
  0x42   : > { %2588 = vmatprep.subr.bf16.mxu1 %v2886_v19  ;;  %v350_v20 = vrot.slane %v348_v10, 1 }
  0x44   : > { %2557 = vmatpush3.bf16.msra.mxu0 %v2885_v18  ;;  %v1014_v18 = vshll.u32 %v3148_v15, 16 }
  0x45   : > { %2589 = vmatpush3.bf16.msra.mxu1 %v2886_v19  ;;  %2558 = vmatprep.subr.bf16.mxu0 %v2887_v22  ;;  %v346_v19 = vor.u32 %v344_v9, %v342_v7  ;;  %v1529_v7 = vshrl.u32 %v3189_v52, 16  ;;  %v1700_v9 = vrot.slane %v3189_v52, 1 }
  0x46   : > { %2590 = vmatprep.subr.bf16.mxu1 %v2888_v27 }
  0x47   : > { %v351_v28 = vsel %vm283_vm0, %v346_v19, %v350_v20  ;;  %v2926_v20 = vld [vmem:[#allocation2 + $0x168] sm:$0xff]  }
  0x48   : > { %2559 = vmatpush3.bf16.msra.mxu0 %v2887_v22  ;;  %v1016_v22 = vrot.slane %v1014_v18, 1  ;;  %v2955_v18 = vld [vmem:[%s3076_s6 + $0x50] ss:$0 sps:$4 sm:$0xff]  }
  0x49   : > { %2591 = vmatpush3.bf16.msra.mxu1 %v2888_v27  ;;  %2608 = vmatprep.subr.bf16.mxu0 %v2892_v34 }
  0x4a   : > { %2640 = vmatprep.subr.bf16.mxu1 %v2893_v35  ;;  %v3161_v27 = vsel %vm283_vm0, %v346_v19, %v1016_v22  ;;  %v3221_v19 = vsel %vm658_vm1, %v3207_v5, %v1700_v9 }
  0x4b   : > { %2561 = vmatmul.mubr.bf16.vlgmr.msra.gmra.mrb[0].mxu0 %v3106_v40 }
  0x4c   : > { %2593 = vmatmul.mubr.bf16.vlgmr.msra.gmra.mrb[0].mxu1 %v3082_v13  ;;  %2609 = vmatpush3.bf16.msra.mxu0 %v2892_v34  ;;  %v2916_v34 = vld [vmem:[#allocation2 + $0x140] sm:$0xff]  }
  0x4d   : > { %2641 = vmatpush3.bf16.msra.mxu1 %v2893_v35  ;;  %2610 = vmatprep.subr.bf16.mxu0 %v2894_v36  ;;  %v664_v35 = vrot.slane %v3094_v26, 1 }
  0x4e   : > { %2642 = vmatprep.subr.bf16.mxu1 %v2895_v43  ;;  %2564 = vmatprep.mubr.bf16.mxu0 %v3115_v45 }
  0x4f   : > { %2596 = vmatprep.mubr.bf16.mxu1 %v3085_v14  ;;  %v3174_v41 = vsel %vm658_vm1, %v662_v12, %v664_v35 }
  0x50   : > { %2611 = vmatpush3.bf16.msra.mxu0 %v2894_v36  ;;  %v3170_v36 = vsel %vm658_vm1, %v660_v25, %v662_v12  ;;  %v1702_v25 = vrot.slane %v2955_v18, 1 }
  0x51   : > { %2643 = vmatpush3.bf16.msra.mxu1 %v2895_v43  ;;  %2612 = vmatprep.subr.bf16.mxu0 %v2898_v50  ;;  %v1018_v43 = vshrl.u32 %v3148_v15, 16 }
  0x52   : > { %2644 = vmatprep.subr.bf16.mxu1 %v2899_v51 }
  0x53   : > { %2565 = vmatmul.mubr.bf16.gmra.mrb[4].mxu0 %v3128_v57  ;;  %v1020_v55 = vor.u32 %v1018_v43, %v1016_v22  ;;  %v1531_v22 = vor.u32 %v1529_v7, %v1527_v6  ;;  %v2938_v43 = vld [vmem:[#allocation2 + $0x1d8] sm:$0xff]  }
  0x54   : > { %2597 = vmatmul.mubr.bf16.gmra.mrb[4].mxu1 %v3094_v26  ;;  %2613 = vmatpush3.bf16.msra.mxu0 %v2898_v50  ;;  %v3184_v50 = vcombine.low %v205_v48, %v205_v48  ;;  %v2941_v48 = vld [vmem:[#allocation2 + $0x1a8] sm:$0xff]  }
  0x55   : > { %2645 = vmatpush3.bf16.msra.mxu1 %v2899_v51  ;;  %2614 = vmatprep.subr.bf16.mxu0 %v2900_v58 }
  0x56   : > { %2646 = vmatprep.subr.bf16.mxu1 %v2901_v60  ;;  %2568 = vmatprep.mubr.bf16.mxu0 %v3133_v62 }
  0x57   : > { %2600 = vmatprep.mubr.bf16.mxu1 %v3100_v33 }
  0x58   : > { %2615 = vmatpush3.bf16.msra.mxu0 %v2900_v58  ;;  %v1022_v58 = vshll.u32 %v3184_v50, 16 }
  0x59   : > { %2647 = vmatpush3.bf16.msra.mxu1 %v2901_v60  ;;  %2616 = vmatprep.subr.bf16.mxu0 %v2904_v63  ;;  %v670_v60 = vrot.slane %v3111_v44, 1 }
  0x5a   : > { %2648 = vmatprep.subr.bf16.mxu1 %v2905_v4  ;;  %v1024_v61 = vrot.slane %v1022_v58, 1  ;;  %v2946_v58 = vld [vmem:[#allocation2 + $0x1f0] sm:$0xff]  }
  0x5b   : > { %2569 = vmatmul.mubr.bf16.gmra.mrb[8].mxu0 %v3144_v8  ;;  %v3213_v10 = vsel %vm658_vm1, %v668_v47, %v670_v60 }
  0x5c   : > { %2601 = vmatmul.mubr.bf16.gmra.mrb[8].mxu1 %v3103_v39  ;;  %2617 = vmatpush3.bf16.msra.mxu0 %v2904_v63  ;;  %v2923_v63 = vld [vmem:[#allocation2 + $0x120] sm:$0xff]  }
  0x5d   : > { %2649 = vmatpush3.bf16.msra.mxu1 %v2905_v4  ;;  %2618 = vmatprep.subr.bf16.mxu0 %v2906_v11  ;;  %v3203_v4 = vsel %vm283_vm0, %v1020_v55, %v1024_v61  ;;  %v2947_v61 = vld [vmem:[#allocation2 + $0x1b8] sm:$0xff]  }
  0x5e   : > { %2650 = vmatprep.subr.bf16.mxu1 %v2907_v16  ;;  %2572 = vmatprep.mubr.bf16.mxu0 %v3152_v17 }
  0x5f   : > { %2604 = vmatprep.mubr.bf16.mxu1 %v3111_v44 }
  0x60   : > { %2619 = vmatpush3.bf16.msra.mxu0 %v2906_v11  ;;  %v3216_v11 = vsel %vm283_vm0, %v1020_v55, %v1527_v6  ;;  %v2945_v55 = vld [vmem:[#allocation2 + $0x1b0] sm:$0xff]  }
  0x61   : > { %2651 = vmatpush3.bf16.msra.mxu1 %v2907_v16  ;;  %2620 = vmatprep.subr.bf16.mxu0 %v2911_v21  ;;  %v2925_v16 = vld [vmem:[#allocation2 + $0x128] sm:$0xff]  }
  0x62   : > { %2652 = vmatprep.subr.bf16.mxu1 %v2912_v23 }
  0x63   : > { %2573 = vmatmul.mubr.bf16.gmra.mrb[12].mxu0 %v351_v28  ;;  %v2927_v28 = vld [vmem:[#allocation2 + $0x130] sm:$0xff]  }
  0x64   : > { %2605 = vmatmul.mubr.bf16.gmra.mrb[12].mxu1 %v3125_v56  ;;  %2621 = vmatpush3.bf16.msra.mxu0 %v2911_v21  ;;  %v3226_v21 = vsel %vm658_vm1, %v670_v60, %v3200_v2 }
  0x65   : > { %2653 = vmatpush3.bf16.msra.mxu1 %v2912_v23  ;;  %2622 = vmatprep.subr.bf16.mxu0 %v2913_v29  ;;  %v1533_v23 = vshll.u32 %v2955_v18, 16 }
  0x66   : > { %2654 = vmatprep.subr.bf16.mxu1 %v2914_v30  ;;  %2624 = vmatprep.mubr.bf16.mxu0 %v661_v31  ;;  %v3232_v31 = vsel %vm658_vm1, %v1700_v9, %v1702_v25 }
  0x67   : > { %2656 = vmatprep.mubr.bf16.mxu1 %v3082_v13  ;;  %v666_v13 = vrot.slane %v3100_v33, 1 }
  0x68   : > { %2623 = vmatpush3.bf16.msra.mxu0 %v2913_v29  ;;  %v1535_v29 = vrot.slane %v1533_v23, 1 }
  0x69   : > { %2655 = vmatpush3.bf16.msra.mxu1 %v2914_v30  ;;  %2672 = vmatprep.subr.bf16.mxu0 %v2915_v32  ;;  %v3187_v51 = vsel %vm658_vm1, %v664_v35, %v666_v13  ;;  %v3194_v59 = vsel %vm658_vm1, %v666_v13, %v668_v47  ;;  %v2928_v30 = vld [vmem:[#allocation2 + $0x170] sm:$0xff]   ;;  %v2931_v35 = vld [vmem:[#allocation2 + $0x180] sm:$0xff]   ;;  %v2934_v13 = vld [vmem:[#allocation2 + $0x1c8] sm:$0xff]  }
  0x6a   : > { %2704 = vmatprep.subr.bf16.mxu1 %v2916_v34  ;;  %v3236_v12 = vsel %vm283_vm0, %v1531_v22, %v1535_v29  ;;  %v2940_v47 = vld [vmem:[#allocation2 + $0x1e0] sm:$0xff]  }
  0x6b   : > { %2625 = vmatmul.mubr.bf16.vlgmr.msra.gmra.mrb[16].mxu0 %v3170_v36 }
  0x6c   : > { %2657 = vmatmul.mubr.bf16.vlgmr.msra.gmra.mrb[16].mxu1 %v3085_v14  ;;  %2673 = vmatpush3.bf16.msra.mxu0 %v2915_v32  ;;  %v2929_v32 = vld [vmem:[#allocation2 + $0x138] sm:$0xff]  }
  0x6d   : > { %2705 = vmatpush3.bf16.msra.mxu1 %v2916_v34  ;;  %2674 = vmatprep.subr.bf16.mxu0 %v2917_v37  ;;  %v2930_v34 = vld [vmem:[#allocation2 + $0x178] sm:$0xff]  }
  0x6e   : > { %2706 = vmatprep.subr.bf16.mxu1 %v2918_v38  ;;  %2628 = vmatprep.mubr.bf16.mxu0 %v3174_v41 }
  0x6f   : > { %2660 = vmatprep.mubr.bf16.mxu1 %v3094_v26 }
  0x70   : > { %2675 = vmatpush3.bf16.msra.mxu0 %v2917_v37  ;;  %v2932_v37 = vld [vmem:[#allocation2 + $0x1c0] sm:$0xff]  }
  0x71   : > { %2707 = vmatpush3.bf16.msra.mxu1 %v2918_v38  ;;  %2676 = vmatprep.subr.bf16.mxu0 %v2919_v42  ;;  %v2933_v38 = vld [vmem:[#allocation2 + $0x188] sm:$0xff]  }
  0x72   : > { %2708 = vmatprep.subr.bf16.mxu1 %v2920_v46 }
  0x73   : > { %2629 = vmatmul.mubr.bf16.gmra.mrb[20].mxu0 %v3187_v51 }
  0x74   : > { %2661 = vmatmul.mubr.bf16.gmra.mrb[20].mxu1 %v3100_v33  ;;  %2677 = vmatpush3.bf16.msra.mxu0 %v2919_v42  ;;  %v2935_v42 = vld [vmem:[#allocation2 + $0x190] sm:$0xff]  }
  0x75   : > { %2709 = vmatpush3.bf16.msra.mxu1 %v2920_v46  ;;  %2678 = vmatprep.subr.bf16.mxu0 %v2921_v53  ;;  %v2939_v46 = vld [vmem:[#allocation2 + $0x1a0] sm:$0xff]  }
  0x76   : > { %2710 = vmatprep.subr.bf16.mxu1 %v2922_v54  ;;  %2632 = vmatprep.mubr.bf16.mxu0 %v3194_v59 }
  0x77   : > { %2664 = vmatprep.mubr.bf16.mxu1 %v3103_v39 }
  0x78   : > { %2679 = vmatpush3.bf16.msra.mxu0 %v2921_v53  ;;  %v3256_v53 = vsel %vm658_vm1, %v3200_v2, %v3207_v5 }
  0x79   : > { %2711 = vmatpush3.bf16.msra.mxu1 %v2922_v54  ;;  %2680 = vmatprep.subr.bf16.mxu0 %v2923_v63  ;;  %v1191_v54 = vrot.slane %v3184_v50, 1  ;;  %v2949_v50 = vld [vmem:[#allocation2 + $0x200] sm:$0xff]  }
  0x7a   : > { %2712 = vmatprep.subr.bf16.mxu1 %v2924_v1 }
  0x7b   : > { %2633 = vmatmul.mubr.bf16.gmra.mrb[24].mxu0 %v3213_v10  ;;  %v1192_v60 = vsel %vm658_vm1, %v3207_v5, %v1191_v54 }
  0x7c   : > { %2665 = vmatmul.mubr.bf16.gmra.mrb[24].mxu1 %v3111_v44  ;;  %2681 = vmatpush3.bf16.msra.mxu0 %v2923_v63  ;;  %v2948_v63 = vld [vmem:[#allocation2 + $0x1f8] sm:$0xff]  }
  0x7d   : > { %2713 = vmatpush3.bf16.msra.mxu1 %v2924_v1  ;;  %2682 = vmatprep.subr.bf16.mxu0 %v2925_v16  ;;  %v2951_v1 = vld [vmem:[#allocation2 + $0x210] sm:$0xff]  }
  0x7e   : > { %2714 = vmatprep.subr.bf16.mxu1 %v2926_v20  ;;  %2636 = vmatprep.mubr.bf16.mxu0 %v3226_v21 }
  0x7f   : > { %2668 = vmatprep.mubr.bf16.mxu1 %v3125_v56 }
  0x80   : > { %2683 = vmatpush3.bf16.msra.mxu0 %v2925_v16 }
  0x81   : > { %2715 = vmatpush3.bf16.msra.mxu1 %v2926_v20  ;;  %2684 = vmatprep.subr.bf16.mxu0 %v2927_v28 }
  0x82   : > { %2716 = vmatprep.subr.bf16.mxu1 %v2928_v30 }
  0x83   : > { %2637 = vmatmul.mubr.bf16.gmra.mrb[28].mxu0 %v675_v3 }
  0x84   : > { %2669 = vmatmul.mubr.bf16.gmra.mrb[28].mxu1 %v3148_v15  ;;  %2685 = vmatpush3.bf16.msra.mxu0 %v2927_v28 }
  0x85   : > { %2717 = vmatpush3.bf16.msra.mxu1 %v2928_v30  ;;  %2686 = vmatprep.subr.bf16.mxu0 %v2929_v32 }
  0x86   : > { %2718 = vmatprep.subr.bf16.mxu1 %v2930_v34  ;;  %2688 = vmatprep.mubr.bf16.mxu0 %v3106_v40  ;;  %v2936_v40 = vld [vmem:[#allocation2 + $0x1d0] sm:$0xff]  }
  0x87   : > { %2720 = vmatprep.mubr.bf16.mxu1 %v3170_v36  ;;  %v2937_v36 = vld [vmem:[#allocation2 + $0x198] sm:$0xff]  }
  0x88   : > { %2687 = vmatpush3.bf16.msra.mxu0 %v2929_v32 }
  0x89   : > { %2719 = vmatpush3.bf16.msra.mxu1 %v2930_v34  ;;  %2736 = vmatprep.subr.bf16.mxu0 %v2931_v35 }
  0x8a   : > { %2768 = vmatprep.subr.bf16.mxu1 %v2932_v37 }
  0x8b   : > { %2689 = vmatmul.mubr.bf16.vlgmr.msra.gmra.mrb[32].mxu0 %v3115_v45 }
  0x8c   : > { %2721 = vmatmul.mubr.bf16.vlgmr.msra.gmra.mrb[32].mxu1 %v3174_v41  ;;  %2737 = vmatpush3.bf16.msra.mxu0 %v2931_v35 }
  0x8d   : > { %2769 = vmatpush3.bf16.msra.mxu1 %v2932_v37  ;;  %2738 = vmatprep.subr.bf16.mxu0 %v2933_v38 }
  0x8e   : > { %2770 = vmatprep.subr.bf16.mxu1 %v2934_v13  ;;  %2692 = vmatprep.mubr.bf16.mxu0 %v3128_v57 }
  0x8f   : > { %2724 = vmatprep.mubr.bf16.mxu1 %v3187_v51 }
  0x90   : > { %2739 = vmatpush3.bf16.msra.mxu0 %v2933_v38 }
  0x91   : > { %2771 = vmatpush3.bf16.msra.mxu1 %v2934_v13  ;;  %2740 = vmatprep.subr.bf16.mxu0 %v2935_v42  ;;  %v3001_v13 = vmov 0  }
  0x92   : > { %2772 = vmatprep.subr.bf16.mxu1 %v2936_v40  ;;  %2095 = vst [vmem:[%s3292_s10] sm:$0xf] %v3001_v13  ;;  %2096 = vst [vmem:[%s3292_s10 + $0x4] sm:$0xf] %v3001_v13 }
  0x93   : > { %2693 = vmatmul.mubr.bf16.gmra.mrb[36].mxu0 %v3133_v62  ;;  %2100 = vst [vmem:[%s3292_s10 + $0x14] sm:$0xf] %v3001_v13  ;;  %2101 = vst [vmem:[%s3292_s10 + $0x18] sm:$0xf] %v3001_v13 }
  0x94   : > { %2725 = vmatmul.mubr.bf16.gmra.mrb[36].mxu1 %v3194_v59  ;;  %2741 = vmatpush3.bf16.msra.mxu0 %v2935_v42  ;;  %2097 = vst [vmem:[%s3292_s10 + $0x8] sm:$0xf] %v3001_v13  ;;  %2098 = vst [vmem:[%s3292_s10 + $0xc] sm:$0xf] %v3001_v13 }
  0x95   : > { %2773 = vmatpush3.bf16.msra.mxu1 %v2936_v40  ;;  %2742 = vmatprep.subr.bf16.mxu0 %v2937_v36  ;;  %2099 = vst [vmem:[%s3292_s10 + $0x10] sm:$0xf] %v3001_v13 }
  0x96   : > { %2774 = vmatprep.subr.bf16.mxu1 %v2938_v43  ;;  %2696 = vmatprep.mubr.bf16.mxu0 %v3144_v8 }
  0x97   : > { %2728 = vmatprep.mubr.bf16.mxu1 %v3213_v10 }
  0x98   : > { %2743 = vmatpush3.bf16.msra.mxu0 %v2937_v36 }
  0x99   : > { %2775 = vmatpush3.bf16.msra.mxu1 %v2938_v43  ;;  %2744 = vmatprep.subr.bf16.mxu0 %v2939_v46 }
  0x9a   : > { %2776 = vmatprep.subr.bf16.mxu1 %v2940_v47 }
  0x9b   : > { %2697 = vmatmul.mubr.bf16.gmra.mrb[40].mxu0 %v3152_v17 }
  0x9c   : > { %2729 = vmatmul.mubr.bf16.gmra.mrb[40].mxu1 %v3226_v21  ;;  %2745 = vmatpush3.bf16.msra.mxu0 %v2939_v46 }
  0x9d   : > { %2777 = vmatpush3.bf16.msra.mxu1 %v2940_v47  ;;  %2746 = vmatprep.subr.bf16.mxu0 %v2941_v48 }
  0x9e   : > { %2778 = vmatprep.subr.bf16.mxu1 %v2942_v49  ;;  %2700 = vmatprep.mubr.bf16.mxu0 %v3161_v27 }
  0x9f   : > { %2732 = vmatprep.mubr.bf16.mxu1 %v3256_v53 }
  0xa0   : > { %2747 = vmatpush3.bf16.msra.mxu0 %v2941_v48 }
  0xa1   : > { %2779 = vmatpush3.bf16.msra.mxu1 %v2942_v49  ;;  %2748 = vmatprep.subr.bf16.mxu0 %v2945_v55 }
  0xa2   : > { %2780 = vmatprep.subr.bf16.mxu1 %v2946_v58 }
  0xa3   : > { %2701 = vmatmul.mubr.bf16.gmra.mrb[44].mxu0 %v3203_v4 }
  0xa4   : > { %2733 = vmatmul.mubr.bf16.gmra.mrb[44].mxu1 %v1192_v60  ;;  %2749 = vmatpush3.bf16.msra.mxu0 %v2945_v55 }
  0xa5   : > { %2781 = vmatpush3.bf16.msra.mxu1 %v2946_v58  ;;  %2750 = vmatprep.subr.bf16.mxu0 %v2947_v61 }
  0xa6   : > { %2782 = vmatprep.subr.bf16.mxu1 %v2948_v63  ;;  %2752 = vmatprep.mubr.bf16.mxu0 %v3085_v14  ;;  %v2952_v14 = vld [vmem:[#allocation2 + $0x218] sm:$0xff]  }
  0xa7   : > { %2784 = vmatprep.mubr.bf16.mxu1 %v3115_v45 }
  0xa8   : > { %2751 = vmatpush3.bf16.msra.mxu0 %v2947_v61 }
  0xa9   : > { %2783 = vmatpush3.bf16.msra.mxu1 %v2948_v63  ;;  %2800 = vmatprep.subr.bf16.mxu0 %v2949_v50 }
  0xaa   : > { %2832 = vmatprep.subr.bf16.mxu1 %v2949_v50 }
  0xab   : > { %2753 = vmatmul.mubr.bf16.vlgmr.msra.gmra.mrb[48].mxu0 %v3094_v26  ;;  %v2953_v26 = vld [vmem:[#allocation2 + $0x220] sm:$0xff]  }
  0xac   : > { %2785 = vmatmul.mubr.bf16.vlgmr.msra.gmra.mrb[48].mxu1 %v3128_v57  ;;  %2801 = vmatpush3.bf16.msra.mxu0 %v2949_v50 }
  0xad   : > { %2840 = vmatpush3.bf16.msra.mxu1 %v2949_v50  ;;  %2802 = vmatprep.subr.bf16.mxu0 %v2950_v0 }
  0xae   : > { %2833 = vmatprep.subr.bf16.mxu1 %v2950_v0  ;;  %2756 = vmatprep.mubr.bf16.mxu0 %v3100_v33  ;;  %v2954_v33 = vld [vmem:[#allocation2 + $0x228] sm:$0xff]  }
  0xaf   : > { %2788 = vmatprep.mubr.bf16.mxu1 %v3133_v62 }
  0xb0   : > { %2803 = vmatpush3.bf16.msra.mxu0 %v2950_v0 }
  0xb1   : > { %2841 = vmatpush3.bf16.msra.mxu1 %v2950_v0  ;;  %2804 = vmatprep.subr.bf16.mxu0 %v2951_v1 }
  0xb2   : > { %2834 = vmatprep.subr.bf16.mxu1 %v2951_v1 }
  0xb3   : > { %2757 = vmatmul.mubr.bf16.gmra.mrb[52].mxu0 %v3103_v39  ;;  %v2956_v39 = vld [vmem:[#allocation2 + $0x230] sm:$0xff]  }
  0xb4   : > { %2789 = vmatmul.mubr.bf16.gmra.mrb[52].mxu1 %v3144_v8  ;;  %2805 = vmatpush3.bf16.msra.mxu0 %v2951_v1 }
  0xb5   : > { %2842 = vmatpush3.bf16.msra.mxu1 %v2951_v1  ;;  %2806 = vmatprep.subr.bf16.mxu0 %v2952_v14 }
  0xb6   : > { %2835 = vmatprep.subr.bf16.mxu1 %v2952_v14  ;;  %2760 = vmatprep.mubr.bf16.mxu0 %v3111_v44  ;;  %v2957_v44 = vld [vmem:[#allocation2 + $0x238] sm:$0xff]  }
  0xb7   : > { %2792 = vmatprep.mubr.bf16.mxu1 %v3152_v17 }
  0xb8   : > { %2807 = vmatpush3.bf16.msra.mxu0 %v2952_v14 }
  0xb9   : > { %2843 = vmatpush3.bf16.msra.mxu1 %v2952_v14  ;;  %2808 = vmatprep.subr.bf16.mxu0 %v2953_v26 }
  0xba   : > { %2836 = vmatprep.subr.bf16.mxu1 %v2953_v26 }
  0xbb   : > { %2761 = vmatmul.mubr.bf16.gmra.mrb[56].mxu0 %v3125_v56 }
  0xbc   : > { %2793 = vmatmul.mubr.bf16.gmra.mrb[56].mxu1 %v3161_v27  ;;  %2809 = vmatpush3.bf16.msra.mxu0 %v2953_v26 }
  0xbd   : > { %2844 = vmatpush3.bf16.msra.mxu1 %v2953_v26  ;;  %2810 = vmatprep.subr.bf16.mxu0 %v2954_v33 }
  0xbe   : > { %2837 = vmatprep.subr.bf16.mxu1 %v2954_v33  ;;  %2764 = vmatprep.mubr.bf16.mxu0 %v3148_v15 }
  0xbf   : > { %2796 = vmatprep.mubr.bf16.mxu1 %v3216_v11 }
  0xc0   : > { %2811 = vmatpush3.bf16.msra.mxu0 %v2954_v33 }
  0xc1   : > { %2845 = vmatpush3.bf16.msra.mxu1 %v2954_v33  ;;  %2812 = vmatprep.subr.bf16.mxu0 %v2956_v39 }
  0xc2   : > { %2838 = vmatprep.subr.bf16.mxu1 %v2956_v39 }
  0xc3   : > { %2765 = vmatmul.mubr.bf16.gmra.mrb[60].mxu0 %v3189_v52 }
  0xc4   : > { %2797 = vmatmul.mubr.bf16.gmra.mrb[60].mxu1 %v3236_v12  ;;  %2813 = vmatpush3.bf16.msra.mxu0 %v2956_v39 }
  0xc5   : > { %2846 = vmatpush3.bf16.msra.mxu1 %v2956_v39  ;;  %2814 = vmatprep.subr.bf16.mxu0 %v2957_v44 }
  0xc6   : > { %2839 = vmatprep.subr.bf16.mxu1 %v2957_v44  ;;  %2816 = vmatprep.mubr.bf16.mxu0 %v3174_v41 }
  0xc7   : > { %2824 = vmatprep.mubr.bf16.mxu1 %v3226_v21 }
  0xc8   : > { %2815 = vmatpush3.bf16.msra.mxu0 %v2957_v44 }
  0xc9   : > { %2847 = vmatpush3.bf16.msra.mxu1 %v2957_v44 }
  0xcb   : > { %2817 = vmatmul.mubr.bf16.vlgmr.msra.gmra.mrb[64].mxu0 %v3187_v51 }
  0xcc   : > { %2825 = vmatmul.mubr.bf16.vlgmr.msra.gmra.mrb[64].mxu1 %v3256_v53  ;;  %2820 = vmatprep.mubr.bf16.mxu0 %v3194_v59 }
  0xcd   : > { %2828 = vmatprep.mubr.bf16.mxu1 %v3221_v19 }
  0xd3   : > { %2821 = vmatmul.mubr.bf16.gmra.mrb[68].mxu0 %v3213_v10 }
  0xd4   : > { %2829 = vmatmul.mubr.bf16.gmra.mrb[68].mxu1 %v3232_v31 }
 0x11e   : > { %v2562_v45 = vpop.f32.mrb[0].mxu0 }
 0x11f   : > { %v2594_v56 = vpop.f32.mrb[0].mxu1  ;;  %v442_v57 = vpop.f32.mrb[1].mxu0 }
 0x120   : > { %v595_v62 = vadd.f32 %v2594_v56, %v2562_v45  ;;  %v587_v8 = vpop.f32.mrb[1].mxu1  ;;  %v2563_v15 = vpop.f32.mrb[2].mxu0 }
 0x121   : > { %v588_v17 = vadd.f32 %v587_v8, %v442_v57  ;;  %v2595_v27 = vpop.f32.mrb[2].mxu1  ;;  %v445_v41 = vpop.f32.mrb[3].mxu0 }
 0x122   : > { %v590_v51 = vpop.f32.mrb[3].mxu1 }
 0x126   : > { %v2566_v52 = vpop.f32.mrb[4].mxu0 }
 0x127   : > { %v2598_v2 = vpop.f32.mrb[4].mxu1  ;;  %v456_v4 = vpop.f32.mrb[5].mxu0 }
 0x128   : > { %v609_v59 = vadd.f32 %v2598_v2, %v2566_v52  ;;  %v601_v5 = vpop.f32.mrb[5].mxu1  ;;  %v2567_v6 = vpop.f32.mrb[6].mxu0 }
 0x129   : > { %v602_v7 = vadd.f32 %v601_v5, %v456_v4  ;;  %v2599_v9 = vpop.f32.mrb[6].mxu1  ;;  %v459_v10 = vpop.f32.mrb[7].mxu0 }
 0x12a   : > { %v604_v11 = vpop.f32.mrb[7].mxu1 }
 0x12e   : > { %v2570_v16 = vpop.f32.mrb[8].mxu0 }
 0x12f   : > { %v2602_v18 = vpop.f32.mrb[8].mxu1  ;;  %v470_v19 = vpop.f32.mrb[9].mxu0 }
 0x130   : > { %v623_v20 = vadd.f32 %v2602_v18, %v2570_v16  ;;  %v615_v21 = vpop.f32.mrb[9].mxu1  ;;  %v2571_v22 = vpop.f32.mrb[10].mxu0 }
 0x131   : > { %v616_v23 = vadd.f32 %v615_v21, %v470_v19  ;;  %v2603_v24 = vpop.f32.mrb[10].mxu1  ;;  %v473_v25 = vpop.f32.mrb[11].mxu0 }
 0x132   : > { %v618_v28 = vpop.f32.mrb[11].mxu1 }
 0x136   : > { %v2574_v29 = vpop.f32.mrb[12].mxu0 }
 0x137   : > { %v2606_v30 = vpop.f32.mrb[12].mxu1  ;;  %v484_v31 = vpop.f32.mrb[13].mxu0 }
 0x138   : > { %v637_v12 = vadd.f32 %v2606_v30, %v2574_v29  ;;  %v629_v3 = vpop.f32.mrb[13].mxu1  ;;  %v2575_v32 = vpop.f32.mrb[14].mxu0 }
 0x139   : > { %v630_v34 = vadd.f32 %v629_v3, %v484_v31  ;;  %v2607_v35 = vpop.f32.mrb[14].mxu1  ;;  %v487_v37 = vpop.f32.mrb[15].mxu0 }
 0x13a   : > { %v632_v38 = vpop.f32.mrb[15].mxu1 }
 0x13e   : > { %v2626_v42 = vpop.f32.mrb[16].mxu0 }
 0x13f   : > { %v822_v40 = vadd.f32 %v2626_v42, %v595_v62  ;;  %v2658_v36 = vpop.f32.mrb[16].mxu1  ;;  %v766_v43 = vpop.f32.mrb[17].mxu0 }
 0x140   : > { %v821_v46 = vadd.f32 %v766_v43, %v588_v17  ;;  %v931_v47 = vpop.f32.mrb[17].mxu1  ;;  %v2627_v48 = vpop.f32.mrb[18].mxu0 }
 0x141   : > { %v987_v49 = vadd.f32 %v2658_v36, %v822_v40  ;;  %v2659_v53 = vpop.f32.mrb[18].mxu1  ;;  %v769_v54 = vpop.f32.mrb[19].mxu0 }
 0x142   : > { %v986_v55 = vadd.f32 %v931_v47, %v821_v46  ;;  %v934_v58 = vpop.f32.mrb[19].mxu1 }
 0x146   : > { %v2630_v60 = vpop.f32.mrb[20].mxu0 }
 0x147   : > { %v824_v61 = vadd.f32 %v2630_v60, %v609_v59  ;;  %v2662_v63 = vpop.f32.mrb[20].mxu1  ;;  %v780_v50 = vpop.f32.mrb[21].mxu0 }
 0x148   : > { %v823_v0 = vadd.f32 %v780_v50, %v602_v7  ;;  %v945_v1 = vpop.f32.mrb[21].mxu1  ;;  %v2631_v14 = vpop.f32.mrb[22].mxu0 }
 0x149   : > { %v989_v26 = vadd.f32 %v2662_v63, %v824_v61  ;;  %v2663_v33 = vpop.f32.mrb[22].mxu1  ;;  %v783_v39 = vpop.f32.mrb[23].mxu0 }
 0x14a   : > { %v988_v44 = vadd.f32 %v945_v1, %v823_v0  ;;  %v948_v45 = vpop.f32.mrb[23].mxu1 }
 0x14e   : > { %v2634_v56 = vpop.f32.mrb[24].mxu0 }
 0x14f   : > { %v826_v57 = vadd.f32 %v2634_v56, %v623_v20  ;;  %v2666_v62 = vpop.f32.mrb[24].mxu1  ;;  %v794_v8 = vpop.f32.mrb[25].mxu0 }
 0x150   : > { %v825_v15 = vadd.f32 %v794_v8, %v616_v23  ;;  %v959_v17 = vpop.f32.mrb[25].mxu1  ;;  %v2635_v27 = vpop.f32.mrb[26].mxu0 }
 0x151   : > { %v991_v41 = vadd.f32 %v2666_v62, %v826_v57  ;;  %v2667_v51 = vpop.f32.mrb[26].mxu1  ;;  %v797_v52 = vpop.f32.mrb[27].mxu0 }
 0x152   : > { %v990_v2 = vadd.f32 %v959_v17, %v825_v15  ;;  %v962_v4 = vpop.f32.mrb[27].mxu1 }
 0x156   : > { %v2638_v59 = vpop.f32.mrb[28].mxu0 }
 0x157   : > { %v828_v5 = vadd.f32 %v2638_v59, %v637_v12  ;;  %v2670_v6 = vpop.f32.mrb[28].mxu1  ;;  %v808_v7 = vpop.f32.mrb[29].mxu0 }
 0x158   : > { %v827_v9 = vadd.f32 %v808_v7, %v630_v34  ;;  %v973_v10 = vpop.f32.mrb[29].mxu1  ;;  %v2639_v11 = vpop.f32.mrb[30].mxu0 }
 0x159   : > { %v993_v16 = vadd.f32 %v2670_v6, %v828_v5  ;;  %v2671_v18 = vpop.f32.mrb[30].mxu1  ;;  %v811_v19 = vpop.f32.mrb[31].mxu0 }
 0x15a   : > { %v992_v20 = vadd.f32 %v973_v10, %v827_v9  ;;  %v976_v21 = vpop.f32.mrb[31].mxu1 }
 0x15e   : > { %v2690_v22 = vpop.f32.mrb[32].mxu0 }
 0x15f   : > { %v1166_v23 = vadd.f32 %v2690_v22, %v987_v49  ;;  %v2722_v24 = vpop.f32.mrb[32].mxu1  ;;  %v1110_v25 = vpop.f32.mrb[33].mxu0 }
 0x160   : > { %v1165_v28 = vadd.f32 %v1110_v25, %v986_v55  ;;  %v1277_v29 = vpop.f32.mrb[33].mxu1  ;;  %v2691_v30 = vpop.f32.mrb[34].mxu0 }
 0x161   : > { %v1333_v31 = vadd.f32 %v2722_v24, %v1166_v23  ;;  %v2723_v3 = vpop.f32.mrb[34].mxu1  ;;  %v1113_v12 = vpop.f32.mrb[35].mxu0 }
 0x162   : > { %v1332_v32 = vadd.f32 %v1277_v29, %v1165_v28  ;;  %v1280_v35 = vpop.f32.mrb[35].mxu1 }
 0x166   : > { %v2694_v34 = vpop.f32.mrb[36].mxu0 }
 0x167   : > { %v1168_v37 = vadd.f32 %v2694_v34, %v989_v26  ;;  %v2726_v38 = vpop.f32.mrb[36].mxu1  ;;  %v1124_v13 = vpop.f32.mrb[37].mxu0 }
 0x168   : > { %v1167_v42 = vadd.f32 %v1124_v13, %v988_v44  ;;  %v1291_v40 = vpop.f32.mrb[37].mxu1  ;;  %v2695_v36 = vpop.f32.mrb[38].mxu0 }
 0x169   : > { %v1335_v43 = vadd.f32 %v2726_v38, %v1168_v37  ;;  %v2727_v46 = vpop.f32.mrb[38].mxu1  ;;  %v1127_v47 = vpop.f32.mrb[39].mxu0 }
 0x16a   : > { %v1334_v48 = vadd.f32 %v1291_v40, %v1167_v42  ;;  %v1294_v49 = vpop.f32.mrb[39].mxu1 }
 0x16e   : > { %v2698_v53 = vpop.f32.mrb[40].mxu0 }
 0x16f   : > { %v1170_v54 = vadd.f32 %v2698_v53, %v991_v41  ;;  %v2730_v55 = vpop.f32.mrb[40].mxu1  ;;  %v1138_v58 = vpop.f32.mrb[41].mxu0 }
 0x170   : > { %v1169_v60 = vadd.f32 %v1138_v58, %v990_v2  ;;  %v1305_v61 = vpop.f32.mrb[41].mxu1  ;;  %v2699_v63 = vpop.f32.mrb[42].mxu0 }
 0x171   : > { %v1337_v50 = vadd.f32 %v2730_v55, %v1170_v54  ;;  %v2731_v0 = vpop.f32.mrb[42].mxu1  ;;  %v1141_v1 = vpop.f32.mrb[43].mxu0 }
 0x172   : > { %v1336_v14 = vadd.f32 %v1305_v61, %v1169_v60  ;;  %v1308_v26 = vpop.f32.mrb[43].mxu1  ;;  %v3002_v0 = vmov 1983009808  }
 0x173   : > { %v1884_v1 = vunpack.c.l.s4 %v3002_v0 }
 0x176   : > { %v2702_v33 = vpop.f32.mrb[44].mxu0 }
 0x177   : > { %v1172_v39 = vadd.f32 %v2702_v33, %v993_v16  ;;  %v2734_v44 = vpop.f32.mrb[44].mxu1  ;;  %v1152_v45 = vpop.f32.mrb[45].mxu0  ;;  %v3306_v33 = vld [vmem:[%s3394_s2] ss:$0 sm:$0xff] }
 0x178   : > { %v1171_v56 = vadd.f32 %v1152_v45, %v992_v20  ;;  %v1319_v57 = vpop.f32.mrb[45].mxu1  ;;  %v2703_v62 = vpop.f32.mrb[46].mxu0 }
 0x179   : > { %v1339_v8 = vadd.f32 %v2734_v44, %v1172_v39  ;;  %v2735_v15 = vpop.f32.mrb[46].mxu1  ;;  %v1155_v17 = vpop.f32.mrb[47].mxu0  ;;  %v1885_v62 = vunpack.c.0.s8 %v1884_v1 }
 0x17a   : > { %v1338_v27 = vadd.f32 %v1319_v57, %v1171_v56  ;;  %v1322_v41 = vpop.f32.mrb[47].mxu1 }
 0x17e   : > { %v2754_v51 = vpop.f32.mrb[48].mxu0 }
 0x17f   : > { %v1498_v52 = vadd.f32 %v2754_v51, %v1333_v31  ;;  %v2786_v2 = vpop.f32.mrb[48].mxu1  ;;  %v1442_v4 = vpop.f32.mrb[49].mxu0 }
 0x180   : > { %v1497_v59 = vadd.f32 %v1442_v4, %v1332_v32  ;;  %v1621_v5 = vpop.f32.mrb[49].mxu1  ;;  %v2755_v6 = vpop.f32.mrb[50].mxu0 }
 0x181   : > { %v1677_v7 = vadd.f32 %v2786_v2, %v1498_v52  ;;  %v2787_v9 = vpop.f32.mrb[50].mxu1  ;;  %v1445_v10 = vpop.f32.mrb[51].mxu0 }
 0x182   : > { %v1676_v11 = vadd.f32 %v1621_v5, %v1497_v59  ;;  %v1624_v16 = vpop.f32.mrb[51].mxu1 }
 0x186   : > { %v2758_v18 = vpop.f32.mrb[52].mxu0 }
 0x187   : > { %v1500_v19 = vadd.f32 %v2758_v18, %v1335_v43  ;;  %v2790_v20 = vpop.f32.mrb[52].mxu1  ;;  %v1456_v21 = vpop.f32.mrb[53].mxu0 }
 0x188   : > { %v1499_v22 = vadd.f32 %v1456_v21, %v1334_v48  ;;  %v1635_v23 = vpop.f32.mrb[53].mxu1  ;;  %v2759_v24 = vpop.f32.mrb[54].mxu0 }
 0x189   : > { %v1679_v25 = vadd.f32 %v2790_v20, %v1500_v19  ;;  %v2791_v28 = vpop.f32.mrb[54].mxu1  ;;  %v1459_v29 = vpop.f32.mrb[55].mxu0 }
 0x18a   : > { %v3301_v30 = vadd.f32 %v1635_v23, %v1499_v22  ;;  %v1638_v31 = vpop.f32.mrb[55].mxu1 }
 0x18e   : > { %v2762_v3 = vpop.f32.mrb[56].mxu0 }
 0x18f   : > { %v1502_v12 = vadd.f32 %v2762_v3, %v1337_v50  ;;  %v2794_v32 = vpop.f32.mrb[56].mxu1  ;;  %v1470_v35 = vpop.f32.mrb[57].mxu0 }
 0x190   : > { %v1501_v34 = vadd.f32 %v1470_v35, %v1336_v14  ;;  %v1649_v37 = vpop.f32.mrb[57].mxu1  ;;  %v2763_v38 = vpop.f32.mrb[58].mxu0  ;;  %v1886_v14 = vlaneseq }
 0x191   : > { %v1681_v13 = vadd.f32 %v2794_v32, %v1502_v12  ;;  %v2795_v42 = vpop.f32.mrb[58].mxu1  ;;  %v1473_v40 = vpop.f32.mrb[59].mxu0 }
 0x192   : > { %v1680_v36 = vadd.f32 %v1649_v37, %v1501_v34  ;;  %v1652_v43 = vpop.f32.mrb[59].mxu1 }
 0x196   : > { %v2766_v46 = vpop.f32.mrb[60].mxu0 }
 0x197   : > { %v1504_v47 = vadd.f32 %v2766_v46, %v1339_v8  ;;  %v2798_v48 = vpop.f32.mrb[60].mxu1  ;;  %v1484_v49 = vpop.f32.mrb[61].mxu0  ;;  %v1887_v8 = vshrl.u32 %v1886_v14, 7 }
 0x198   : > { %v1503_v53 = vadd.f32 %v1484_v49, %v1338_v27  ;;  %v1663_v54 = vpop.f32.mrb[61].mxu1  ;;  %v2767_v55 = vpop.f32.mrb[62].mxu0 }
 0x199   : > { %v1683_v58 = vadd.f32 %v2798_v48, %v1504_v47  ;;  %v2799_v60 = vpop.f32.mrb[62].mxu1  ;;  %v1487_v61 = vpop.f32.mrb[63].mxu0  ;;  %v3312_v10 = vsub.s32 %v1885_v62, %v1887_v8 }
 0x19a   : > { %v1682_v63 = vadd.f32 %v1663_v54, %v1503_v53  ;;  %v1666_v50 = vpop.f32.mrb[63].mxu1 }
 0x19e   : > { %v2818_v26 = vpop.f32.mrb[64].mxu0 }
 0x19f   : > { %v1844_v39 = vadd.f32 %v2818_v26, %v1677_v7  ;;  %v2826_v44 = vpop.f32.mrb[64].mxu1  ;;  %v1788_v45 = vpop.f32.mrb[65].mxu0 }
 0x1a0   : > { %v1848_v56 = vadd.f32 %v2826_v44, %v1681_v13  ;;  %v1843_v57 = vadd.f32 %v1788_v45, %v1676_v11  ;;  %v1816_v15 = vpop.f32.mrb[65].mxu1  ;;  %v2819_v17 = vpop.f32.mrb[66].mxu0 }
 0x1a1   : > { %v1859_v27 = vadd.f32 %v3306_v33, %v1844_v39  ;;  %v1847_v41 = vadd.f32 %v1816_v15, %v1680_v36  ;;  %v2827_v51 = vpop.f32.mrb[66].mxu1  ;;  %v1791_v52 = vpop.f32.mrb[67].mxu0 }
 0x1a2   : > { %v1863_v2 = vadd.f32 %v3306_v33, %v1848_v56  ;;  %v1858_v4 = vadd.f32 %v3306_v33, %v1843_v57  ;;  %v1819_v59 = vpop.f32.mrb[67].mxu1 }
 0x1a3   : > { %v1867_v5 = vmax.f32 %v1859_v27, 0.0  ;;  %v1862_v6 = vadd.f32 %v3306_v33, %v1847_v41 }
 0x1a4   : > { %v1871_v7 = vmax.f32 %v1863_v2, 0.0  ;;  %v1866_v9 = vmax.f32 %v1858_v4, 0.0 }
 0x1a5   : > { %v1870_v11 = vmax.f32 %v1862_v6, 0.0 }
 0x1a6   : > { %v1874_v16 = vmax.f32 %v1866_v9, %v1867_v5  ;;  %v2822_v18 = vpop.f32.mrb[68].mxu0 }
 0x1a7   : > { %v1876_v19 = vmax.f32 %v1870_v11, %v1871_v7  ;;  %v1846_v20 = vadd.f32 %v2822_v18, %v1679_v25  ;;  %v2830_v21 = vpop.f32.mrb[68].mxu1  ;;  %v1802_v22 = vpop.f32.mrb[69].mxu0 }
 0x1a8   : > { %v1882_v23 = vcombine.high %v1874_v16, %v1874_v16  ;;  %v1889_v24 = vrot.slane %v1874_v16, %v3312_v10  ;;  %v1850_v28 = vadd.f32 %v2830_v21, %v1683_v58  ;;  %v3316_v29 = vadd.f32 %v1802_v22, %v3301_v30  ;;  %v1830_v31 = vpop.f32.mrb[69].mxu1  ;;  %v2823_v3 = vpop.f32.mrb[70].mxu0 }
 0x1a9   : > { %v1916_v12 = vcombine.high %v1876_v19, %v1876_v19  ;;  %v1923_v32 = vrot.slane %v1876_v19, %v3312_v10  ;;  %v3320_v35 = vadd.f32 %v3306_v33, %v1846_v20  ;;  %v3322_v34 = vadd.f32 %v1830_v31, %v1682_v63  ;;  %v2831_v25 = vpop.f32.mrb[70].mxu1  ;;  %v1805_v37 = vpop.f32.mrb[71].mxu0 }
 0x1aa   : > { %v1896_v38 = vrot.slane %v1882_v23, %v3312_v10  ;;  %v1897_v13 = vcombine.high %v1889_v24, %v1889_v24  ;;  %v1967_v42 = vsel %vm1966_vm2, %v1889_v24, -inf  ;;  %v3327_v30 = vadd.f32 %v3306_v33, %v1850_v28  ;;  %v1833_v40 = vpop.f32.mrb[71].mxu1 }
 0x1ab   : > { %v1968_v36 = vrot.slane %v1967_v42, 4  ;;  %v1930_v43 = vrot.slane %v1916_v12, %v3312_v10  ;;  %v1931_v46 = vcombine.high %v1923_v32, %v1923_v32  ;;  %v2023_v47 = vsel %vm1966_vm2, %v1923_v32, -inf }
 0x1ac   : > { %v1898_v48 = vcombine.high %v1896_v38, %v1896_v38  ;;  %v1974_v49 = vsel %vm1966_vm2, %v1897_v13, -inf  ;;  %v1981_v53 = vsel %vm1966_vm2, %v1896_v38, -inf  ;;  %v2024_v54 = vrot.slane %v2023_v47, 4 }
 0x1ad   : > { %v1969_v55 = vmax.f32 %v1967_v42, %v1968_v36  ;;  %v1975_v58 = vrot.slane %v1974_v49, 4  ;;  %v1982_v60 = vrot.slane %v1981_v53, 4  ;;  %v1932_v61 = vcombine.high %v1930_v43, %v1930_v43 }
 0x1ae   : > { %v1988_v63 = vsel %vm1966_vm2, %v1898_v48, -inf  ;;  %v2025_v50 = vmax.f32 %v2023_v47, %v2024_v54  ;;  %v2030_v0 = vsel %vm1966_vm2, %v1931_v46, -inf  ;;  %v2037_v1 = vsel %vm1966_vm2, %v1930_v43, -inf }
 0x1af   : > { %v1970_v14 = vrot.slane %v1969_v55, 2  ;;  %v1976_v26 = vmax.f32 %v1974_v49, %v1975_v58  ;;  %v1983_v39 = vmax.f32 %v1981_v53, %v1982_v60  ;;  %v1989_v44 = vrot.slane %v1988_v63, 4 }
 0x1b0   : > { %v2026_v45 = vrot.slane %v2025_v50, 2  ;;  %v2031_v56 = vrot.slane %v2030_v0, 4  ;;  %v2038_v57 = vrot.slane %v2037_v1, 4  ;;  %v2044_v62 = vsel %vm1966_vm2, %v1932_v61, -inf }
 0x1b1   : > { %v1971_v8 = vmax.f32 %v1969_v55, %v1970_v14  ;;  %v1977_v15 = vrot.slane %v1976_v26, 2  ;;  %v1984_v17 = vrot.slane %v1983_v39, 2  ;;  %v1990_v27 = vmax.f32 %v1988_v63, %v1989_v44 }
 0x1b2   : > { %v2027_v41 = vmax.f32 %v2025_v50, %v2026_v45  ;;  %v2032_v51 = vmax.f32 %v2030_v0, %v2031_v56  ;;  %v2039_v52 = vmax.f32 %v2037_v1, %v2038_v57  ;;  %v2045_v2 = vrot.slane %v2044_v62, 4  ;;  %v2129_v57 = vld [vmem:[%s3292_s10 + $0x4] sm:$0x7] }
 0x1b3   : > { %v1972_v4 = vrot.slane %v1971_v8, 1  ;;  %v1978_v59 = vmax.f32 %v1976_v26, %v1977_v15  ;;  %v1985_v5 = vmax.f32 %v1983_v39, %v1984_v17  ;;  %v1991_v6 = vrot.slane %v1990_v27, 2 }
 0x1b4   : > { %v2028_v7 = vrot.slane %v2027_v41, 1  ;;  %v2033_v9 = vrot.slane %v2032_v51, 2  ;;  %v2040_v11 = vrot.slane %v2039_v52, 2  ;;  %v2046_v16 = vmax.f32 %v2044_v62, %v2045_v2 }
 0x1b5   : > { %v1973_v18 = vmax.f32 %v1971_v8, %v1972_v4  ;;  %v1979_v19 = vrot.slane %v1978_v59, 1  ;;  %v1986_v20 = vrot.slane %v1985_v5, 1  ;;  %v1992_v21 = vmax.f32 %v1990_v27, %v1991_v6 }
 0x1b6   : > { %v2029_v22 = vmax.f32 %v2027_v41, %v2028_v7  ;;  %v2034_v23 = vmax.f32 %v2032_v51, %v2033_v9  ;;  %v2041_v24 = vmax.f32 %v2039_v52, %v2040_v11  ;;  %v2047_v28 = vrot.slane %v2046_v16, 2  ;;  %v2177_v52 = vld [vmem:[%s3292_s10 + $0xc] sm:$0x7] }
 0x1b7   : > { %v1980_v31 = vmax.f32 %v1978_v59, %v1979_v19  ;;  %v1987_v3 = vmax.f32 %v1985_v5, %v1986_v20  ;;  %v1993_v12 = vrot.slane %v1992_v21, 1  ;;  %v2384_v32 = vpack.c.bf16 %v1973_v18, %v1973_v18 }
 0x1b8   : > { %v2035_v25 = vrot.slane %v2034_v23, 1  ;;  %v2042_v37 = vrot.slane %v2041_v24, 1  ;;  %v2048_v38 = vmax.f32 %v2046_v16, %v2047_v28  ;;  %v2392_v13 = vpack.c.bf16 %v2029_v22, %v2029_v22 }
 0x1b9   : > { %v1994_v42 = vmax.f32 %v1992_v21, %v1993_v12  ;;  %v2385_v40 = vpack.c.bf16 %v1980_v31, %v1980_v31  ;;  %v2386_v36 = vpack.c.bf16 %v1987_v3, %v1987_v3  ;;  %v2114_v43 = vunpack.c.l.b16 %v2384_v32 }
 0x1ba   : > { %v2036_v46 = vmax.f32 %v2034_v23, %v2035_v25  ;;  %v2043_v47 = vmax.f32 %v2041_v24, %v2042_v37  ;;  %v2049_v48 = vrot.slane %v2048_v38, 1  ;;  %v2168_v49 = vunpack.c.l.b16 %v2392_v13 }
 0x1bb   : > { %v2387_v53 = vpack.c.bf16 %v1994_v42, %v1994_v42  ;;  %v2115_v54 = vunpack.c.l.b16 %v2385_v40  ;;  %v2116_v55 = vunpack.c.l.b16 %v2386_v36  ;;  %v1869_v58 = vmax.f32 %v3320_v35, 0.0 }
 0x1bc   : > { %v2050_v60 = vmax.f32 %v2048_v38, %v2049_v48  ;;  %v2393_v61 = vpack.c.bf16 %v2036_v46, %v2036_v46  ;;  %v2394_v63 = vpack.c.bf16 %v2043_v47, %v2043_v47  ;;  %v1873_v50 = vmax.f32 %v3327_v30, 0.0 }
 0x1bd   : > { %v2117_v0 = vunpack.c.l.b16 %v2387_v53  ;;  %v2119_v1 = vsel %vm2118_vm3, %v2115_v54, %v2114_v43  ;;  %v1860_v14 = vadd.f32 %v3306_v33, %v3316_v29  ;;  %v1864_v26 = vadd.f32 %v3306_v33, %v3322_v34 }
 0x1be   : > { %v2121_v39 = vsel %vm2120_vm4, %v2116_v55, %v2119_v1  ;;  %v2395_v44 = vpack.c.bf16 %v2050_v60, %v2050_v60  ;;  %v2169_v45 = vunpack.c.l.b16 %v2393_v61  ;;  %v2170_v35 = vunpack.c.l.b16 %v2394_v63 }
 0x1bf   : > { %v2123_v56 = vsel %vm2122_vm5, %v2117_v0, %v2121_v39  ;;  %v1868_v29 = vmax.f32 %v1860_v14, 0.0  ;;  %v1872_v62 = vmax.f32 %v1864_v26, 0.0 }
 0x1c0   : > { %v2124_v8 = vpack.c.b16 %v2123_v56, %v2123_v56  ;;  %v2171_v33 = vunpack.c.l.b16 %v2395_v44  ;;  %v2172_v34 = vsel %vm2118_vm3, %v2169_v45, %v2168_v49 }
 0x1c1   : > { %v2173_v15 = vsel %vm2120_vm4, %v2170_v35, %v2172_v34  ;;  %v1875_v17 = vmax.f32 %v1868_v29, %v1869_v58  ;;  %v1877_v27 = vmax.f32 %v1872_v62, %v1873_v50 }
 0x1c2   : > { %v2130_v41 = vsel %vm3348_vm8, %v2124_v8, %v2129_v57  ;;  %v2174_v51 = vsel %vm2122_vm5, %v2171_v33, %v2173_v15 }
 0x1c3   : > { %2131 = vst [vmem:[%s3292_s10 + $0x4] sm:$0x7] %v2130_v41  ;;  %v2175_v2 = vpack.c.b16 %v2174_v51, %v2174_v51  ;;  %v1899_v4 = vcombine.high %v1875_v17, %v1875_v17  ;;  %v1906_v59 = vrot.slane %v1875_v17, %v3312_v10  ;;  %v1933_v5 = vcombine.high %v1877_v27, %v1877_v27 }
 0x1c4   : > { %v1940_v6 = vrot.slane %v1877_v27, %v3312_v10 }
 0x1c5   : > { %v2178_v7 = vsel %vm3348_vm8, %v2175_v2, %v2177_v52  ;;  %v1913_v9 = vrot.slane %v1899_v4, %v3312_v10  ;;  %v1914_v11 = vcombine.high %v1906_v59, %v1906_v59  ;;  %v1995_v16 = vsel %vm1966_vm2, %v1906_v59, -inf }
 0x1c6   : > { %2179 = vst [vmem:[%s3292_s10 + $0xc] sm:$0x7] %v2178_v7  ;;  %v1996_v18 = vrot.slane %v1995_v16, 4  ;;  %v1947_v19 = vrot.slane %v1933_v5, %v3312_v10  ;;  %v1948_v20 = vcombine.high %v1940_v6, %v1940_v6  ;;  %v2051_v21 = vsel %vm1966_vm2, %v1940_v6, -inf }
 0x1c7   : > { %v1915_v22 = vcombine.high %v1913_v9, %v1913_v9  ;;  %v2002_v23 = vsel %vm1966_vm2, %v1914_v11, -inf  ;;  %v2009_v24 = vsel %vm1966_vm2, %v1913_v9, -inf  ;;  %v2052_v28 = vrot.slane %v2051_v21, 4 }
 0x1c8   : > { %v1997_v31 = vmax.f32 %v1995_v16, %v1996_v18  ;;  %v2003_v3 = vrot.slane %v2002_v23, 4  ;;  %v2010_v12 = vrot.slane %v2009_v24, 4  ;;  %v1949_v32 = vcombine.high %v1947_v19, %v1947_v19 }
 0x1c9   : > { %v2016_v25 = vsel %vm1966_vm2, %v1915_v22, -inf  ;;  %v2053_v37 = vmax.f32 %v2051_v21, %v2052_v28  ;;  %v2058_v38 = vsel %vm1966_vm2, %v1948_v20, -inf  ;;  %v2065_v10 = vsel %vm1966_vm2, %v1947_v19, -inf }
 0x1ca   : > { %v1998_v13 = vrot.slane %v1997_v31, 2  ;;  %v2004_v42 = vmax.f32 %v2002_v23, %v2003_v3  ;;  %v2011_v40 = vmax.f32 %v2009_v24, %v2010_v12  ;;  %v2017_v36 = vrot.slane %v2016_v25, 4 }
 0x1cb   : > { %v2054_v43 = vrot.slane %v2053_v37, 2  ;;  %v2059_v46 = vrot.slane %v2058_v38, 4  ;;  %v2066_v47 = vrot.slane %v2065_v10, 4  ;;  %v2072_v48 = vsel %vm1966_vm2, %v1949_v32, -inf }
 0x1cc   : > { %v1999_v49 = vmax.f32 %v1997_v31, %v1998_v13  ;;  %v2005_v53 = vrot.slane %v2004_v42, 2  ;;  %v2012_v54 = vrot.slane %v2011_v40, 2  ;;  %v2018_v55 = vmax.f32 %v2016_v25, %v2017_v36 }
 0x1cd   : > { %v2055_v58 = vmax.f32 %v2053_v37, %v2054_v43  ;;  %v2060_v60 = vmax.f32 %v2058_v38, %v2059_v46  ;;  %v2067_v61 = vmax.f32 %v2065_v10, %v2066_v47  ;;  %v2073_v63 = vrot.slane %v2072_v48, 4  ;;  %v2153_v38 = vld [vmem:[%s3292_s10 + $0x8] sm:$0x7]  ;;  %v2201_v46 = vld [vmem:[%s3292_s10 + $0x10] sm:$0x7] }
 0x1ce   : > { %v2000_v50 = vrot.slane %v1999_v49, 1  ;;  %v2006_v0 = vmax.f32 %v2004_v42, %v2005_v53  ;;  %v2013_v1 = vmax.f32 %v2011_v40, %v2012_v54  ;;  %v2019_v14 = vrot.slane %v2018_v55, 2 }
 0x1cf   : > { %v2056_v26 = vrot.slane %v2055_v58, 1  ;;  %v2061_v39 = vrot.slane %v2060_v60, 2  ;;  %v2068_v44 = vrot.slane %v2067_v61, 2  ;;  %v2074_v45 = vmax.f32 %v2072_v48, %v2073_v63 }
 0x1d0   : > { %v2001_v35 = vmax.f32 %v1999_v49, %v2000_v50  ;;  %v2007_v56 = vrot.slane %v2006_v0, 1  ;;  %v2014_v57 = vrot.slane %v2013_v1, 1  ;;  %v2020_v29 = vmax.f32 %v2018_v55, %v2019_v14 }
 0x1d1   : > { %v2057_v62 = vmax.f32 %v2055_v58, %v2056_v26  ;;  %v2062_v8 = vmax.f32 %v2060_v60, %v2061_v39  ;;  %v2069_v33 = vmax.f32 %v2067_v61, %v2068_v44  ;;  %v2075_v34 = vrot.slane %v2074_v45, 2 }
 0x1d2   : > { %v2008_v15 = vmax.f32 %v2006_v0, %v2007_v56  ;;  %v2015_v17 = vmax.f32 %v2013_v1, %v2014_v57  ;;  %v2021_v27 = vrot.slane %v2020_v29, 1  ;;  %v2388_v41 = vpack.c.bf16 %v2001_v35, %v2001_v35 }
 0x1d3   : > { %v2063_v51 = vrot.slane %v2062_v8, 1  ;;  %v2070_v52 = vrot.slane %v2069_v33, 1  ;;  %v2076_v2 = vmax.f32 %v2074_v45, %v2075_v34  ;;  %v2396_v6 = vpack.c.bf16 %v2057_v62, %v2057_v62 }
 0x1d4   : > { %v2022_v4 = vmax.f32 %v2020_v29, %v2021_v27  ;;  %v2389_v59 = vpack.c.bf16 %v2008_v15, %v2008_v15  ;;  %v2390_v5 = vpack.c.bf16 %v2015_v17, %v2015_v17  ;;  %v2144_v18 = vunpack.c.l.b16 %v2388_v41 }
 0x1d5   : > { %v2064_v7 = vmax.f32 %v2062_v8, %v2063_v51  ;;  %v2071_v9 = vmax.f32 %v2069_v33, %v2070_v52  ;;  %v2077_v11 = vrot.slane %v2076_v2, 1  ;;  %v2192_v31 = vunpack.c.l.b16 %v2396_v6 }
 0x1d6   : > { %v2391_v16 = vpack.c.bf16 %v2022_v4, %v2022_v4  ;;  %v2145_v19 = vunpack.c.l.b16 %v2389_v59  ;;  %v2146_v20 = vunpack.c.l.b16 %v2390_v5 }
 0x1d7   : > { %v2078_v21 = vmax.f32 %v2076_v2, %v2077_v11  ;;  %v2397_v22 = vpack.c.bf16 %v2064_v7, %v2064_v7  ;;  %v2398_v23 = vpack.c.bf16 %v2071_v9, %v2071_v9 }
 0x1d8   : > { %v2147_v24 = vunpack.c.l.b16 %v2391_v16  ;;  %v2148_v28 = vsel %vm2118_vm3, %v2145_v19, %v2144_v18 }
 0x1d9   : > { %v2149_v3 = vsel %vm2120_vm4, %v2146_v20, %v2148_v28  ;;  %v2399_v12 = vpack.c.bf16 %v2078_v21, %v2078_v21  ;;  %v2193_v32 = vunpack.c.l.b16 %v2397_v22  ;;  %v2194_v25 = vunpack.c.l.b16 %v2398_v23 }
 0x1da   : > { %v2150_v37 = vsel %vm2122_vm5, %v2147_v24, %v2149_v3 }
 0x1db   : > { %v2151_v10 = vpack.c.b16 %v2150_v37, %v2150_v37  ;;  %v2195_v13 = vunpack.c.l.b16 %v2399_v12  ;;  %v2196_v42 = vsel %vm2118_vm3, %v2193_v32, %v2192_v31 }
 0x1dc   : > { %v2197_v40 = vsel %vm2120_vm4, %v2194_v25, %v2196_v42 }
 0x1dd   : > { %v2154_v36 = vsel %vm3348_vm8, %v2151_v10, %v2153_v38  ;;  %v2198_v43 = vsel %vm2122_vm5, %v2195_v13, %v2197_v40 }
 0x1de   : > { %2155 = vst [vmem:[%s3292_s10 + $0x8] sm:$0x7] %v2154_v36  ;;  %v2199_v47 = vpack.c.b16 %v2198_v43, %v2198_v43 }
 0x1e0   : > { %v2202_v48 = vsel %vm3348_vm8, %v2199_v47, %v2201_v46 }
 0x1e1   : > { %2203 = vst [vmem:[%s3292_s10 + $0x10] sm:$0x7] %v2202_v48 }
 0x1e2 PF: > { %s14_s12 = sadd.s32 1, %s2996_s12  }
 0x1e3   : > { %p11_p3 = scmp.ge.s32.totalorder %s14_s12, 4  }
 0x1e5   :  { %13 = sbr.rel (!%p11_p3) target bundleno = 1 (0x1), region = 67 }
 0x1ec   :  { %2225 = vsyncpa [#allocation3], 1 }
 0x1ed   :  { %2227 = vsyncpa [#allocation3 + $0x1], 1 }

// kernel: vgg_forward.6
= control target key start
LH: loop header
LB: loop body
LE: loop exit
PB: predicated region body
PF: predicated region fallthrough
CT: control target
= control target key end

     0   :  { %s3837_s12 = smov 0   ;;  %s4839_s0 = inlined_call_operand.vmem [shape: bf16[2,40,128], index: 0, kind: input, shape index: {}]   ;;  %s4840_s1 = inlined_call_operand.vmem [shape: bf16[1152,512], index: 1, kind: input, shape index: {}]   ;;  %s4841_s2 = inlined_call_operand.vmem [shape: f32[1,512], index: 2, kind: input, shape index: {}]   ;;  %s4842_s3 = inlined_call_operand.vmem [shape: bf16[2,1,512], index: 3, kind: output, shape index: {}]  }
   0x1 LB: > { %s2988_s13 = sadd.s32 4294967295, %s3813_s12   ;;  %p2992_p0 = scmp.ge.s32.totalorder %s3813_s12, 1  ;;  %s3813_s12 = sphi %s3837_s12, %s13_s12  }
   0x2   : > { %p137_p1 = scmp.lt.s32.totalorder %s3813_s12, 3 }
   0x4   : > { %p138_p2 = pnand %p2992_p0, %p137_p1 }
   0x5   : > { %v3368_v0 = vld [vmem:[%s4840_s1 + $0x104] ss:$16 sps:$4 sm:$0xff] (!%p138_p2)   ;;  %v3370_v1 = vld [vmem:[%s4840_s1 + $0x10c] ss:$16 sps:$4 sm:$0xff] (!%p138_p2)   ;;  %v3815_v2 = vmov (!%p138_p2), 0   ;;  %p160_p3 = scmp.lt.s32.totalorder (!%p138_p2), %s2988_s13, 1 }
   0x6   : > { %141 = sbr.rel (%p138_p2) target bundleno = 540 (0x21c), region = 32  ;;  %453 = vmatprep.mubr.bf16.mxu0 (!%p138_p2), %v3815_v2  ;;  %496 = vmatprep.mubr.bf16.mxu1 (!%p138_p2), %v3815_v2  ;;  %v3372_v3 = vld [vmem:[%s4840_s1 + $0x100] ss:$16 sps:$4 sm:$0xff] (!%p138_p2)   ;;  %v3373_v4 = vld [vmem:[%s4840_s1 + $0x108] ss:$16 sps:$4 sm:$0xff] (!%p138_p2)   ;;  %vm786_vm0 = vcmask (!%p138_p2), 1046528  }
   0x7   : > { %421 = vmatprep.subr.bf16.mxu0 (!%p138_p2), %v3368_v0  ;;  %464 = vmatprep.subr.bf16.mxu1 (!%p138_p2), %v3370_v1  ;;  %v3374_v5 = vld [vmem:[%s4840_s1 + $0x124] ss:$16 sps:$4 sm:$0xff] (!%p138_p2)   ;;  %v3376_v6 = vld [vmem:[%s4840_s1 + $0x12c] ss:$16 sps:$4 sm:$0xff] (!%p138_p2)   ;;  %v3378_v7 = vld [vmem:[%s4840_s1 + $0x120] ss:$16 sps:$4 sm:$0xff] (!%p138_p2)  }
   0x8   : > { %422 = vmatpush1.bf16.msra.mxu0 (!%p138_p2), %v3372_v3  ;;  %465 = vmatpush1.bf16.msra.mxu1 (!%p138_p2), %v3373_v4  ;;  %v3379_v8 = vld [vmem:[%s4840_s1 + $0x128] ss:$16 sps:$4 sm:$0xff] (!%p138_p2)   ;;  %v3380_v9 = vld [vmem:[%s4840_s1 + $0x144] ss:$16 sps:$4 sm:$0xff] (!%p138_p2)   ;;  %v3382_v10 = vld [vmem:[%s4840_s1 + $0x14c] ss:$16 sps:$4 sm:$0xff] (!%p138_p2)  }
   0x9   : > { %423 = vmatprep.subr.bf16.mxu0 (!%p138_p2), %v3374_v5  ;;  %466 = vmatprep.subr.bf16.mxu1 (!%p138_p2), %v3376_v6  ;;  %v3384_v11 = vld [vmem:[%s4840_s1 + $0x140] ss:$16 sps:$4 sm:$0xff] (!%p138_p2)   ;;  %v3385_v12 = vld [vmem:[%s4840_s1 + $0x148] ss:$16 sps:$4 sm:$0xff] (!%p138_p2)   ;;  %v3386_v13 = vld [vmem:[%s4840_s1 + $0x164] ss:$16 sps:$4 sm:$0xff] (!%p138_p2)  }
   0xa   : > { %v3388_v14 = vld [vmem:[%s4840_s1 + $0x16c] ss:$16 sps:$4 sm:$0xff] (!%p138_p2)   ;;  %v3390_v15 = vld [vmem:[%s4840_s1 + $0x160] ss:$16 sps:$4 sm:$0xff] (!%p138_p2)   ;;  %v3391_v16 = vld [vmem:[%s4840_s1 + $0x168] ss:$16 sps:$4 sm:$0xff] (!%p138_p2)  }
   0xb   : > { %v3392_v17 = vld [vmem:[%s4840_s1 + $0x184] ss:$16 sps:$4 sm:$0xff] (!%p138_p2)   ;;  %v3394_v18 = vld [vmem:[%s4840_s1 + $0x18c] ss:$16 sps:$4 sm:$0xff] (!%p138_p2)   ;;  %v3396_v19 = vld [vmem:[%s4840_s1 + $0x180] ss:$16 sps:$4 sm:$0xff] (!%p138_p2)  }
   0xc   : > { %424 = vmatpush1.bf16.msra.mxu0 (!%p138_p2), %v3378_v7  ;;  %467 = vmatpush1.bf16.msra.mxu1 (!%p138_p2), %v3379_v8  ;;  %v3397_v20 = vld [vmem:[%s4840_s1 + $0x188] ss:$16 sps:$4 sm:$0xff] (!%p138_p2)   ;;  %v3398_v21 = vld [vmem:[%s4840_s1 + $0x1a4] ss:$16 sps:$4 sm:$0xff] (!%p138_p2)   ;;  %v3400_v22 = vld [vmem:[%s4840_s1 + $0x1ac] ss:$16 sps:$4 sm:$0xff] (!%p138_p2)  }
   0xd   : > { %425 = vmatprep.subr.bf16.mxu0 %v3380_v9  ;;  %468 = vmatprep.subr.bf16.mxu1 %v3382_v10  ;;  %s4848_s13 = smov (!%p160_p3, %s2988_s13), 1  ;;  %v3402_v23 = vld [vmem:[%s4840_s1 + $0x1a0] ss:$16 sps:$4 sm:$0xff]   ;;  %v3403_v24 = vld [vmem:[%s4840_s1 + $0x1a8] ss:$16 sps:$4 sm:$0xff]   ;;  %vm2843_vm2 = vcmask 1041408  }
   0xe   : > { %s3357_s6 = smul.u32 20, %s4848_s13  ;;  %v3404_v25 = vld [vmem:[%s4840_s1 + $0x1c4] ss:$16 sps:$4 sm:$0xff]   ;;  %v3406_v26 = vld [vmem:[%s4840_s1 + $0x1cc] ss:$16 sps:$4 sm:$0xff]   ;;  %vm2917_vm3 = vcmask 1040384  }
   0xf   : > { %v3408_v27 = vld [vmem:[%s4840_s1 + $0x1c0] ss:$16 sps:$4 sm:$0xff]   ;;  %v3409_v28 = vld [vmem:[%s4840_s1 + $0x1c8] ss:$16 sps:$4 sm:$0xff]   ;;  %v3410_v29 = vld [vmem:[%s4840_s1 + $0x1e4] ss:$16 sps:$4 sm:$0xff]  }
  0x10   : > { %426 = vmatpush1.bf16.msra.mxu0 %v3384_v11  ;;  %469 = vmatpush1.bf16.msra.mxu1 %v3385_v12  ;;  %s3935_s19 = scalar_lea.vmem %s4839_s0, %s3357_s6  ;;  %v3412_v33 = vld [vmem:[%s4840_s1 + $0x1ec] ss:$16 sps:$4 sm:$0xff]   ;;  %v3414_v36 = vld [vmem:[%s4840_s1 + $0x1e0] ss:$16 sps:$4 sm:$0xff]   ;;  %v3415_v40 = vld [vmem:[%s4840_s1 + $0x1e8] ss:$16 sps:$4 sm:$0xff]  }
  0x11   : > { %427 = vmatprep.subr.bf16.mxu0 %v3386_v13  ;;  %470 = vmatprep.subr.bf16.mxu1 %v3388_v14  ;;  %v170_v30 = vld [vmem:[%s3935_s19] sm:$0xf]  ;;  %v3948_v31 = vld [vmem:[%s3935_s19 + $0x4] sm:$0xf]  ;;  %v3951_v32 = vld [vmem:[%s3935_s19 + $0x8] sm:$0xf] }
  0x12   : > { %v3957_v34 = vcombine.low %v170_v30, %v3948_v31  ;;  %v2996_v35 = vcombine.low %v3951_v32, %v3951_v32  ;;  %v3418_v43 = vld [vmem:[%s4840_s1 + $0x4] ss:$16 sps:$4 sm:$0xff]   ;;  %v3421_v44 = vld [vmem:[%s4840_s1 + $0xc] ss:$16 sps:$4 sm:$0xff]   ;;  %vm247_vm1 = vsmask.f32 7424 }
  0x13   : > { %v3416_v49 = vld [vmem:[%s4840_s1] ss:$16 sps:$4 sm:$0xff]   ;;  %v3419_v50 = vld [vmem:[%s4840_s1 + $0x8] ss:$16 sps:$4 sm:$0xff]   ;;  %v3426_v52 = vld [vmem:[%s4840_s1 + $0x24] ss:$16 sps:$4 sm:$0xff]  }
  0x14   : > { %428 = vmatpush1.bf16.msra.mxu0 %v3390_v15  ;;  %471 = vmatpush1.bf16.msra.mxu1 %v3391_v16  ;;  %v249_v37 = vshrl.u32 %v3957_v34, 16  ;;  %v251_v38 = vshll.u32 %v3957_v34, 16  ;;  %v256_v39 = vshll.u32 %v2996_v35, 16  ;;  %v787_v41 = vrot.slane %v3957_v34, 1  ;;  %v3429_v53 = vld [vmem:[%s4840_s1 + $0x2c] ss:$16 sps:$4 sm:$0xff]  }
  0x15   : > { %429 = vmatprep.subr.bf16.mxu0 %v3392_v17  ;;  %472 = vmatprep.subr.bf16.mxu1 %v3394_v18  ;;  %v788_v42 = vrot.slane %v2996_v35, 1  ;;  %v3424_v54 = vld [vmem:[%s4840_s1 + $0x20] ss:$16 sps:$4 sm:$0xff]   ;;  %v3427_v55 = vld [vmem:[%s4840_s1 + $0x28] ss:$16 sps:$4 sm:$0xff]   ;;  %vm2920_vm5 = vcmask 1041409  }
  0x16   : > { %v253_v45 = vrot.slane %v251_v38, 1  ;;  %v258_v46 = vrot.slane %v256_v39, 1  ;;  %v3432_v56 = vld [vmem:[%s4840_s1 + $0x44] ss:$16 sps:$4 sm:$0xff]   ;;  %v3435_v57 = vld [vmem:[%s4840_s1 + $0x4c] ss:$16 sps:$4 sm:$0xff]  }
  0x17   : > { %v3977_v47 = vsel %vm786_vm0, %v787_v41, %v788_v42  ;;  %v3430_v58 = vld [vmem:[%s4840_s1 + $0x40] ss:$16 sps:$4 sm:$0xff]   ;;  %v3433_v59 = vld [vmem:[%s4840_s1 + $0x48] ss:$16 sps:$4 sm:$0xff]   ;;  %v3438_v60 = vld [vmem:[%s4840_s1 + $0x64] ss:$16 sps:$4 sm:$0xff]  }
  0x18   : > { %430 = vmatpush1.bf16.msra.mxu0 %v3396_v19  ;;  %473 = vmatpush1.bf16.msra.mxu1 %v3397_v20  ;;  %v254_v48 = vor.u32 %v253_v45, %v249_v37  ;;  %v3441_v61 = vld [vmem:[%s4840_s1 + $0x6c] ss:$16 sps:$4 sm:$0xff]   ;;  %v3436_v62 = vld [vmem:[%s4840_s1 + $0x60] ss:$16 sps:$4 sm:$0xff]   ;;  %v3439_v63 = vld [vmem:[%s4840_s1 + $0x68] ss:$16 sps:$4 sm:$0xff]  }
  0x19   : > { %431 = vmatprep.subr.bf16.mxu0 %v3398_v21  ;;  %474 = vmatprep.subr.bf16.mxu1 %v3400_v22  ;;  %v3444_v0 = vld [vmem:[%s4840_s1 + $0x84] ss:$16 sps:$4 sm:$0xff]   ;;  %v3447_v1 = vld [vmem:[%s4840_s1 + $0x8c] ss:$16 sps:$4 sm:$0xff]   ;;  %v3442_v3 = vld [vmem:[%s4840_s1 + $0x80] ss:$16 sps:$4 sm:$0xff]  }
  0x1a   : > { %v259_v51 = vsel %vm247_vm1, %v254_v48, %v258_v46  ;;  %v3445_v4 = vld [vmem:[%s4840_s1 + $0x88] ss:$16 sps:$4 sm:$0xff]   ;;  %v3450_v5 = vld [vmem:[%s4840_s1 + $0xa4] ss:$16 sps:$4 sm:$0xff]   ;;  %v3453_v6 = vld [vmem:[%s4840_s1 + $0xac] ss:$16 sps:$4 sm:$0xff]  }
  0x1b   : > { %v3448_v7 = vld [vmem:[%s4840_s1 + $0xa0] ss:$16 sps:$4 sm:$0xff]   ;;  %v3451_v8 = vld [vmem:[%s4840_s1 + $0xa8] ss:$16 sps:$4 sm:$0xff]   ;;  %v3456_v9 = vld [vmem:[%s4840_s1 + $0xc4] ss:$16 sps:$4 sm:$0xff]  }
  0x1c   : > { %432 = vmatpush1.bf16.msra.mxu0 %v3402_v23  ;;  %475 = vmatpush1.bf16.msra.mxu1 %v3403_v24  ;;  %v3459_v10 = vld [vmem:[%s4840_s1 + $0xcc] ss:$16 sps:$4 sm:$0xff]   ;;  %v3454_v11 = vld [vmem:[%s4840_s1 + $0xc0] ss:$16 sps:$4 sm:$0xff]   ;;  %v3457_v12 = vld [vmem:[%s4840_s1 + $0xc8] ss:$16 sps:$4 sm:$0xff]  }
  0x1d   : > { %433 = vmatprep.subr.bf16.mxu0 %v3404_v25  ;;  %476 = vmatprep.subr.bf16.mxu1 %v3406_v26  ;;  %v3462_v13 = vld [vmem:[%s4840_s1 + $0xe4] ss:$16 sps:$4 sm:$0xff]   ;;  %v3465_v14 = vld [vmem:[%s4840_s1 + $0xec] ss:$16 sps:$4 sm:$0xff]   ;;  %v3460_v15 = vld [vmem:[%s4840_s1 + $0xe0] ss:$16 sps:$4 sm:$0xff]  }
  0x1e   : > { %v3463_v16 = vld [vmem:[%s4840_s1 + $0xe8] ss:$16 sps:$4 sm:$0xff]   ;;  %v3468_v17 = vld [vmem:[%s4840_s1 + $0x204] ss:$16 sps:$4 sm:$0xff]   ;;  %v3471_v18 = vld [vmem:[%s4840_s1 + $0x20c] ss:$16 sps:$4 sm:$0xff]  }
  0x1f   : > { %v3466_v19 = vld [vmem:[%s4840_s1 + $0x200] ss:$16 sps:$4 sm:$0xff]   ;;  %v3469_v20 = vld [vmem:[%s4840_s1 + $0x208] ss:$16 sps:$4 sm:$0xff]   ;;  %v3474_v21 = vld [vmem:[%s4840_s1 + $0x224] ss:$16 sps:$4 sm:$0xff]  }
  0x20   : > { %434 = vmatpush1.bf16.msra.mxu0 %v3408_v27  ;;  %477 = vmatpush1.bf16.msra.mxu1 %v3409_v28  ;;  %v3477_v22 = vld [vmem:[%s4840_s1 + $0x22c] ss:$16 sps:$4 sm:$0xff]   ;;  %v3472_v23 = vld [vmem:[%s4840_s1 + $0x220] ss:$16 sps:$4 sm:$0xff]   ;;  %v3475_v24 = vld [vmem:[%s4840_s1 + $0x228] ss:$16 sps:$4 sm:$0xff]  }
  0x21   : > { %435 = vmatprep.subr.bf16.mxu0 %v3410_v29  ;;  %478 = vmatprep.subr.bf16.mxu1 %v3412_v33  ;;  %v3480_v25 = vld [vmem:[%s4840_s1 + $0x244] ss:$16 sps:$4 sm:$0xff]   ;;  %v3483_v26 = vld [vmem:[%s4840_s1 + $0x24c] ss:$16 sps:$4 sm:$0xff]   ;;  %v3478_v27 = vld [vmem:[%s4840_s1 + $0x240] ss:$16 sps:$4 sm:$0xff]  }
  0x22   : > { %v3481_v28 = vld [vmem:[%s4840_s1 + $0x248] ss:$16 sps:$4 sm:$0xff]   ;;  %v3486_v29 = vld [vmem:[%s4840_s1 + $0x264] ss:$16 sps:$4 sm:$0xff]   ;;  %v3489_v30 = vld [vmem:[%s4840_s1 + $0x26c] ss:$16 sps:$4 sm:$0xff]  }
  0x23   : > { %v3484_v33 = vld [vmem:[%s4840_s1 + $0x260] ss:$16 sps:$4 sm:$0xff]   ;;  %v3492_v35 = vld [vmem:[%s4840_s1 + $0x284] ss:$16 sps:$4 sm:$0xff]   ;;  %v3493_v38 = vld [vmem:[%s4840_s1 + $0x288] ss:$16 sps:$4 sm:$0xff]  }
  0x24   : > { %436 = vmatpush1.bf16.msra.mxu0 %v3414_v36  ;;  %479 = vmatpush1.bf16.msra.mxu1 %v3415_v40  ;;  %v3495_v36 = vld [vmem:[%s4840_s1 + $0x28c] ss:$16 sps:$4 sm:$0xff]   ;;  %v3490_v37 = vld [vmem:[%s4840_s1 + $0x280] ss:$16 sps:$4 sm:$0xff]   ;;  %v3498_v39 = vld [vmem:[%s4840_s1 + $0x2a4] ss:$16 sps:$4 sm:$0xff]  }
  0x25   : > { %668 = vmatprep.subr.bf16.mxu0 %v3418_v43  ;;  %711 = vmatprep.subr.bf16.mxu1 %v3421_v44  ;;  %v3501_v40 = vld [vmem:[%s4840_s1 + $0x2ac] ss:$16 sps:$4 sm:$0xff]   ;;  %v3496_v41 = vld [vmem:[%s4840_s1 + $0x2a0] ss:$16 sps:$4 sm:$0xff]   ;;  %v3499_v42 = vld [vmem:[%s4840_s1 + $0x2a8] ss:$16 sps:$4 sm:$0xff]  }
  0x26   : > { %v3504_v43 = vld [vmem:[%s4840_s1 + $0x2c4] ss:$16 sps:$4 sm:$0xff]   ;;  %v3507_v44 = vld [vmem:[%s4840_s1 + $0x2cc] ss:$16 sps:$4 sm:$0xff]   ;;  %v3502_v45 = vld [vmem:[%s4840_s1 + $0x2c0] ss:$16 sps:$4 sm:$0xff]  }
  0x27   : > { %454 = vmatmul.mubr.bf16.vlgmr.msra.gmra.mrb[0].mxu0 %v259_v51  ;;  %497 = vmatmul.mubr.bf16.vlgmr.msra.gmra.mrb[0].mxu1 %v259_v51  ;;  %v3505_v46 = vld [vmem:[%s4840_s1 + $0x2c8] ss:$16 sps:$4 sm:$0xff]   ;;  %v3510_v48 = vld [vmem:[%s4840_s1 + $0x2e4] ss:$16 sps:$4 sm:$0xff]   ;;  %vm2918_vm4 = vsmask.f32 256 }
  0x28   : > { %669 = vmatpush1.bf16.msra.mxu0 %v3416_v49  ;;  %712 = vmatpush1.bf16.msra.mxu1 %v3419_v50  ;;  %v3513_v49 = vld [vmem:[%s4840_s1 + $0x2ec] ss:$16 sps:$4 sm:$0xff]   ;;  %v3508_v50 = vld [vmem:[%s4840_s1 + $0x2e0] ss:$16 sps:$4 sm:$0xff]   ;;  %v3511_v51 = vld [vmem:[%s4840_s1 + $0x2e8] ss:$16 sps:$4 sm:$0xff]  }
  0x29   : > { %670 = vmatprep.subr.bf16.mxu0 %v3426_v52  ;;  %713 = vmatprep.subr.bf16.mxu1 %v3429_v53  ;;  %v3516_v52 = vld [vmem:[%s4840_s1 + $0x304] ss:$16 sps:$4 sm:$0xff]   ;;  %v3519_v53 = vld [vmem:[%s4840_s1 + $0x30c] ss:$16 sps:$4 sm:$0xff]   ;;  %vm2921_vm6 = vsmask.f32 1280  ;;  %vm4819_vm7 = vmand %vm2917_vm3, %vm2918_vm4 }
  0x2a   : > { %700 = vmatprep.mubr.bf16.mxu0 %v3815_v2  ;;  %743 = vmatprep.mubr.bf16.mxu1 %v3815_v2  ;;  %vm4823_vm8 = vmand %vm2920_vm5, %vm2921_vm6  ;;  %vm2924_vm9 = vcmask 1042434   ;;  %vm2925_vm10 = vsmask.f32 2304  ;;  %s2994_s11 = sshll.u32 %s4848_s13, 2  ;;  %vm2928_vm13 = vcmask 1043459  }
  0x2b   : > { %vm2923_vm11 = vmor %vm4823_vm8, %vm4819_vm7  ;;  %vm2929_vm14 = vsmask.f32 3328  ;;  %s168_s16 = scalar_lea.vmem %s4842_s3, %s2994_s11 }
  0x2c   : > { %671 = vmatpush1.bf16.msra.mxu0 %v3424_v54  ;;  %714 = vmatpush1.bf16.msra.mxu1 %v3427_v55  ;;  %v3514_v54 = vld [vmem:[%s4840_s1 + $0x300] ss:$16 sps:$4 sm:$0xff]   ;;  %v3517_v55 = vld [vmem:[%s4840_s1 + $0x308] ss:$16 sps:$4 sm:$0xff]   ;;  %vm2926_vm12 = vmand %vm2924_vm9, %vm2925_vm10 }
  0x2d   : > { %672 = vmatprep.subr.bf16.mxu0 %v3432_v56  ;;  %715 = vmatprep.subr.bf16.mxu1 %v3435_v57  ;;  %v3522_v56 = vld [vmem:[%s4840_s1 + $0x324] ss:$16 sps:$4 sm:$0xff]   ;;  %v3525_v57 = vld [vmem:[%s4840_s1 + $0x32c] ss:$16 sps:$4 sm:$0xff]   ;;  %vm2927_vm15 = vmor %vm2926_vm12, %vm2923_vm11 }
  0x30   : > { %673 = vmatpush1.bf16.msra.mxu0 %v3430_v58  ;;  %716 = vmatpush1.bf16.msra.mxu1 %v3433_v59  ;;  %v3520_v58 = vld [vmem:[%s4840_s1 + $0x320] ss:$16 sps:$4 sm:$0xff]   ;;  %v3523_v59 = vld [vmem:[%s4840_s1 + $0x328] ss:$16 sps:$4 sm:$0xff]  }
  0x31   : > { %674 = vmatprep.subr.bf16.mxu0 %v3438_v60  ;;  %717 = vmatprep.subr.bf16.mxu1 %v3441_v61  ;;  %v3528_v60 = vld [vmem:[%s4840_s1 + $0x344] ss:$16 sps:$4 sm:$0xff]   ;;  %v3526_v61 = vld [vmem:[%s4840_s1 + $0x340] ss:$16 sps:$4 sm:$0xff]  }
  0x34   : > { %675 = vmatpush1.bf16.msra.mxu0 %v3436_v62  ;;  %718 = vmatpush1.bf16.msra.mxu1 %v3439_v63  ;;  %v3529_v62 = vld [vmem:[%s4840_s1 + $0x348] ss:$16 sps:$4 sm:$0xff]   ;;  %v3534_v63 = vld [vmem:[%s4840_s1 + $0x364] ss:$16 sps:$4 sm:$0xff]  }
  0x35   : > { %676 = vmatprep.subr.bf16.mxu0 %v3444_v0  ;;  %719 = vmatprep.subr.bf16.mxu1 %v3447_v1  ;;  %v3537_v0 = vld [vmem:[%s4840_s1 + $0x36c] ss:$16 sps:$4 sm:$0xff]   ;;  %v3532_v1 = vld [vmem:[%s4840_s1 + $0x360] ss:$16 sps:$4 sm:$0xff]  }
  0x38   : > { %677 = vmatpush1.bf16.msra.mxu0 %v3442_v3  ;;  %720 = vmatpush1.bf16.msra.mxu1 %v3445_v4  ;;  %v3535_v3 = vld [vmem:[%s4840_s1 + $0x368] ss:$16 sps:$4 sm:$0xff]   ;;  %v3540_v4 = vld [vmem:[%s4840_s1 + $0x384] ss:$16 sps:$4 sm:$0xff]  }
  0x39   : > { %678 = vmatprep.subr.bf16.mxu0 %v3450_v5  ;;  %721 = vmatprep.subr.bf16.mxu1 %v3453_v6  ;;  %v3543_v5 = vld [vmem:[%s4840_s1 + $0x38c] ss:$16 sps:$4 sm:$0xff]   ;;  %v3538_v6 = vld [vmem:[%s4840_s1 + $0x380] ss:$16 sps:$4 sm:$0xff]  }
  0x3c   : > { %679 = vmatpush1.bf16.msra.mxu0 %v3448_v7  ;;  %722 = vmatpush1.bf16.msra.mxu1 %v3451_v8  ;;  %v3541_v7 = vld [vmem:[%s4840_s1 + $0x388] ss:$16 sps:$4 sm:$0xff]   ;;  %v3546_v8 = vld [vmem:[%s4840_s1 + $0x3a4] ss:$16 sps:$4 sm:$0xff]  }
  0x3d   : > { %680 = vmatprep.subr.bf16.mxu0 %v3456_v9  ;;  %723 = vmatprep.subr.bf16.mxu1 %v3459_v10  ;;  %v3549_v9 = vld [vmem:[%s4840_s1 + $0x3ac] ss:$16 sps:$4 sm:$0xff]   ;;  %v3544_v10 = vld [vmem:[%s4840_s1 + $0x3a0] ss:$16 sps:$4 sm:$0xff]  }
  0x40   : > { %681 = vmatpush1.bf16.msra.mxu0 %v3454_v11  ;;  %724 = vmatpush1.bf16.msra.mxu1 %v3457_v12  ;;  %v3547_v11 = vld [vmem:[%s4840_s1 + $0x3a8] ss:$16 sps:$4 sm:$0xff]   ;;  %v3552_v12 = vld [vmem:[%s4840_s1 + $0x3c4] ss:$16 sps:$4 sm:$0xff]  }
  0x41   : > { %682 = vmatprep.subr.bf16.mxu0 %v3462_v13  ;;  %725 = vmatprep.subr.bf16.mxu1 %v3465_v14  ;;  %v3555_v13 = vld [vmem:[%s4840_s1 + $0x3cc] ss:$16 sps:$4 sm:$0xff]   ;;  %v3550_v14 = vld [vmem:[%s4840_s1 + $0x3c0] ss:$16 sps:$4 sm:$0xff]  }
  0x44   : > { %683 = vmatpush1.bf16.msra.mxu0 %v3460_v15  ;;  %726 = vmatpush1.bf16.msra.mxu1 %v3463_v16  ;;  %v3553_v15 = vld [vmem:[%s4840_s1 + $0x3c8] ss:$16 sps:$4 sm:$0xff]   ;;  %v3558_v16 = vld [vmem:[%s4840_s1 + $0x3e4] ss:$16 sps:$4 sm:$0xff]  }
  0x45   : > { %951 = vmatprep.subr.bf16.mxu0 %v3468_v17  ;;  %994 = vmatprep.subr.bf16.mxu1 %v3471_v18  ;;  %v3561_v17 = vld [vmem:[%s4840_s1 + $0x3ec] ss:$16 sps:$4 sm:$0xff]   ;;  %v3556_v18 = vld [vmem:[%s4840_s1 + $0x3e0] ss:$16 sps:$4 sm:$0xff]  }
  0x47   : > { %701 = vmatmul.mubr.bf16.vlgmr.msra.gmra.mrb[0].mxu0 %v3957_v34  ;;  %744 = vmatmul.mubr.bf16.vlgmr.msra.gmra.mrb[0].mxu1 %v3957_v34  ;;  %v3487_v34 = vld [vmem:[%s4840_s1 + $0x268] ss:$16 sps:$4 sm:$0xff]  }
  0x48   : > { %952 = vmatpush1.bf16.msra.mxu0 %v3466_v19  ;;  %995 = vmatpush1.bf16.msra.mxu1 %v3469_v20  ;;  %v3559_v19 = vld [vmem:[%s4840_s1 + $0x3e8] ss:$16 sps:$4 sm:$0xff]   ;;  %v3564_v20 = vld [vmem:[%s4840_s1 + $0x404] ss:$16 sps:$4 sm:$0xff]  }
  0x49   : > { %953 = vmatprep.subr.bf16.mxu0 %v3474_v21  ;;  %996 = vmatprep.subr.bf16.mxu1 %v3477_v22  ;;  %v3567_v21 = vld [vmem:[%s4840_s1 + $0x40c] ss:$16 sps:$4 sm:$0xff]   ;;  %v3562_v22 = vld [vmem:[%s4840_s1 + $0x400] ss:$16 sps:$4 sm:$0xff]  }
  0x4a   : > { %983 = vmatprep.mubr.bf16.mxu0 %v3815_v2  ;;  %1026 = vmatprep.mubr.bf16.mxu1 %v3815_v2 }
  0x4c   : > { %954 = vmatpush1.bf16.msra.mxu0 %v3472_v23  ;;  %997 = vmatpush1.bf16.msra.mxu1 %v3475_v24  ;;  %v4283_v23 = vcombine.low %v3948_v31, %v3951_v32  ;;  %v3565_v24 = vld [vmem:[%s4840_s1 + $0x408] ss:$16 sps:$4 sm:$0xff]   ;;  %v3569_v31 = vld [vmem:[%s4840_s1 + $0x420] ss:$16 sps:$4 sm:$0xff]  }
  0x4d   : > { %955 = vmatprep.subr.bf16.mxu0 %v3480_v25  ;;  %998 = vmatprep.subr.bf16.mxu1 %v3483_v26  ;;  %v3571_v25 = vld [vmem:[%s4840_s1 + $0x424] ss:$16 sps:$4 sm:$0xff]   ;;  %v3574_v26 = vld [vmem:[%s4840_s1 + $0x42c] ss:$16 sps:$4 sm:$0xff]   ;;  %v3572_v32 = vld [vmem:[%s4840_s1 + $0x428] ss:$16 sps:$4 sm:$0xff]  }
  0x50   : > { %956 = vmatpush1.bf16.msra.mxu0 %v3478_v27  ;;  %999 = vmatpush1.bf16.msra.mxu1 %v3481_v28  ;;  %v3577_v27 = vld [vmem:[%s4840_s1 + $0x444] ss:$16 sps:$4 sm:$0xff]   ;;  %v3580_v28 = vld [vmem:[%s4840_s1 + $0x44c] ss:$16 sps:$4 sm:$0xff]  }
  0x51   : > { %957 = vmatprep.subr.bf16.mxu0 %v3486_v29  ;;  %1000 = vmatprep.subr.bf16.mxu1 %v3489_v30  ;;  %v3575_v29 = vld [vmem:[%s4840_s1 + $0x440] ss:$16 sps:$4 sm:$0xff]   ;;  %v3578_v30 = vld [vmem:[%s4840_s1 + $0x448] ss:$16 sps:$4 sm:$0xff]  }
  0x54   : > { %958 = vmatpush1.bf16.msra.mxu0 %v3484_v33  ;;  %1001 = vmatpush1.bf16.msra.mxu1 %v3487_v34  ;;  %v3583_v33 = vld [vmem:[%s4840_s1 + $0x464] ss:$16 sps:$4 sm:$0xff]   ;;  %v3586_v34 = vld [vmem:[%s4840_s1 + $0x46c] ss:$16 sps:$4 sm:$0xff]  }
  0x55   : > { %959 = vmatprep.subr.bf16.mxu0 %v3492_v35  ;;  %1002 = vmatprep.subr.bf16.mxu1 %v3495_v36  ;;  %v3581_v35 = vld [vmem:[%s4840_s1 + $0x460] ss:$16 sps:$4 sm:$0xff]   ;;  %v3584_v36 = vld [vmem:[%s4840_s1 + $0x468] ss:$16 sps:$4 sm:$0xff]  }
  0x58   : > { %960 = vmatpush1.bf16.msra.mxu0 %v3490_v37  ;;  %1003 = vmatpush1.bf16.msra.mxu1 %v3493_v38  ;;  %v3589_v37 = vld [vmem:[%s4840_s1 + $0x484] ss:$16 sps:$4 sm:$0xff]   ;;  %v3592_v38 = vld [vmem:[%s4840_s1 + $0x48c] ss:$16 sps:$4 sm:$0xff]  }
  0x59   : > { %961 = vmatprep.subr.bf16.mxu0 %v3498_v39  ;;  %1004 = vmatprep.subr.bf16.mxu1 %v3501_v40  ;;  %v3587_v39 = vld [vmem:[%s4840_s1 + $0x480] ss:$16 sps:$4 sm:$0xff]   ;;  %v3590_v40 = vld [vmem:[%s4840_s1 + $0x488] ss:$16 sps:$4 sm:$0xff]  }
  0x5c   : > { %962 = vmatpush1.bf16.msra.mxu0 %v3496_v41  ;;  %1005 = vmatpush1.bf16.msra.mxu1 %v3499_v42  ;;  %v3595_v41 = vld [vmem:[%s4840_s1 + $0x4a4] ss:$16 sps:$4 sm:$0xff]   ;;  %v3598_v42 = vld [vmem:[%s4840_s1 + $0x4ac] ss:$16 sps:$4 sm:$0xff]  }
  0x5d   : > { %963 = vmatprep.subr.bf16.mxu0 %v3504_v43  ;;  %1006 = vmatprep.subr.bf16.mxu1 %v3507_v44  ;;  %v4347_v43 = vld [vmem:[%s3935_s19 + $0xc] sm:$0xf]  ;;  %v3593_v44 = vld [vmem:[%s4840_s1 + $0x4a0] ss:$16 sps:$4 sm:$0xff]  }
  0x60   : > { %964 = vmatpush1.bf16.msra.mxu0 %v3502_v45  ;;  %1007 = vmatpush1.bf16.msra.mxu1 %v3505_v46  ;;  %v1371_v45 = vshll.u32 %v4283_v23, 16  ;;  %v3596_v46 = vld [vmem:[%s4840_s1 + $0x4a8] ss:$16 sps:$4 sm:$0xff]  }
  0x61   : > { %965 = vmatprep.subr.bf16.mxu0 %v3510_v48  ;;  %1008 = vmatprep.subr.bf16.mxu1 %v3513_v49  ;;  %v3601_v48 = vld [vmem:[%s4840_s1 + $0x4c4] ss:$16 sps:$4 sm:$0xff]   ;;  %v4361_v49 = vcombine.low %v4347_v43, %v4347_v43 }
  0x64   : > { %966 = vmatpush1.bf16.msra.mxu0 %v3508_v50  ;;  %1009 = vmatpush1.bf16.msra.mxu1 %v3511_v51  ;;  %v3604_v50 = vld [vmem:[%s4840_s1 + $0x4cc] ss:$16 sps:$4 sm:$0xff]   ;;  %v3599_v51 = vld [vmem:[%s4840_s1 + $0x4c0] ss:$16 sps:$4 sm:$0xff]  }
  0x65   : > { %1239 = vmatprep.subr.bf16.mxu0 %v3516_v52  ;;  %1282 = vmatprep.subr.bf16.mxu1 %v3519_v53  ;;  %v1369_v52 = vshrl.u32 %v4283_v23, 16  ;;  %v1373_v53 = vrot.slane %v1371_v45, 1  ;;  %v3672_v45 = vld [vmem:[%s4840_s1 + $0x640] ss:$16 sps:$4 sm:$0xff]  }
  0x67   : > { %984 = vmatmul.mubr.bf16.vlgmr.msra.gmra.mrb[0].mxu0 %v3977_v47  ;;  %1027 = vmatmul.mubr.bf16.vlgmr.msra.gmra.mrb[0].mxu1 %v3977_v47  ;;  %v3531_v47 = vld [vmem:[%s4840_s1 + $0x34c] ss:$16 sps:$4 sm:$0xff]  }
  0x68   : > { %1240 = vmatpush1.bf16.msra.mxu0 %v3514_v54  ;;  %1283 = vmatpush1.bf16.msra.mxu1 %v3517_v55  ;;  %v3602_v54 = vld [vmem:[%s4840_s1 + $0x4c8] ss:$16 sps:$4 sm:$0xff]   ;;  %v3607_v55 = vld [vmem:[%s4840_s1 + $0x4e4] ss:$16 sps:$4 sm:$0xff]  }
  0x69   : > { %1241 = vmatprep.subr.bf16.mxu0 %v3522_v56  ;;  %1284 = vmatprep.subr.bf16.mxu1 %v3525_v57  ;;  %v1376_v56 = vshll.u32 %v4361_v49, 16  ;;  %v3610_v57 = vld [vmem:[%s4840_s1 + $0x4ec] ss:$16 sps:$4 sm:$0xff]  }
  0x6a   : > { %1271 = vmatprep.mubr.bf16.mxu0 %v3815_v2  ;;  %1314 = vmatprep.mubr.bf16.mxu1 %v3815_v2 }
  0x6c   : > { %1242 = vmatpush1.bf16.msra.mxu0 %v3520_v58  ;;  %1285 = vmatpush1.bf16.msra.mxu1 %v3523_v59  ;;  %v3605_v58 = vld [vmem:[%s4840_s1 + $0x4e0] ss:$16 sps:$4 sm:$0xff]   ;;  %v3608_v59 = vld [vmem:[%s4840_s1 + $0x4e8] ss:$16 sps:$4 sm:$0xff]  }
  0x6d   : > { %1243 = vmatprep.subr.bf16.mxu0 %v3528_v60  ;;  %1286 = vmatprep.subr.bf16.mxu1 %v3531_v47  ;;  %v3613_v60 = vld [vmem:[%s4840_s1 + $0x504] ss:$16 sps:$4 sm:$0xff]   ;;  %v1374_v47 = vor.u32 %v1373_v53, %v1369_v52  ;;  %v3689_v53 = vld [vmem:[%s4840_s1 + $0x68c] ss:$16 sps:$4 sm:$0xff]  }
  0x6e   : > { %v3686_v52 = vld [vmem:[%s4840_s1 + $0x684] ss:$16 sps:$4 sm:$0xff]  }
  0x70   : > { %1244 = vmatpush1.bf16.msra.mxu0 %v3526_v61  ;;  %1287 = vmatpush1.bf16.msra.mxu1 %v3529_v62  ;;  %v1378_v61 = vrot.slane %v1376_v56, 1  ;;  %v3616_v62 = vld [vmem:[%s4840_s1 + $0x50c] ss:$16 sps:$4 sm:$0xff]   ;;  %v3692_v56 = vld [vmem:[%s4840_s1 + $0x6a4] ss:$16 sps:$4 sm:$0xff]  }
  0x71   : > { %1245 = vmatprep.subr.bf16.mxu0 %v3534_v63  ;;  %1288 = vmatprep.subr.bf16.mxu1 %v3537_v0  ;;  %v3611_v63 = vld [vmem:[%s4840_s1 + $0x500] ss:$16 sps:$4 sm:$0xff]   ;;  %v3614_v0 = vld [vmem:[%s4840_s1 + $0x508] ss:$16 sps:$4 sm:$0xff]  }
  0x74   : > { %1246 = vmatpush1.bf16.msra.mxu0 %v3532_v1  ;;  %1289 = vmatpush1.bf16.msra.mxu1 %v3535_v3  ;;  %v1379_v1 = vsel %vm247_vm1, %v1374_v47, %v1378_v61  ;;  %v3620_v3 = vld [vmem:[%s4840_s1 + $0x524] ss:$16 sps:$4 sm:$0xff]   ;;  %v3701_v47 = vld [vmem:[%s4840_s1 + $0x6cc] ss:$16 sps:$4 sm:$0xff]   ;;  %v3696_v61 = vld [vmem:[%s4840_s1 + $0x6c0] ss:$16 sps:$4 sm:$0xff]  }
  0x75   : > { %1247 = vmatprep.subr.bf16.mxu0 %v3540_v4  ;;  %1290 = vmatprep.subr.bf16.mxu1 %v3543_v5  ;;  %v3623_v4 = vld [vmem:[%s4840_s1 + $0x52c] ss:$16 sps:$4 sm:$0xff]   ;;  %v3618_v5 = vld [vmem:[%s4840_s1 + $0x520] ss:$16 sps:$4 sm:$0xff]  }
  0x78   : > { %1248 = vmatpush1.bf16.msra.mxu0 %v3538_v6  ;;  %1291 = vmatpush1.bf16.msra.mxu1 %v3541_v7  ;;  %v3621_v6 = vld [vmem:[%s4840_s1 + $0x528] ss:$16 sps:$4 sm:$0xff]   ;;  %v3626_v7 = vld [vmem:[%s4840_s1 + $0x544] ss:$16 sps:$4 sm:$0xff]  }
  0x79   : > { %1249 = vmatprep.subr.bf16.mxu0 %v3546_v8  ;;  %1292 = vmatprep.subr.bf16.mxu1 %v3549_v9  ;;  %v3629_v8 = vld [vmem:[%s4840_s1 + $0x54c] ss:$16 sps:$4 sm:$0xff]   ;;  %v3624_v9 = vld [vmem:[%s4840_s1 + $0x540] ss:$16 sps:$4 sm:$0xff]  }
  0x7c   : > { %1250 = vmatpush1.bf16.msra.mxu0 %v3544_v10  ;;  %1293 = vmatpush1.bf16.msra.mxu1 %v3547_v11  ;;  %v3627_v10 = vld [vmem:[%s4840_s1 + $0x548] ss:$16 sps:$4 sm:$0xff]   ;;  %v3632_v11 = vld [vmem:[%s4840_s1 + $0x564] ss:$16 sps:$4 sm:$0xff]  }
  0x7d   : > { %1251 = vmatprep.subr.bf16.mxu0 %v3552_v12  ;;  %1294 = vmatprep.subr.bf16.mxu1 %v3555_v13  ;;  %v3635_v12 = vld [vmem:[%s4840_s1 + $0x56c] ss:$16 sps:$4 sm:$0xff]   ;;  %v3630_v13 = vld [vmem:[%s4840_s1 + $0x560] ss:$16 sps:$4 sm:$0xff]  }
  0x80   : > { %1252 = vmatpush1.bf16.msra.mxu0 %v3550_v14  ;;  %1295 = vmatpush1.bf16.msra.mxu1 %v3553_v15  ;;  %v3633_v14 = vld [vmem:[%s4840_s1 + $0x568] ss:$16 sps:$4 sm:$0xff]   ;;  %v3638_v15 = vld [vmem:[%s4840_s1 + $0x584] ss:$16 sps:$4 sm:$0xff]  }
  0x81   : > { %1253 = vmatprep.subr.bf16.mxu0 %v3558_v16  ;;  %1296 = vmatprep.subr.bf16.mxu1 %v3561_v17  ;;  %v3641_v16 = vld [vmem:[%s4840_s1 + $0x58c] ss:$16 sps:$4 sm:$0xff]   ;;  %v3636_v17 = vld [vmem:[%s4840_s1 + $0x580] ss:$16 sps:$4 sm:$0xff]  }
  0x84   : > { %1254 = vmatpush1.bf16.msra.mxu0 %v3556_v18  ;;  %1297 = vmatpush1.bf16.msra.mxu1 %v3559_v19  ;;  %v3639_v18 = vld [vmem:[%s4840_s1 + $0x588] ss:$16 sps:$4 sm:$0xff]   ;;  %v3644_v19 = vld [vmem:[%s4840_s1 + $0x5a4] ss:$16 sps:$4 sm:$0xff]  }
  0x85   : > { %1541 = vmatprep.subr.bf16.mxu0 %v3564_v20  ;;  %1584 = vmatprep.subr.bf16.mxu1 %v3567_v21  ;;  %v3647_v20 = vld [vmem:[%s4840_s1 + $0x5ac] ss:$16 sps:$4 sm:$0xff]   ;;  %v3642_v21 = vld [vmem:[%s4840_s1 + $0x5a0] ss:$16 sps:$4 sm:$0xff]  }
  0x87   : > { %1272 = vmatmul.mubr.bf16.vlgmr.msra.gmra.mrb[0].mxu0 %v4283_v23  ;;  %1315 = vmatmul.mubr.bf16.vlgmr.msra.gmra.mrb[0].mxu1 %v4283_v23 }
  0x88   : > { %1542 = vmatpush1.bf16.msra.mxu0 %v3562_v22  ;;  %1585 = vmatpush1.bf16.msra.mxu1 %v3565_v24  ;;  %v3645_v22 = vld [vmem:[%s4840_s1 + $0x5a8] ss:$16 sps:$4 sm:$0xff]   ;;  %v3650_v24 = vld [vmem:[%s4840_s1 + $0x5c4] ss:$16 sps:$4 sm:$0xff]  }
  0x89   : > { %1543 = vmatprep.subr.bf16.mxu0 %v3571_v25  ;;  %1586 = vmatprep.subr.bf16.mxu1 %v3574_v26  ;;  %v3653_v25 = vld [vmem:[%s4840_s1 + $0x5cc] ss:$16 sps:$4 sm:$0xff]   ;;  %v3648_v26 = vld [vmem:[%s4840_s1 + $0x5c0] ss:$16 sps:$4 sm:$0xff]  }
  0x8a   : > { %1573 = vmatprep.mubr.bf16.mxu0 %v3815_v2  ;;  %1616 = vmatprep.mubr.bf16.mxu1 %v3815_v2 }
  0x8c   : > { %1544 = vmatpush1.bf16.msra.mxu0 %v3569_v31  ;;  %1587 = vmatpush1.bf16.msra.mxu1 %v3572_v32  ;;  %v3651_v31 = vld [vmem:[%s4840_s1 + $0x5c8] ss:$16 sps:$4 sm:$0xff]   ;;  %v3656_v32 = vld [vmem:[%s4840_s1 + $0x5e4] ss:$16 sps:$4 sm:$0xff]  }
  0x8d   : > { %1545 = vmatprep.subr.bf16.mxu0 %v3577_v27  ;;  %1588 = vmatprep.subr.bf16.mxu1 %v3580_v28  ;;  %v3659_v27 = vld [vmem:[%s4840_s1 + $0x5ec] ss:$16 sps:$4 sm:$0xff]   ;;  %v3654_v28 = vld [vmem:[%s4840_s1 + $0x5e0] ss:$16 sps:$4 sm:$0xff]  }
  0x90   : > { %1546 = vmatpush1.bf16.msra.mxu0 %v3575_v29  ;;  %1589 = vmatpush1.bf16.msra.mxu1 %v3578_v30  ;;  %v3657_v29 = vld [vmem:[%s4840_s1 + $0x5e8] ss:$16 sps:$4 sm:$0xff]   ;;  %v1667_v30 = vrot.slane %v4283_v23, 1 }
  0x91   : > { %1547 = vmatprep.subr.bf16.mxu0 %v3583_v33  ;;  %1590 = vmatprep.subr.bf16.mxu1 %v3586_v34  ;;  %v1668_v33 = vrot.slane %v4361_v49, 1  ;;  %v3662_v34 = vld [vmem:[%s4840_s1 + $0x604] ss:$16 sps:$4 sm:$0xff]   ;;  %v3663_v23 = vld [vmem:[%s4840_s1 + $0x608] ss:$16 sps:$4 sm:$0xff]  }
  0x92   : > { %v3683_v49 = vld [vmem:[%s4840_s1 + $0x66c] ss:$16 sps:$4 sm:$0xff]  }
  0x94   : > { %1548 = vmatpush1.bf16.msra.mxu0 %v3581_v35  ;;  %1591 = vmatpush1.bf16.msra.mxu1 %v3584_v36  ;;  %v3665_v35 = vld [vmem:[%s4840_s1 + $0x60c] ss:$16 sps:$4 sm:$0xff]   ;;  %v3660_v36 = vld [vmem:[%s4840_s1 + $0x600] ss:$16 sps:$4 sm:$0xff]  }
  0x95   : > { %1549 = vmatprep.subr.bf16.mxu0 %v3589_v37  ;;  %1592 = vmatprep.subr.bf16.mxu1 %v3592_v38  ;;  %v1669_v37 = vsel %vm786_vm0, %v1667_v30, %v1668_v33  ;;  %v3668_v38 = vld [vmem:[%s4840_s1 + $0x624] ss:$16 sps:$4 sm:$0xff]   ;;  %v3750_v33 = vld [vmem:[%s4840_s1 + $0x7cc] ss:$16 sps:$4 sm:$0xff]  }
  0x96   : > { %v3747_v30 = vld [vmem:[%s4840_s1 + $0x7c4] ss:$16 sps:$4 sm:$0xff]  }
  0x98   : > { %1550 = vmatpush1.bf16.msra.mxu0 %v3587_v39  ;;  %1593 = vmatpush1.bf16.msra.mxu1 %v3590_v40  ;;  %v3671_v39 = vld [vmem:[%s4840_s1 + $0x62c] ss:$16 sps:$4 sm:$0xff]   ;;  %v3666_v40 = vld [vmem:[%s4840_s1 + $0x620] ss:$16 sps:$4 sm:$0xff]  }
  0x99   : > { %1551 = vmatprep.subr.bf16.mxu0 %v3595_v41  ;;  %1594 = vmatprep.subr.bf16.mxu1 %v3598_v42  ;;  %v3669_v41 = vld [vmem:[%s4840_s1 + $0x628] ss:$16 sps:$4 sm:$0xff]   ;;  %v3674_v42 = vld [vmem:[%s4840_s1 + $0x644] ss:$16 sps:$4 sm:$0xff]  }
  0x9c   : > { %1552 = vmatpush1.bf16.msra.mxu0 %v3593_v44  ;;  %1595 = vmatpush1.bf16.msra.mxu1 %v3596_v46  ;;  %v3677_v44 = vld [vmem:[%s4840_s1 + $0x64c] ss:$16 sps:$4 sm:$0xff]   ;;  %v3675_v46 = vld [vmem:[%s4840_s1 + $0x648] ss:$16 sps:$4 sm:$0xff]  }
  0x9d   : > { %1553 = vmatprep.subr.bf16.mxu0 %v3601_v48  ;;  %1596 = vmatprep.subr.bf16.mxu1 %v3604_v50  ;;  %v3680_v48 = vld [vmem:[%s4840_s1 + $0x664] ss:$16 sps:$4 sm:$0xff]   ;;  %v3678_v50 = vld [vmem:[%s4840_s1 + $0x660] ss:$16 sps:$4 sm:$0xff]  }
  0xa0   : > { %1554 = vmatpush1.bf16.msra.mxu0 %v3599_v51  ;;  %1597 = vmatpush1.bf16.msra.mxu1 %v3602_v54  ;;  %v3681_v51 = vld [vmem:[%s4840_s1 + $0x668] ss:$16 sps:$4 sm:$0xff]   ;;  %v3684_v54 = vld [vmem:[%s4840_s1 + $0x680] ss:$16 sps:$4 sm:$0xff]  }
  0xa1   : > { %1555 = vmatprep.subr.bf16.mxu0 %v3607_v55  ;;  %1598 = vmatprep.subr.bf16.mxu1 %v3610_v57  ;;  %v3687_v55 = vld [vmem:[%s4840_s1 + $0x688] ss:$16 sps:$4 sm:$0xff]   ;;  %v3695_v57 = vld [vmem:[%s4840_s1 + $0x6ac] ss:$16 sps:$4 sm:$0xff]  }
  0xa4   : > { %1556 = vmatpush1.bf16.msra.mxu0 %v3605_v58  ;;  %1599 = vmatpush1.bf16.msra.mxu1 %v3608_v59  ;;  %v3690_v58 = vld [vmem:[%s4840_s1 + $0x6a0] ss:$16 sps:$4 sm:$0xff]   ;;  %v3693_v59 = vld [vmem:[%s4840_s1 + $0x6a8] ss:$16 sps:$4 sm:$0xff]  }
  0xa5   : > { %1831 = vmatprep.subr.bf16.mxu0 %v3613_v60  ;;  %1874 = vmatprep.subr.bf16.mxu1 %v3616_v62  ;;  %v3698_v60 = vld [vmem:[%s4840_s1 + $0x6c4] ss:$16 sps:$4 sm:$0xff]   ;;  %v3699_v62 = vld [vmem:[%s4840_s1 + $0x6c8] ss:$16 sps:$4 sm:$0xff]  }
  0xa7   : > { %1574 = vmatmul.mubr.bf16.vlgmr.msra.gmra.mrb[0].mxu0 %v1379_v1  ;;  %1617 = vmatmul.mubr.bf16.vlgmr.msra.gmra.mrb[0].mxu1 %v1379_v1  ;;  %v3702_v1 = vld [vmem:[%s4840_s1 + $0x6e0] ss:$16 sps:$4 sm:$0xff]  }
  0xa8   : > { %1832 = vmatpush1.bf16.msra.mxu0 %v3611_v63  ;;  %1875 = vmatpush1.bf16.msra.mxu1 %v3614_v0  ;;  %v3704_v63 = vld [vmem:[%s4840_s1 + $0x6e4] ss:$16 sps:$4 sm:$0xff]   ;;  %v3707_v0 = vld [vmem:[%s4840_s1 + $0x6ec] ss:$16 sps:$4 sm:$0xff]  }
  0xa9   : > { %1833 = vmatprep.subr.bf16.mxu0 %v3620_v3  ;;  %1876 = vmatprep.subr.bf16.mxu1 %v3623_v4  ;;  %v3705_v3 = vld [vmem:[%s4840_s1 + $0x6e8] ss:$16 sps:$4 sm:$0xff]   ;;  %v3710_v4 = vld [vmem:[%s4840_s1 + $0x704] ss:$16 sps:$4 sm:$0xff]  }
  0xaa   : > { %1863 = vmatprep.mubr.bf16.mxu0 %v3815_v2  ;;  %1906 = vmatprep.mubr.bf16.mxu1 %v3815_v2 }
  0xac   : > { %1834 = vmatpush1.bf16.msra.mxu0 %v3618_v5  ;;  %1877 = vmatpush1.bf16.msra.mxu1 %v3621_v6  ;;  %v3713_v5 = vld [vmem:[%s4840_s1 + $0x70c] ss:$16 sps:$4 sm:$0xff]   ;;  %v3806_v6 = vld [vmem:[%s3935_s19 + $0x8] sm:$0xf] }
  0xad   : > { %1835 = vmatprep.subr.bf16.mxu0 %v3626_v7  ;;  %1878 = vmatprep.subr.bf16.mxu1 %v3629_v8  ;;  %v4594_v7 = vcombine.low %v3806_v6, %v4347_v43  ;;  %v3708_v8 = vld [vmem:[%s4840_s1 + $0x700] ss:$16 sps:$4 sm:$0xff]   ;;  %v3720_v43 = vld [vmem:[%s4840_s1 + $0x72c] ss:$16 sps:$4 sm:$0xff]   ;;  %v3796_v6 = vld [vmem:[%s4840_s1 + $0x8c4] ss:$16 sps:$4 sm:$0xff]  }
  0xb0   : > { %1836 = vmatpush1.bf16.msra.mxu0 %v3624_v9  ;;  %1879 = vmatpush1.bf16.msra.mxu1 %v3627_v10  ;;  %v3711_v9 = vld [vmem:[%s4840_s1 + $0x708] ss:$16 sps:$4 sm:$0xff]   ;;  %v3717_v10 = vld [vmem:[%s4840_s1 + $0x724] ss:$16 sps:$4 sm:$0xff]  }
  0xb1   : > { %1837 = vmatprep.subr.bf16.mxu0 %v3632_v11  ;;  %1880 = vmatprep.subr.bf16.mxu1 %v3635_v12  ;;  %v3715_v11 = vld [vmem:[%s4840_s1 + $0x720] ss:$16 sps:$4 sm:$0xff]   ;;  %v3718_v12 = vld [vmem:[%s4840_s1 + $0x728] ss:$16 sps:$4 sm:$0xff]  }
  0xb4   : > { %1838 = vmatpush1.bf16.msra.mxu0 %v3630_v13  ;;  %1881 = vmatpush1.bf16.msra.mxu1 %v3633_v14  ;;  %v3723_v13 = vld [vmem:[%s4840_s1 + $0x744] ss:$16 sps:$4 sm:$0xff]   ;;  %v3726_v14 = vld [vmem:[%s4840_s1 + $0x74c] ss:$16 sps:$4 sm:$0xff]  }
  0xb5   : > { %1839 = vmatprep.subr.bf16.mxu0 %v3638_v15  ;;  %1882 = vmatprep.subr.bf16.mxu1 %v3641_v16  ;;  %v3721_v15 = vld [vmem:[%s4840_s1 + $0x740] ss:$16 sps:$4 sm:$0xff]   ;;  %v3724_v16 = vld [vmem:[%s4840_s1 + $0x748] ss:$16 sps:$4 sm:$0xff]  }
  0xb8   : > { %1840 = vmatpush1.bf16.msra.mxu0 %v3636_v17  ;;  %1883 = vmatpush1.bf16.msra.mxu1 %v3639_v18  ;;  %v3729_v17 = vld [vmem:[%s4840_s1 + $0x764] ss:$16 sps:$4 sm:$0xff]   ;;  %v3732_v18 = vld [vmem:[%s4840_s1 + $0x76c] ss:$16 sps:$4 sm:$0xff]  }
  0xb9   : > { %1841 = vmatprep.subr.bf16.mxu0 %v3644_v19  ;;  %1884 = vmatprep.subr.bf16.mxu1 %v3647_v20  ;;  %v3727_v19 = vld [vmem:[%s4840_s1 + $0x760] ss:$16 sps:$4 sm:$0xff]   ;;  %v3730_v20 = vld [vmem:[%s4840_s1 + $0x768] ss:$16 sps:$4 sm:$0xff]  }
  0xbc   : > { %1842 = vmatpush1.bf16.msra.mxu0 %v3642_v21  ;;  %1885 = vmatpush1.bf16.msra.mxu1 %v3645_v22  ;;  %v3735_v21 = vld [vmem:[%s4840_s1 + $0x784] ss:$16 sps:$4 sm:$0xff]   ;;  %v3738_v22 = vld [vmem:[%s4840_s1 + $0x78c] ss:$16 sps:$4 sm:$0xff]  }
  0xbd   : > { %1843 = vmatprep.subr.bf16.mxu0 %v3650_v24  ;;  %1886 = vmatprep.subr.bf16.mxu1 %v3653_v25  ;;  %v3733_v24 = vld [vmem:[%s4840_s1 + $0x780] ss:$16 sps:$4 sm:$0xff]   ;;  %v3736_v25 = vld [vmem:[%s4840_s1 + $0x788] ss:$16 sps:$4 sm:$0xff]  }
  0xc0   : > { %1844 = vmatpush1.bf16.msra.mxu0 %v3648_v26  ;;  %1887 = vmatpush1.bf16.msra.mxu1 %v3651_v31  ;;  %v3741_v26 = vld [vmem:[%s4840_s1 + $0x7a4] ss:$16 sps:$4 sm:$0xff]   ;;  %v3744_v31 = vld [vmem:[%s4840_s1 + $0x7ac] ss:$16 sps:$4 sm:$0xff]  }
  0xc1   : > { %1845 = vmatprep.subr.bf16.mxu0 %v3656_v32  ;;  %1888 = vmatprep.subr.bf16.mxu1 %v3659_v27  ;;  %v2251_v32 = vshll.u32 %v4594_v7, 16  ;;  %v3739_v27 = vld [vmem:[%s4840_s1 + $0x7a0] ss:$16 sps:$4 sm:$0xff]  }
  0xc4   : > { %1846 = vmatpush1.bf16.msra.mxu0 %v3654_v28  ;;  %1889 = vmatpush1.bf16.msra.mxu1 %v3657_v29  ;;  %v3742_v28 = vld [vmem:[%s4840_s1 + $0x7a8] ss:$16 sps:$4 sm:$0xff]   ;;  %v4668_v29 = vld [vmem:[%s3935_s19 + $0x10] ss:$0 sps:$4 sm:$0xff]  }
  0xc5   : > { %2119 = vmatprep.subr.bf16.mxu0 %v3662_v34  ;;  %2162 = vmatprep.subr.bf16.mxu1 %v3665_v35  ;;  %v2249_v34 = vshrl.u32 %v4594_v7, 16  ;;  %v3745_v35 = vld [vmem:[%s4840_s1 + $0x7c0] ss:$16 sps:$4 sm:$0xff]  }
  0xc7   : > { %1864 = vmatmul.mubr.bf16.vlgmr.msra.gmra.mrb[0].mxu0 %v1669_v37  ;;  %1907 = vmatmul.mubr.bf16.vlgmr.msra.gmra.mrb[0].mxu1 %v1669_v37  ;;  %v2256_v37 = vshll.u32 %v4668_v29, 16 }
  0xc8   : > { %2120 = vmatpush1.bf16.msra.mxu0 %v3660_v36  ;;  %2163 = vmatpush1.bf16.msra.mxu1 %v3663_v23  ;;  %v3748_v36 = vld [vmem:[%s4840_s1 + $0x7c8] ss:$16 sps:$4 sm:$0xff]   ;;  %v2253_v23 = vrot.slane %v2251_v32, 1 }
  0xc9   : > { %2121 = vmatprep.subr.bf16.mxu0 %v3668_v38  ;;  %2164 = vmatprep.subr.bf16.mxu1 %v3671_v39  ;;  %v3753_v38 = vld [vmem:[%s4840_s1 + $0x7e4] ss:$16 sps:$4 sm:$0xff]   ;;  %v3756_v39 = vld [vmem:[%s4840_s1 + $0x7ec] ss:$16 sps:$4 sm:$0xff]  }
  0xca   : > { %2151 = vmatprep.mubr.bf16.mxu0 %v3815_v2  ;;  %2194 = vmatprep.mubr.bf16.mxu1 %v3815_v2 }
  0xcc   : > { %2122 = vmatpush1.bf16.msra.mxu0 %v3666_v40  ;;  %2165 = vmatpush1.bf16.msra.mxu1 %v3669_v41  ;;  %v3751_v40 = vld [vmem:[%s4840_s1 + $0x7e0] ss:$16 sps:$4 sm:$0xff]   ;;  %v3754_v41 = vld [vmem:[%s4840_s1 + $0x7e8] ss:$16 sps:$4 sm:$0xff]  }
  0xcd   : > { %2123 = vmatprep.subr.bf16.mxu0 %v3674_v42  ;;  %2166 = vmatprep.subr.bf16.mxu1 %v3677_v44  ;;  %v2254_v42 = vor.u32 %v2253_v23, %v2249_v34  ;;  %v2258_v44 = vrot.slane %v2256_v37, 1 }
  0xd0   : > { %2124 = vmatpush1.bf16.msra.mxu0 %v3672_v45  ;;  %2167 = vmatpush1.bf16.msra.mxu1 %v3675_v46  ;;  %v3759_v45 = vld [vmem:[%s4840_s1 + $0x804] ss:$16 sps:$4 sm:$0xff]   ;;  %v3762_v46 = vld [vmem:[%s4840_s1 + $0x80c] ss:$16 sps:$4 sm:$0xff]  }
  0xd1   : > { %2125 = vmatprep.subr.bf16.mxu0 %v3680_v48  ;;  %2168 = vmatprep.subr.bf16.mxu1 %v3683_v49  ;;  %v3757_v48 = vld [vmem:[%s4840_s1 + $0x800] ss:$16 sps:$4 sm:$0xff]   ;;  %v3760_v49 = vld [vmem:[%s4840_s1 + $0x808] ss:$16 sps:$4 sm:$0xff]  }
  0xd4   : > { %2126 = vmatpush1.bf16.msra.mxu0 %v3678_v50  ;;  %2169 = vmatpush1.bf16.msra.mxu1 %v3681_v51  ;;  %v2259_v50 = vsel %vm247_vm1, %v2254_v42, %v2258_v44  ;;  %v3766_v51 = vld [vmem:[%s4840_s1 + $0x824] ss:$16 sps:$4 sm:$0xff]  }
  0xd5   : > { %2127 = vmatprep.subr.bf16.mxu0 %v3686_v52  ;;  %2170 = vmatprep.subr.bf16.mxu1 %v3689_v53  ;;  %v3769_v52 = vld [vmem:[%s4840_s1 + $0x82c] ss:$16 sps:$4 sm:$0xff]   ;;  %v3764_v53 = vld [vmem:[%s4840_s1 + $0x820] ss:$16 sps:$4 sm:$0xff]  }
  0xd8   : > { %2128 = vmatpush1.bf16.msra.mxu0 %v3684_v54  ;;  %2171 = vmatpush1.bf16.msra.mxu1 %v3687_v55  ;;  %v3767_v54 = vld [vmem:[%s4840_s1 + $0x828] ss:$16 sps:$4 sm:$0xff]   ;;  %v3772_v55 = vld [vmem:[%s4840_s1 + $0x844] ss:$16 sps:$4 sm:$0xff]  }
  0xd9   : > { %2129 = vmatprep.subr.bf16.mxu0 %v3692_v56  ;;  %2172 = vmatprep.subr.bf16.mxu1 %v3695_v57  ;;  %v3775_v56 = vld [vmem:[%s4840_s1 + $0x84c] ss:$16 sps:$4 sm:$0xff]   ;;  %v3770_v57 = vld [vmem:[%s4840_s1 + $0x840] ss:$16 sps:$4 sm:$0xff]  }
  0xdc   : > { %2130 = vmatpush1.bf16.msra.mxu0 %v3690_v58  ;;  %2173 = vmatpush1.bf16.msra.mxu1 %v3693_v59  ;;  %v3773_v58 = vld [vmem:[%s4840_s1 + $0x848] ss:$16 sps:$4 sm:$0xff]   ;;  %v3778_v59 = vld [vmem:[%s4840_s1 + $0x864] ss:$16 sps:$4 sm:$0xff]  }
  0xdd   : > { %2131 = vmatprep.subr.bf16.mxu0 %v3698_v60  ;;  %2174 = vmatprep.subr.bf16.mxu1 %v3701_v47  ;;  %v3776_v60 = vld [vmem:[%s4840_s1 + $0x860] ss:$16 sps:$4 sm:$0xff]   ;;  %v3779_v47 = vld [vmem:[%s4840_s1 + $0x868] ss:$16 sps:$4 sm:$0xff]  }
  0xe0   : > { %2132 = vmatpush1.bf16.msra.mxu0 %v3696_v61  ;;  %2175 = vmatpush1.bf16.msra.mxu1 %v3699_v62  ;;  %v3784_v61 = vld [vmem:[%s4840_s1 + $0x884] ss:$16 sps:$4 sm:$0xff]   ;;  %v3787_v62 = vld [vmem:[%s4840_s1 + $0x88c] ss:$16 sps:$4 sm:$0xff]  }
  0xe1   : > { %2133 = vmatprep.subr.bf16.mxu0 %v3704_v63  ;;  %2176 = vmatprep.subr.bf16.mxu1 %v3707_v0  ;;  %v3782_v63 = vld [vmem:[%s4840_s1 + $0x880] ss:$16 sps:$4 sm:$0xff]   ;;  %v3785_v0 = vld [vmem:[%s4840_s1 + $0x888] ss:$16 sps:$4 sm:$0xff]  }
  0xe4   : > { %2134 = vmatpush1.bf16.msra.mxu0 %v3702_v1  ;;  %2177 = vmatpush1.bf16.msra.mxu1 %v3705_v3  ;;  %v3790_v1 = vld [vmem:[%s4840_s1 + $0x8a4] ss:$16 sps:$4 sm:$0xff]   ;;  %v3793_v3 = vld [vmem:[%s4840_s1 + $0x8ac] ss:$16 sps:$4 sm:$0xff]  }
  0xe5   : > { %2421 = vmatprep.subr.bf16.mxu0 %v3710_v4  ;;  %2464 = vmatprep.subr.bf16.mxu1 %v3713_v5  ;;  %v3788_v4 = vld [vmem:[%s4840_s1 + $0x8a0] ss:$16 sps:$4 sm:$0xff]   ;;  %v3791_v5 = vld [vmem:[%s4840_s1 + $0x8a8] ss:$16 sps:$4 sm:$0xff]  }
  0xe7   : > { %2152 = vmatmul.mubr.bf16.vlgmr.msra.gmra.mrb[0].mxu0 %v4594_v7  ;;  %2195 = vmatmul.mubr.bf16.vlgmr.msra.gmra.mrb[0].mxu1 %v4594_v7 }
  0xe8   : > { %2422 = vmatpush1.bf16.msra.mxu0 %v3708_v8  ;;  %2465 = vmatpush1.bf16.msra.mxu1 %v3711_v9  ;;  %v3799_v8 = vld [vmem:[%s4840_s1 + $0x8cc] ss:$16 sps:$4 sm:$0xff]   ;;  %v3794_v9 = vld [vmem:[%s4840_s1 + $0x8c0] ss:$16 sps:$4 sm:$0xff]  }
  0xe9   : > { %2423 = vmatprep.subr.bf16.mxu0 %v3717_v10  ;;  %2466 = vmatprep.subr.bf16.mxu1 %v3720_v43  ;;  %v3797_v10 = vld [vmem:[%s4840_s1 + $0x8c8] ss:$16 sps:$4 sm:$0xff]   ;;  %v3802_v43 = vld [vmem:[%s4840_s1 + $0x8e4] ss:$16 sps:$4 sm:$0xff]  }
  0xea   : > { %2453 = vmatprep.mubr.bf16.mxu0 %v3815_v2  ;;  %2496 = vmatprep.mubr.bf16.mxu1 %v3815_v2 }
  0xec   : > { %2424 = vmatpush1.bf16.msra.mxu0 %v3715_v11  ;;  %2467 = vmatpush1.bf16.msra.mxu1 %v3718_v12  ;;  %v3805_v11 = vld [vmem:[%s4840_s1 + $0x8ec] ss:$16 sps:$4 sm:$0xff]   ;;  %v3800_v12 = vld [vmem:[%s4840_s1 + $0x8e0] ss:$16 sps:$4 sm:$0xff]  }
  0xed   : > { %2425 = vmatprep.subr.bf16.mxu0 %v3723_v13  ;;  %2468 = vmatprep.subr.bf16.mxu1 %v3726_v14  ;;  %v3803_v13 = vld [vmem:[%s4840_s1 + $0x8e8] ss:$16 sps:$4 sm:$0xff]   ;;  %v2547_v14 = vrot.slane %v4594_v7, 1  ;;  %v2805_v7 = vld [vmem:[%s4841_s2] sm:$0xf] }
  0xf0   : > { %2426 = vmatpush1.bf16.msra.mxu0 %v3721_v15  ;;  %2469 = vmatpush1.bf16.msra.mxu1 %v3724_v16  ;;  %v2548_v15 = vrot.slane %v4668_v29, 1 }
  0xf1   : > { %2427 = vmatprep.subr.bf16.mxu0 %v3729_v17  ;;  %2470 = vmatprep.subr.bf16.mxu1 %v3732_v18  ;;  %v2807_v17 = vlaneseq }
  0xf2   : > { %v2549_v16 = vsel %vm786_vm0, %v2547_v14, %v2548_v15  ;;  %vm2930_vm0 = vmand %vm2928_vm13, %vm2929_vm14 }
  0xf3   : > { %v4798_v18 = vshrl.u32 %v2807_v17, 7  ;;  %vm2931_vm1 = vmor %vm2930_vm0, %vm2927_vm15 }
  0xf4   : > { %2428 = vmatpush1.bf16.msra.mxu0 %v3727_v19  ;;  %2471 = vmatpush1.bf16.msra.mxu1 %v3730_v20 }
  0xf5   : > { %2429 = vmatprep.subr.bf16.mxu0 %v3735_v21  ;;  %2472 = vmatprep.subr.bf16.mxu1 %v3738_v22  ;;  %v2809_v19 = vsub.s32 0, %v4798_v18  ;;  %v2817_v20 = vsub.s32 2, %v4798_v18  ;;  %v2813_v21 = vsub.s32 1, %v4798_v18  ;;  %v2821_v22 = vsub.s32 3, %v4798_v18 }
  0xf8   : > { %2430 = vmatpush1.bf16.msra.mxu0 %v3733_v24  ;;  %2473 = vmatpush1.bf16.msra.mxu1 %v3736_v25  ;;  %v2810_v24 = vrot.slane %v2805_v7, %v2809_v19  ;;  %v2818_v25 = vrot.slane %v2805_v7, %v2817_v20 }
  0xf9   : > { %2431 = vmatprep.subr.bf16.mxu0 %v3741_v26  ;;  %2474 = vmatprep.subr.bf16.mxu1 %v3744_v31  ;;  %v2814_v26 = vrot.slane %v2805_v7, %v2813_v21  ;;  %v2822_v31 = vrot.slane %v2805_v7, %v2821_v22 }
  0xfc   : > { %2432 = vmatpush1.bf16.msra.mxu0 %v3739_v27  ;;  %2475 = vmatpush1.bf16.msra.mxu1 %v3742_v28 }
  0xfd   : > { %2433 = vmatprep.subr.bf16.mxu0 %v3747_v30  ;;  %2476 = vmatprep.subr.bf16.mxu1 %v3750_v33 }
 0x100   : > { %2434 = vmatpush1.bf16.msra.mxu0 %v3745_v35  ;;  %2477 = vmatpush1.bf16.msra.mxu1 %v3748_v36 }
 0x101   : > { %2435 = vmatprep.subr.bf16.mxu0 %v3753_v38  ;;  %2478 = vmatprep.subr.bf16.mxu1 %v3756_v39 }
 0x104   : > { %2436 = vmatpush1.bf16.msra.mxu0 %v3751_v40  ;;  %2479 = vmatpush1.bf16.msra.mxu1 %v3754_v41 }
 0x105   : > { %2711 = vmatprep.subr.bf16.mxu0 %v3759_v45  ;;  %2754 = vmatprep.subr.bf16.mxu1 %v3762_v46 }
 0x107   : > { %2454 = vmatmul.mubr.bf16.vlgmr.msra.gmra.mrb[0].mxu0 %v2259_v50  ;;  %2497 = vmatmul.mubr.bf16.vlgmr.msra.gmra.mrb[0].mxu1 %v2259_v50 }
 0x108   : > { %2712 = vmatpush1.bf16.msra.mxu0 %v3757_v48  ;;  %2755 = vmatpush1.bf16.msra.mxu1 %v3760_v49 }
 0x109   : > { %2713 = vmatprep.subr.bf16.mxu0 %v3766_v51  ;;  %2756 = vmatprep.subr.bf16.mxu1 %v3769_v52 }
 0x10a   : > { %2743 = vmatprep.mubr.bf16.mxu0 %v3815_v2  ;;  %2786 = vmatprep.mubr.bf16.mxu1 %v3815_v2  ;;  %v3781_v2 = vld [vmem:[%s4840_s1 + $0x86c] ss:$16 sps:$4 sm:$0xff]  }
 0x10c   : > { %2714 = vmatpush1.bf16.msra.mxu0 %v3764_v53  ;;  %2757 = vmatpush1.bf16.msra.mxu1 %v3767_v54 }
 0x10d   : > { %2715 = vmatprep.subr.bf16.mxu0 %v3772_v55  ;;  %2758 = vmatprep.subr.bf16.mxu1 %v3775_v56 }
 0x110   : > { %2716 = vmatpush1.bf16.msra.mxu0 %v3770_v57  ;;  %2759 = vmatpush1.bf16.msra.mxu1 %v3773_v58 }
 0x111   : > { %2717 = vmatprep.subr.bf16.mxu0 %v3778_v59  ;;  %2760 = vmatprep.subr.bf16.mxu1 %v3781_v2 }
 0x114   : > { %2718 = vmatpush1.bf16.msra.mxu0 %v3776_v60  ;;  %2761 = vmatpush1.bf16.msra.mxu1 %v3779_v47 }
 0x115   : > { %2719 = vmatprep.subr.bf16.mxu0 %v3784_v61  ;;  %2762 = vmatprep.subr.bf16.mxu1 %v3787_v62 }
 0x118   : > { %2720 = vmatpush1.bf16.msra.mxu0 %v3782_v63  ;;  %2763 = vmatpush1.bf16.msra.mxu1 %v3785_v0 }
 0x119   : > { %2721 = vmatprep.subr.bf16.mxu0 %v3790_v1  ;;  %2764 = vmatprep.subr.bf16.mxu1 %v3793_v3 }
 0x11c   : > { %2722 = vmatpush1.bf16.msra.mxu0 %v3788_v4  ;;  %2765 = vmatpush1.bf16.msra.mxu1 %v3791_v5 }
 0x11d   : > { %2723 = vmatprep.subr.bf16.mxu0 %v3796_v6  ;;  %2766 = vmatprep.subr.bf16.mxu1 %v3799_v8 }
 0x120   : > { %2724 = vmatpush1.bf16.msra.mxu0 %v3794_v9  ;;  %2767 = vmatpush1.bf16.msra.mxu1 %v3797_v10 }
 0x121   : > { %2725 = vmatprep.subr.bf16.mxu0 %v3802_v43  ;;  %2768 = vmatprep.subr.bf16.mxu1 %v3805_v11  ;;  %v3816_v43 = vmov 1966171168  }
 0x122   : > { %v2895_v11 = vunpack.c.l.s4 %v3816_v43 }
 0x124   : > { %2726 = vmatpush1.bf16.msra.mxu0 %v3800_v12  ;;  %2769 = vmatpush1.bf16.msra.mxu1 %v3803_v13  ;;  %v2896_v22 = vunpack.c.0.s8 %v2895_v11 }
 0x127   : > { %2744 = vmatmul.mubr.bf16.vlgmr.msra.gmra.mrb[0].mxu0 %v2549_v16  ;;  %2787 = vmatmul.mubr.bf16.vlgmr.msra.gmra.mrb[0].mxu1 %v2549_v16 }
 0x1fa   : > { %v2745_v32 = vpop.f32.mrb[0].mxu0  ;;  %v2788_v27 = vpop.f32.mrb[0].mxu1 }
 0x1fb   : > { %v2827_v28 = vadd.f32 %v2810_v24, %v2745_v32  ;;  %v2829_v29 = vadd.f32 %v2818_v25, %v2788_v27  ;;  %v2747_v30 = vpop.f32.mrb[1].mxu0  ;;  %v2790_v33 = vpop.f32.mrb[1].mxu1 }
 0x1fc   : > { %v2828_v34 = vadd.f32 %v2814_v26, %v2747_v30  ;;  %v2830_v35 = vadd.f32 %v2822_v31, %v2790_v33  ;;  %v2749_v36 = vpop.f32.mrb[2].mxu0  ;;  %v2792_v23 = vpop.f32.mrb[2].mxu1  ;;  %v2899_v33 = vsub.s32 %v2896_v22, %v4798_v18 }
 0x1fd   : > { %v2835_v37 = vmax.f32 %v2827_v28, 0.0  ;;  %v2837_v38 = vmax.f32 %v2829_v29, 0.0  ;;  %v2831_v39 = vadd.f32 %v2810_v24, %v2749_v36  ;;  %v2833_v40 = vadd.f32 %v2818_v25, %v2792_v23  ;;  %v2751_v41 = vpop.f32.mrb[3].mxu0  ;;  %v2794_v42 = vpop.f32.mrb[3].mxu1 }
 0x1fe   : > { %v2836_v44 = vmax.f32 %v2828_v34, 0.0  ;;  %v2838_v45 = vmax.f32 %v2830_v35, 0.0  ;;  %v2832_v46 = vadd.f32 %v2814_v26, %v2751_v41  ;;  %v2834_v48 = vadd.f32 %v2822_v31, %v2794_v42 }
 0x1ff   : > { %v2839_v49 = vmax.f32 %v2831_v39, 0.0  ;;  %v2841_v50 = vmax.f32 %v2833_v40, 0.0  ;;  %v2844_v51 = vsel %vm2843_vm2, %v2835_v37, -inf  ;;  %v2850_v52 = vsel %vm2843_vm2, %v2837_v38, -inf  ;;  %v2932_v39 = vld [vmem:[%s168_s16] sm:$0xf] }
 0x200   : > { %v2840_v53 = vmax.f32 %v2832_v46, 0.0  ;;  %v2842_v54 = vmax.f32 %v2834_v48, 0.0  ;;  %v2847_v55 = vsel %vm2843_vm2, %v2836_v44, -inf  ;;  %v2853_v56 = vsel %vm2843_vm2, %v2838_v45, -inf }
 0x201   : > { %v2845_v57 = vsel %vm2843_vm2, %v2839_v49, -inf  ;;  %v2851_v58 = vsel %vm2843_vm2, %v2841_v50, -inf }
 0x202   : > { %v2846_v59 = vmax.f32 %v2844_v51, %v2845_v57  ;;  %v2852_v2 = vmax.f32 %v2850_v52, %v2851_v58  ;;  %v2848_v60 = vsel %vm2843_vm2, %v2840_v53, -inf  ;;  %v2854_v47 = vsel %vm2843_vm2, %v2842_v54, -inf }
 0x203   : > { %v2849_v61 = vmax.f32 %v2847_v55, %v2848_v60  ;;  %v2855_v62 = vmax.f32 %v2853_v56, %v2854_v47 }
 0x204   : > { %v2856_v63 = vsel %vm2843_vm2, %v2846_v59, -inf  ;;  %v2870_v0 = vsel %vm2843_vm2, %v2852_v2, -inf }
 0x205   : > { %v2857_v1 = vrot.slane %v2856_v63, 4  ;;  %v2871_v3 = vrot.slane %v2870_v0, 4  ;;  %v2863_v4 = vsel %vm2843_vm2, %v2849_v61, -inf  ;;  %v2877_v5 = vsel %vm2843_vm2, %v2855_v62, -inf }
 0x206   : > { %v2864_v6 = vrot.slane %v2863_v4, 4  ;;  %v2878_v8 = vrot.slane %v2877_v5, 4 }
 0x207   : > { %v2858_v9 = vmax.f32 %v2856_v63, %v2857_v1  ;;  %v2872_v10 = vmax.f32 %v2870_v0, %v2871_v3 }
 0x208   : > { %v2865_v12 = vmax.f32 %v2863_v4, %v2864_v6  ;;  %v2879_v13 = vmax.f32 %v2877_v5, %v2878_v8 }
 0x209   : > { %v2859_v14 = vrot.slane %v2858_v9, 2  ;;  %v2873_v15 = vrot.slane %v2872_v10, 2 }
 0x20a   : > { %v2866_v16 = vrot.slane %v2865_v12, 2  ;;  %v2880_v17 = vrot.slane %v2879_v13, 2 }
 0x20b   : > { %v2860_v19 = vmax.f32 %v2858_v9, %v2859_v14  ;;  %v2874_v20 = vmax.f32 %v2872_v10, %v2873_v15 }
 0x20c   : > { %v2867_v21 = vmax.f32 %v2865_v12, %v2866_v16  ;;  %v2881_v24 = vmax.f32 %v2879_v13, %v2880_v17 }
 0x20d   : > { %v2861_v26 = vrot.slane %v2860_v19, 1  ;;  %v2875_v31 = vrot.slane %v2874_v20, 1 }
 0x20e   : > { %v2868_v32 = vrot.slane %v2867_v21, 1  ;;  %v2882_v27 = vrot.slane %v2881_v24, 1 }
 0x20f   : > { %v2862_v28 = vmax.f32 %v2860_v19, %v2861_v26  ;;  %v2876_v29 = vmax.f32 %v2874_v20, %v2875_v31 }
 0x210   : > { %v2869_v30 = vmax.f32 %v2867_v21, %v2868_v32  ;;  %v2883_v34 = vmax.f32 %v2881_v24, %v2882_v27 }
 0x212   : > { %v3289_v35 = vpack.c.bf16 %v2869_v30, %v2862_v28  ;;  %v3290_v36 = vpack.c.bf16 %v2883_v34, %v2876_v29 }
 0x214   : > { %v2900_v23 = vrot.slane %v3289_v35, %v2899_v33  ;;  %v2907_v37 = vrot.slane %v3290_v36, %v2899_v33 }
 0x216   : > { %v2908_v38 = vcombine.low %v2900_v23, %v2907_v37 }
 0x218   : > { %v2915_v40 = vrot.slane %v2908_v38, %v2899_v33 }
 0x21a   : > { %v2933_v18 = vsel %vm2931_vm1, %v2915_v40, %v2932_v39 }
 0x21b   : > { %2934 = vst [vmem:[%s168_s16] sm:$0xf] %v2933_v18 }
 0x21c PF: > { %s13_s12 = sadd.s32 1, %s3813_s12  }
 0x21d   : > { %p10_p4 = scmp.ge.s32.totalorder %s13_s12, 4  }
 0x21f   :  { %12 = sbr.rel (!%p10_p4) target bundleno = 1 (0x1), region = 62 }

</bundles_post_ra>
